<compile_context>
chip_gen: v5e
topology: v5e:2x2
jax: 0.10.0
libtpu: 0.0.40
codegen_flags: <defaults>
</compile_context>

<pallas_src>
import functools

import jax
import jax.numpy as jnp
from jax import lax
from jax.experimental import pallas as pl
from jax.experimental.pallas import tpu as pltpu


def _block_kernel(x_ref, s1_ref, b1_ref, w1_ref, b2_ref, w2t_ref, out_ref,
                  *scratch, bt, H, W, C, cdt, use_im2col):
    """One grid step processes `bt` images.

    x_ref   : (bt, C, H*W)  f32  channel-major input block (bn1 + residual src)
    s1_ref  : (1, C, 1)     f32  folded bn1 scale
    b1_ref  : (1, C, 1)     f32  folded bn1 bias
    w1_ref  : (9*C, C)      cdt  conv1 weights (im2col layout, * bn2 scale)
    b2_ref  : (1, C)        f32  folded bn2 bias
    w2t_ref : (C, 9*C)      cdt  conv2 weights, transposed im2col layout
    out_ref : (bt, C, H*W)  f32  channel-major output block (free NCHW reshape)
    scratch : [pad1, pad2, col]           (small-C / im2col path)   or
              [pad1, pad2, acc1, acc2t]   (large-C / direct path)
    """
    HW = H * W
    M = bt * HW
    nt = (((1,), (1,)), ((), ()))   # A @ B^T : contract last dim of both operands

    if use_im2col:
        pad1_ref, pad2_ref, col_ref = scratch
    else:
        pad1_ref, pad2_ref, acc1_ref, acc2_ref = scratch

    def zero_halo(pad_ref):
        # Cleared every step (not only on step 0): under megacore the
        # "parallel" batch axis is split across TensorCores, each with its own
        # scratch, and only one core ever sees program_id(0) == 0 — a
        # once-only init would leave the other core's halo uninitialized.
        zr = jnp.zeros((bt, 1, W + 2, C), cdt)
        zc = jnp.zeros((bt, H + 2, 1, C), cdt)
        pad_ref[:, 0:1, :, :] = zr
        pad_ref[:, H + 1:H + 2, :, :] = zr
        pad_ref[:, :, 0:1, :] = zc
        pad_ref[:, :, W + 1:W + 2, :] = zc

    zero_halo(pad1_ref)
    zero_halo(pad2_ref)

    # ---- bn1 + relu1 (f32, channel-major: C on sublanes, H*W on lanes) ----
    a1_cm = jnp.maximum(x_ref[...] * s1_ref[...] + b1_ref[...], 0.0)

    # One in-VMEM transpose per image (channel-major -> NHWC) feeds the conv;
    # this replaces the second full f32 HBM copy of x the old version shipped.
    for b in range(bt):
        pad1_ref[b, 1:H + 1, 1:W + 1, :] = (
            a1_cm[b].T.reshape(H, W, C).astype(cdt))

    # ---- conv1 (bn2 scale already folded into w1) -> y1 (M, C) f32 ----
    if use_im2col:
        for kh in range(3):
            for kw in range(3):
                c0 = (kh * 3 + kw) * C
                col_ref[:, c0:c0 + C] = (
                    pad1_ref[:, kh:kh + H, kw:kw + W, :].reshape(M, C))
        y1 = jnp.dot(col_ref[...], w1_ref[...],
                     preferred_element_type=jnp.float32)
    else:
        for kh in range(3):
            for kw in range(3):
                c0 = (kh * 3 + kw) * C
                slab = pad1_ref[:, kh:kh + H, kw:kw + W, :].reshape(M, C)
                part = jnp.dot(slab, w1_ref[c0:c0 + C, :],
                               preferred_element_type=jnp.float32)
                if kh == 0 and kw == 0:
                    acc1_ref[...] = part
                else:
                    acc1_ref[...] += part
        y1 = acc1_ref[...]

    # ---- bn2 bias + relu2 ----
    a2 = jnp.maximum(y1 + b2_ref[...], 0.0)
    pad2_ref[:, 1:H + 1, 1:W + 1, :] = a2.reshape(bt, H, W, C).astype(cdt)

    # ---- conv2, computed transposed -> y2t (C, M) f32 (no .T on col) ----
    if use_im2col:
        for kh in range(3):
            for kw in range(3):
                c0 = (kh * 3 + kw) * C
                col_ref[:, c0:c0 + C] = (
                    pad2_ref[:, kh:kh + H, kw:kw + W, :].reshape(M, C))
        y2t = lax.dot_general(w2t_ref[...], col_ref[...], nt,
                              preferred_element_type=jnp.float32)
    else:
        for kh in range(3):
            for kw in range(3):
                c0 = (kh * 3 + kw) * C
                slab = pad2_ref[:, kh:kh + H, kw:kw + W, :].reshape(M, C)
                part = lax.dot_general(w2t_ref[:, c0:c0 + C], slab, nt,
                                       preferred_element_type=jnp.float32)
                if kh == 0 and kw == 0:
                    acc2_ref[...] = part
                else:
                    acc2_ref[...] += part
        y2t = acc2_ref[...]

    # ---- residual add + per-image lane-dense (C, H*W) stores ----
    for b in range(bt):
        out_ref[b] = (y2t[:, b * HW:(b + 1) * HW] + x_ref[b]).astype(out_ref.dtype)


def dnas_pre_basic_block_forward(x_nchw, tau, params, *,
                                 compute_dtype=jnp.bfloat16,
                                 block_batch=None,
                                 im2col_channel_threshold=128,
                                 vmem_budget_bytes=40 * 1024 * 1024):
    """Mirrors DNASPreBasicBlockMemory.forward on its first call
    (init_state=False, both_preact, stride=1, no downsample). Returns [out, tau].
    """
    eps = 1e-5
    # Fold BatchNorm (inference form: running stats) into scale/bias.
    s1 = params["bn1_gamma"] / jnp.sqrt(params["bn1_var"] + eps)
    b1 = params["bn1_beta"] - params["bn1_mean"] * s1
    s2 = params["bn2_gamma"] / jnp.sqrt(params["bn2_var"] + eps)
    b2 = params["bn2_beta"] - params["bn2_mean"] * s2

    x_nchw = x_nchw.astype(jnp.float32)
    N, Cin, H, W = x_nchw.shape
    w1 = params["conv1_w"]            # (3, 3, Cin, Cout) HWIO
    w2 = params["conv2_w"]            # (3, 3, Cout, Cout)
    Cout = w1.shape[-1]
    assert Cin == Cout, "no-downsample block requires in_plane == out_plane"
    C = Cout
    HW = H * W

    # Fold bn2's scale into conv1's output channels (host side), reshape the
    # conv weights into im2col layout, cast matmul operands to compute dtype.
    w1f = (w1 * s2[None, None, None, :]).reshape(9 * C, C).astype(compute_dtype)
    w2tf = jnp.transpose(w2.reshape(9 * C, C)).astype(compute_dtype)   # (C, 9C)

    use_im2col = C < im2col_channel_threshold
    cdt_bytes = jnp.dtype(compute_dtype).itemsize

    def vmem_need(bt):
        x_blk = 2 * bt * C * HW * 4                       # double-buffered in
        o_blk = 2 * bt * C * HW * 4                       # double-buffered out
        wts = 2 * 2 * 9 * C * C * cdt_bytes               # 2 weight mats, x2 buf
        pads = 2 * bt * (H + 2) * (W + 2) * C * cdt_bytes
        scr = (bt * HW * 9 * C * cdt_bytes if use_im2col
               else 2 * bt * HW * C * 4)
        return x_blk + o_blk + wts + pads + scr

    # Block-batch: amortize per-grid-step overhead / grow GEMM M, stay under
    # the VMEM budget, and keep >=2 grid steps so megacore parts can shard
    # the batch axis.
    # TODO(synk): very large spatial sizes with bt=1 may still exceed the VMEM
    #             budget; a second grid axis over row-strips (halo handling)
    #             would bound M in that case.
    if block_batch is None:
        block_batch = 1
        for cand in (8, 4, 2):
            if (N % cand == 0 and N // cand >= 2
                    and vmem_need(cand) <= vmem_budget_bytes):
                block_batch = cand
                break
    assert N % block_batch == 0
    bt = block_batch
    grid_n = N // bt

    # Channel-major flat views: genuinely free reshapes of NCHW in and out.
    x_cm = x_nchw.reshape(N, C, HW)
    s1r = s1.reshape(1, C, 1).astype(jnp.float32)
    b1r = b1.reshape(1, C, 1).astype(jnp.float32)
    b2r = b2.reshape(1, C).astype(jnp.float32)

    scratch = [pltpu.VMEM((bt, H + 2, W + 2, C), compute_dtype),
               pltpu.VMEM((bt, H + 2, W + 2, C), compute_dtype)]
    if use_im2col:
        scratch.append(pltpu.VMEM((bt * HW, 9 * C), compute_dtype))
    else:
        scratch.append(pltpu.VMEM((bt * HW, C), jnp.float32))
        scratch.append(pltpu.VMEM((C, bt * HW), jnp.float32))

    kernel = functools.partial(_block_kernel, bt=bt, H=H, W=W, C=C,
                               cdt=compute_dtype, use_im2col=use_im2col)

    vmem_limit = int(min(max(2 * vmem_need(bt), 32 << 20), 56 << 20))

    out_cm = pl.pallas_call(
        kernel,
        out_shape=jax.ShapeDtypeStruct((N, C, HW), jnp.float32),
        grid_spec=pltpu.PrefetchScalarGridSpec(
            num_scalar_prefetch=0,
            grid=(grid_n,),
            in_specs=[
                pl.BlockSpec((bt, C, HW), lambda n: (n, 0, 0)),
                pl.BlockSpec((1, C, 1), lambda n: (0, 0, 0)),
                pl.BlockSpec((1, C, 1), lambda n: (0, 0, 0)),
                pl.BlockSpec((9 * C, C), lambda n: (0, 0)),
                pl.BlockSpec((1, C), lambda n: (0, 0)),
                pl.BlockSpec((C, 9 * C), lambda n: (0, 0)),
            ],
            out_specs=pl.BlockSpec((bt, C, HW), lambda n: (n, 0, 0)),
            scratch_shapes=scratch,
        ),
        compiler_params=pltpu.CompilerParams(
            dimension_semantics=("parallel",),
            vmem_limit_bytes=vmem_limit),
    )(x_cm, s1r, b1r, w1f, b2r, w2tf)

    return [out_cm.reshape(N, C, H, W), tau]


def _reference_forward(x_nchw, tau, params, compute_dtype=jnp.float32):
    """Pure-JAX reference (lax conv). `compute_dtype` quantizes the conv
    operands exactly like the kernel's compute path (f32 accumulation)."""
    eps = 1e-5
    s1 = params["bn1_gamma"] / jnp.sqrt(params["bn1_var"] + eps)
    b1 = params["bn1_beta"] - params["bn1_mean"] * s1
    s2 = params["bn2_gamma"] / jnp.sqrt(params["bn2_var"] + eps)
    b2 = params["bn2_beta"] - params["bn2_mean"] * s2

    x = jnp.transpose(x_nchw, (0, 2, 3, 1)).astype(jnp.float32)
    w1f = (params["conv1_w"] * s2[None, None, None, :]).astype(compute_dtype)
    w2f = params["conv2_w"].astype(compute_dtype)

    a1 = jnp.maximum(x * s1 + b1, 0.0).astype(compute_dtype)
    y1 = lax.conv_general_dilated(
        a1, w1f, window_strides=(1, 1), padding="SAME",
        dimension_numbers=("NHWC", "HWIO", "NHWC"),
        preferred_element_type=jnp.float32)
    a2 = jnp.maximum(y1 + b2, 0.0).astype(compute_dtype)
    y2 = lax.conv_general_dilated(
        a2, w2f, window_strides=(1, 1), padding="SAME",
        dimension_numbers=("NHWC", "HWIO", "NHWC"),
        preferred_element_type=jnp.float32)
    out = y2 + x
    return [jnp.transpose(out, (0, 3, 1, 2)), tau]


def make_params(key, in_plane, out_plane):
    ks = jax.random.split(key, 10)
    fan1 = 3 * 3 * in_plane
    fan2 = 3 * 3 * out_plane
    return {
        "bn1_gamma": 1.0 + 0.1 * jax.random.normal(ks[0], (in_plane,), jnp.float32),
        "bn1_beta": 0.1 * jax.random.normal(ks[1], (in_plane,), jnp.float32),
        "bn1_mean": 0.1 * jax.random.normal(ks[2], (in_plane,), jnp.float32),
        "bn1_var": jnp.abs(jax.random.normal(ks[3], (in_plane,), jnp.float32)) + 0.5,
        "bn2_gamma": 1.0 + 0.1 * jax.random.normal(ks[4], (out_plane,), jnp.float32),
        "bn2_beta": 0.1 * jax.random.normal(ks[5], (out_plane,), jnp.float32),
        "bn2_mean": 0.1 * jax.random.normal(ks[6], (out_plane,), jnp.float32),
        "bn2_var": jnp.abs(jax.random.normal(ks[7], (out_plane,), jnp.float32)) + 0.5,
        # HWIO conv weights, kaiming-ish scale
        "conv1_w": jax.random.normal(ks[8], (3, 3, in_plane, out_plane), jnp.float32)
                   * (2.0 / fan1) ** 0.5,
        "conv2_w": jax.random.normal(ks[9], (3, 3, out_plane, out_plane), jnp.float32)
                   * (2.0 / fan2) ** 0.5,
    }


if __name__ == "__main__":
    key = jax.random.PRNGKey(0)
    k_x, k_p = jax.random.split(key)

    N, C, H, W = 2, 4, 16, 16   # in_plane == out_plane, stride=1, no downsample
    x = jax.random.normal(k_x, (N, C, H, W), jnp.float32)
    tau = jnp.float32(5.0)
    params = make_params(k_p, C, C)

    ref_f32, _ = _reference_forward(x, tau, params, jnp.float32)
    ref_f32 = jax.block_until_ready(ref_f32)

    # 1) exactness check, small-C (im2col) path, f32 compute.
    out_f32, _ = dnas_pre_basic_block_forward(x, tau, params,
                                              compute_dtype=jnp.float32)
    out_f32 = jax.block_until_ready(out_f32)
    assert out_f32.shape == (N, C, H, W)
    assert jnp.allclose(out_f32, ref_f32, atol=1e-4, rtol=1e-4), (
        float(jnp.max(jnp.abs(out_f32 - ref_f32))))

    # 2) exercise the large-C (direct, no-im2col) path too, f32 compute.
    out_dir, _ = dnas_pre_basic_block_forward(x, tau, params,
                                              compute_dtype=jnp.float32,
                                              im2col_channel_threshold=0)
    out_dir = jax.block_until_ready(out_dir)
    assert jnp.allclose(out_dir, ref_f32, atol=1e-4, rtol=1e-4), (
        float(jnp.max(jnp.abs(out_dir - ref_f32))))

    # 3) performance path: bf16 matmul operands (f32 accumulation), checked
    #    against a reference that quantizes its conv operands the same way.
    out_bf16, tau_out = dnas_pre_basic_block_forward(x, tau, params,
                                                     compute_dtype=jnp.bfloat16)
    out_bf16 = jax.block_until_ready(out_bf16)
    ref_bf16, _ = _reference_forward(x, tau, params, jnp.bfloat16)
    ref_bf16 = jax.block_until_ready(ref_bf16)
    assert out_bf16.shape == (N, C, H, W)
    assert jnp.allclose(out_bf16, ref_bf16, atol=1e-2, rtol=1e-2), (
        float(jnp.max(jnp.abs(out_bf16 - ref_bf16))))
    assert float(tau_out) == 5.0

    print("KERNEL_OK")
</pallas_src>

<mosaic_0001>
module attributes {stable_mosaic.version = 11 : i64} {
  func.func @_block_kernel(%arg0: i32, %arg1: memref<1x4x256xf32, #tpu.memory_space<vmem>>, %arg2: memref<1x4x1xf32, #tpu.memory_space<vmem>>, %arg3: memref<1x4x1xf32, #tpu.memory_space<vmem>>, %arg4: memref<36x4xf32, #tpu.memory_space<vmem>>, %arg5: memref<1x4xf32, #tpu.memory_space<vmem>>, %arg6: memref<4x36xf32, #tpu.memory_space<vmem>>, %arg7: memref<1x4x256xf32, #tpu.memory_space<vmem>>, %arg8: memref<1x18x18x4xf32, #tpu.memory_space<vmem>>, %arg9: memref<1x18x18x4xf32, #tpu.memory_space<vmem>>, %arg10: memref<256x36xf32, #tpu.memory_space<vmem>>) attributes {dimension_semantics = [#tpu.dimension_semantics<parallel>], iteration_bounds = array<i64: 2>, scalar_prefetch = 0 : i64, scratch_operands = 3 : i64, tpu.core_type = #tpu.core_type<tc>, window_params = [{transform_indices = @transform_0, window_bounds = array<i64: 1, 4, 256>}, {pipeline_mode = #tpu.pipeline_mode<synchronous>, transform_indices = @transform_1, window_bounds = array<i64: 1, 4, 1>}, {pipeline_mode = #tpu.pipeline_mode<synchronous>, transform_indices = @transform_2, window_bounds = array<i64: 1, 4, 1>}, {pipeline_mode = #tpu.pipeline_mode<synchronous>, transform_indices = @transform_3, window_bounds = array<i64: 36, 4>}, {pipeline_mode = #tpu.pipeline_mode<synchronous>, transform_indices = @transform_4, window_bounds = array<i64: 1, 4>}, {pipeline_mode = #tpu.pipeline_mode<synchronous>, transform_indices = @transform_5, window_bounds = array<i64: 4, 36>}, {transform_indices = @transform_6, window_bounds = array<i64: 1, 4, 256>}]} {
    %cst = arith.constant 0.000000e+00 : f32
    %0 = vector.broadcast %cst : f32 to vector<1x1x18x4xf32>
    %cst_0 = arith.constant 0.000000e+00 : f32
    %1 = vector.broadcast %cst_0 : f32 to vector<1x18x1x4xf32>
    %c0 = arith.constant 0 : index
    %c0_1 = arith.constant 0 : index
    %c0_2 = arith.constant 0 : index
    %c0_3 = arith.constant 0 : index
    %2 = vector.load %arg8[%c0, %c0_1, %c0_2, %c0_3] : memref<1x18x18x4xf32, #tpu.memory_space<vmem>>, vector<1x1x18x4xf32>
    tpu.vector_store %arg8[%c0, %c0_1, %c0_2, %c0_3], %0 {strides = array<i32>} : memref<1x18x18x4xf32, #tpu.memory_space<vmem>>, vector<1x1x18x4xf32>,
    %c0_4 = arith.constant 0 : index
    %c17 = arith.constant 17 : index
    %c0_5 = arith.constant 0 : index
    %c0_6 = arith.constant 0 : index
    %3 = vector.load %arg8[%c0_4, %c17, %c0_5, %c0_6] : memref<1x18x18x4xf32, #tpu.memory_space<vmem>>, vector<1x1x18x4xf32>
    tpu.vector_store %arg8[%c0_4, %c17, %c0_5, %c0_6], %0 {strides = array<i32>} : memref<1x18x18x4xf32, #tpu.memory_space<vmem>>, vector<1x1x18x4xf32>,
    %c0_7 = arith.constant 0 : index
    %c0_8 = arith.constant 0 : index
    %c0_9 = arith.constant 0 : index
    %c0_10 = arith.constant 0 : index
    %4 = vector.load %arg8[%c0_7, %c0_8, %c0_9, %c0_10] : memref<1x18x18x4xf32, #tpu.memory_space<vmem>>, vector<1x18x1x4xf32>
    tpu.vector_store %arg8[%c0_7, %c0_8, %c0_9, %c0_10], %1 {strides = array<i32>} : memref<1x18x18x4xf32, #tpu.memory_space<vmem>>, vector<1x18x1x4xf32>,
    %c0_11 = arith.constant 0 : index
    %c0_12 = arith.constant 0 : index
    %c17_13 = arith.constant 17 : index
    %c0_14 = arith.constant 0 : index
    %5 = vector.load %arg8[%c0_11, %c0_12, %c17_13, %c0_14] : memref<1x18x18x4xf32, #tpu.memory_space<vmem>>, vector<1x18x1x4xf32>
    tpu.vector_store %arg8[%c0_11, %c0_12, %c17_13, %c0_14], %1 {strides = array<i32>} : memref<1x18x18x4xf32, #tpu.memory_space<vmem>>, vector<1x18x1x4xf32>,
    %cst_15 = arith.constant 0.000000e+00 : f32
    %6 = vector.broadcast %cst_15 : f32 to vector<1x1x18x4xf32>
    %cst_16 = arith.constant 0.000000e+00 : f32
    %7 = vector.broadcast %cst_16 : f32 to vector<1x18x1x4xf32>
    %c0_17 = arith.constant 0 : index
    %c0_18 = arith.constant 0 : index
    %c0_19 = arith.constant 0 : index
    %c0_20 = arith.constant 0 : index
    %8 = vector.load %arg9[%c0_17, %c0_18, %c0_19, %c0_20] : memref<1x18x18x4xf32, #tpu.memory_space<vmem>>, vector<1x1x18x4xf32>
    tpu.vector_store %arg9[%c0_17, %c0_18, %c0_19, %c0_20], %6 {strides = array<i32>} : memref<1x18x18x4xf32, #tpu.memory_space<vmem>>, vector<1x1x18x4xf32>,
    %c0_21 = arith.constant 0 : index
    %c17_22 = arith.constant 17 : index
    %c0_23 = arith.constant 0 : index
    %c0_24 = arith.constant 0 : index
    %9 = vector.load %arg9[%c0_21, %c17_22, %c0_23, %c0_24] : memref<1x18x18x4xf32, #tpu.memory_space<vmem>>, vector<1x1x18x4xf32>
    tpu.vector_store %arg9[%c0_21, %c17_22, %c0_23, %c0_24], %6 {strides = array<i32>} : memref<1x18x18x4xf32, #tpu.memory_space<vmem>>, vector<1x1x18x4xf32>,
    %c0_25 = arith.constant 0 : index
    %c0_26 = arith.constant 0 : index
    %c0_27 = arith.constant 0 : index
    %c0_28 = arith.constant 0 : index
    %10 = vector.load %arg9[%c0_25, %c0_26, %c0_27, %c0_28] : memref<1x18x18x4xf32, #tpu.memory_space<vmem>>, vector<1x18x1x4xf32>
    tpu.vector_store %arg9[%c0_25, %c0_26, %c0_27, %c0_28], %7 {strides = array<i32>} : memref<1x18x18x4xf32, #tpu.memory_space<vmem>>, vector<1x18x1x4xf32>,
    %c0_29 = arith.constant 0 : index
    %c0_30 = arith.constant 0 : index
    %c17_31 = arith.constant 17 : index
    %c0_32 = arith.constant 0 : index
    %11 = vector.load %arg9[%c0_29, %c0_30, %c17_31, %c0_32] : memref<1x18x18x4xf32, #tpu.memory_space<vmem>>, vector<1x18x1x4xf32>
    tpu.vector_store %arg9[%c0_29, %c0_30, %c17_31, %c0_32], %7 {strides = array<i32>} : memref<1x18x18x4xf32, #tpu.memory_space<vmem>>, vector<1x18x1x4xf32>,
    %c0_33 = arith.constant 0 : index
    %c0_34 = arith.constant 0 : index
    %c0_35 = arith.constant 0 : index
    %12 = vector.load %arg1[%c0_33, %c0_34, %c0_35] : memref<1x4x256xf32, #tpu.memory_space<vmem>>, vector<1x4x256xf32>
    %c0_36 = arith.constant 0 : index
    %c0_37 = arith.constant 0 : index
    %c0_38 = arith.constant 0 : index
    %13 = vector.load %arg2[%c0_36, %c0_37, %c0_38] : memref<1x4x1xf32, #tpu.memory_space<vmem>>, vector<1x4x1xf32>
    %14 = vector.broadcast %13 : vector<1x4x1xf32> to vector<1x4x256xf32>
    %15 = arith.mulf %12, %14 : vector<1x4x256xf32>
    %c0_39 = arith.constant 0 : index
    %c0_40 = arith.constant 0 : index
    %c0_41 = arith.constant 0 : index
    %16 = vector.load %arg3[%c0_39, %c0_40, %c0_41] : memref<1x4x1xf32, #tpu.memory_space<vmem>>, vector<1x4x1xf32>
    %17 = vector.broadcast %16 : vector<1x4x1xf32> to vector<1x4x256xf32>
    %18 = arith.addf %15, %17 : vector<1x4x256xf32>
    %cst_42 = arith.constant 0.000000e+00 : f32
    %19 = vector.broadcast %cst_42 : f32 to vector<1x4x256xf32>
    %20 = arith.maximumf %18, %19 : vector<1x4x256xf32>
    %21 = vector.shape_cast %20 : vector<1x4x256xf32> to vector<4x256xf32>
    %22 = tpu.transpose %21, [1, 0] : vector<4x256xf32> -> vector<256x4xf32>
    %23 = vector.shape_cast %22 : vector<256x4xf32> to vector<16x16x4xf32>
    %c0_43 = arith.constant 0 : index
    %c1 = arith.constant 1 : index
    %c1_44 = arith.constant 1 : index
    %c0_45 = arith.constant 0 : index
    %24 = vector.load %arg8[%c0_43, %c1, %c1_44, %c0_45] : memref<1x18x18x4xf32, #tpu.memory_space<vmem>>, vector<1x16x16x4xf32>
    %25 = vector.shape_cast %24 : vector<1x16x16x4xf32> to vector<16x16x4xf32>
    %26 = vector.shape_cast %23 : vector<16x16x4xf32> to vector<1x16x16x4xf32>
    tpu.vector_store %arg8[%c0_43, %c1, %c1_44, %c0_45], %26 {strides = array<i32>} : memref<1x18x18x4xf32, #tpu.memory_space<vmem>>, vector<1x16x16x4xf32>,
    %c0_46 = arith.constant 0 : index
    %c0_47 = arith.constant 0 : index
    %c0_48 = arith.constant 0 : index
    %c0_49 = arith.constant 0 : index
    %27 = vector.load %arg8[%c0_46, %c0_47, %c0_48, %c0_49] : memref<1x18x18x4xf32, #tpu.memory_space<vmem>>, vector<1x16x16x4xf32>
    %28 = vector.shape_cast %27 : vector<1x16x16x4xf32> to vector<256x4xf32>
    %c0_50 = arith.constant 0 : index
    %c0_51 = arith.constant 0 : index
    %29 = vector.load %arg10[%c0_50, %c0_51] : memref<256x36xf32, #tpu.memory_space<vmem>>, vector<256x4xf32>
    tpu.vector_store %arg10[%c0_50, %c0_51], %28 {strides = array<i32>} : memref<256x36xf32, #tpu.memory_space<vmem>>, vector<256x4xf32>,
    %c0_52 = arith.constant 0 : index
    %c0_53 = arith.constant 0 : index
    %c1_54 = arith.constant 1 : index
    %c0_55 = arith.constant 0 : index
    %30 = vector.load %arg8[%c0_52, %c0_53, %c1_54, %c0_55] : memref<1x18x18x4xf32, #tpu.memory_space<vmem>>, vector<1x16x16x4xf32>
    %31 = vector.shape_cast %30 : vector<1x16x16x4xf32> to vector<256x4xf32>
    %c0_56 = arith.constant 0 : index
    %c4 = arith.constant 4 : index
    %32 = vector.load %arg10[%c0_56, %c4] : memref<256x36xf32, #tpu.memory_space<vmem>>, vector<256x4xf32>
    tpu.vector_store %arg10[%c0_56, %c4], %31 {strides = array<i32>} : memref<256x36xf32, #tpu.memory_space<vmem>>, vector<256x4xf32>,
    %c0_57 = arith.constant 0 : index
    %c0_58 = arith.constant 0 : index
    %c2 = arith.constant 2 : index
    %c0_59 = arith.constant 0 : index
    %33 = vector.load %arg8[%c0_57, %c0_58, %c2, %c0_59] : memref<1x18x18x4xf32, #tpu.memory_space<vmem>>, vector<1x16x16x4xf32>
    %34 = vector.shape_cast %33 : vector<1x16x16x4xf32> to vector<256x4xf32>
    %c0_60 = arith.constant 0 : index
    %c8 = arith.constant 8 : index
    %35 = vector.load %arg10[%c0_60, %c8] : memref<256x36xf32, #tpu.memory_space<vmem>>, vector<256x4xf32>
    tpu.vector_store %arg10[%c0_60, %c8], %34 {strides = array<i32>} : memref<256x36xf32, #tpu.memory_space<vmem>>, vector<256x4xf32>,
    %c0_61 = arith.constant 0 : index
    %c1_62 = arith.constant 1 : index
    %c0_63 = arith.constant 0 : index
    %c0_64 = arith.constant 0 : index
    %36 = vector.load %arg8[%c0_61, %c1_62, %c0_63, %c0_64] : memref<1x18x18x4xf32, #tpu.memory_space<vmem>>, vector<1x16x16x4xf32>
    %37 = vector.shape_cast %36 : vector<1x16x16x4xf32> to vector<256x4xf32>
    %c0_65 = arith.constant 0 : index
    %c12 = arith.constant 12 : index
    %38 = vector.load %arg10[%c0_65, %c12] : memref<256x36xf32, #tpu.memory_space<vmem>>, vector<256x4xf32>
    tpu.vector_store %arg10[%c0_65, %c12], %37 {strides = array<i32>} : memref<256x36xf32, #tpu.memory_space<vmem>>, vector<256x4xf32>,
    %c0_66 = arith.constant 0 : index
    %c1_67 = arith.constant 1 : index
    %c1_68 = arith.constant 1 : index
    %c0_69 = arith.constant 0 : index
    %39 = vector.load %arg8[%c0_66, %c1_67, %c1_68, %c0_69] : memref<1x18x18x4xf32, #tpu.memory_space<vmem>>, vector<1x16x16x4xf32>
    %40 = vector.shape_cast %39 : vector<1x16x16x4xf32> to vector<256x4xf32>
    %c0_70 = arith.constant 0 : index
    %c16 = arith.constant 16 : index
    %41 = vector.load %arg10[%c0_70, %c16] : memref<256x36xf32, #tpu.memory_space<vmem>>, vector<256x4xf32>
    tpu.vector_store %arg10[%c0_70, %c16], %40 {strides = array<i32>} : memref<256x36xf32, #tpu.memory_space<vmem>>, vector<256x4xf32>,
    %c0_71 = arith.constant 0 : index
    %c1_72 = arith.constant 1 : index
    %c2_73 = arith.constant 2 : index
    %c0_74 = arith.constant 0 : index
    %42 = vector.load %arg8[%c0_71, %c1_72, %c2_73, %c0_74] : memref<1x18x18x4xf32, #tpu.memory_space<vmem>>, vector<1x16x16x4xf32>
    %43 = vector.shape_cast %42 : vector<1x16x16x4xf32> to vector<256x4xf32>
    %c0_75 = arith.constant 0 : index
    %c20 = arith.constant 20 : index
    %44 = vector.load %arg10[%c0_75, %c20] : memref<256x36xf32, #tpu.memory_space<vmem>>, vector<256x4xf32>
    tpu.vector_store %arg10[%c0_75, %c20], %43 {strides = array<i32>} : memref<256x36xf32, #tpu.memory_space<vmem>>, vector<256x4xf32>,
    %c0_76 = arith.constant 0 : index
    %c2_77 = arith.constant 2 : index
    %c0_78 = arith.constant 0 : index
    %c0_79 = arith.constant 0 : index
    %45 = vector.load %arg8[%c0_76, %c2_77, %c0_78, %c0_79] : memref<1x18x18x4xf32, #tpu.memory_space<vmem>>, vector<1x16x16x4xf32>
    %46 = vector.shape_cast %45 : vector<1x16x16x4xf32> to vector<256x4xf32>
    %c0_80 = arith.constant 0 : index
    %c24 = arith.constant 24 : index
    %47 = vector.load %arg10[%c0_80, %c24] : memref<256x36xf32, #tpu.memory_space<vmem>>, vector<256x4xf32>
    tpu.vector_store %arg10[%c0_80, %c24], %46 {strides = array<i32>} : memref<256x36xf32, #tpu.memory_space<vmem>>, vector<256x4xf32>,
    %c0_81 = arith.constant 0 : index
    %c2_82 = arith.constant 2 : index
    %c1_83 = arith.constant 1 : index
    %c0_84 = arith.constant 0 : index
    %48 = vector.load %arg8[%c0_81, %c2_82, %c1_83, %c0_84] : memref<1x18x18x4xf32, #tpu.memory_space<vmem>>, vector<1x16x16x4xf32>
    %49 = vector.shape_cast %48 : vector<1x16x16x4xf32> to vector<256x4xf32>
    %c0_85 = arith.constant 0 : index
    %c28 = arith.constant 28 : index
    %50 = vector.load %arg10[%c0_85, %c28] : memref<256x36xf32, #tpu.memory_space<vmem>>, vector<256x4xf32>
    tpu.vector_store %arg10[%c0_85, %c28], %49 {strides = array<i32>} : memref<256x36xf32, #tpu.memory_space<vmem>>, vector<256x4xf32>,
    %c0_86 = arith.constant 0 : index
    %c2_87 = arith.constant 2 : index
    %c2_88 = arith.constant 2 : index
    %c0_89 = arith.constant 0 : index
    %51 = vector.load %arg8[%c0_86, %c2_87, %c2_88, %c0_89] : memref<1x18x18x4xf32, #tpu.memory_space<vmem>>, vector<1x16x16x4xf32>
    %52 = vector.shape_cast %51 : vector<1x16x16x4xf32> to vector<256x4xf32>
    %c0_90 = arith.constant 0 : index
    %c32 = arith.constant 32 : index
    %53 = vector.load %arg10[%c0_90, %c32] : memref<256x36xf32, #tpu.memory_space<vmem>>, vector<256x4xf32>
    tpu.vector_store %arg10[%c0_90, %c32], %52 {strides = array<i32>} : memref<256x36xf32, #tpu.memory_space<vmem>>, vector<256x4xf32>,
    %c0_91 = arith.constant 0 : index
    %c0_92 = arith.constant 0 : index
    %54 = vector.load %arg10[%c0_91, %c0_92] : memref<256x36xf32, #tpu.memory_space<vmem>>, vector<256x36xf32>
    %c0_93 = arith.constant 0 : index
    %c0_94 = arith.constant 0 : index
    %55 = vector.load %arg4[%c0_93, %c0_94] : memref<36x4xf32, #tpu.memory_space<vmem>>, vector<36x4xf32>
    %cst_95 = arith.constant dense<0.000000e+00> : vector<256x4xf32>
    %56 = tpu.matmul %54, %55, %cst_95 {dimension_numbers = #tpu.dot_dimension_numbers<[1], [0], [0], [1], [0, 0, 1, 1], [], []>} : vector<256x36xf32>, vector<36x4xf32>, vector<256x4xf32> -> vector<256x4xf32>
    %c0_96 = arith.constant 0 : index
    %c0_97 = arith.constant 0 : index
    %57 = vector.load %arg5[%c0_96, %c0_97] : memref<1x4xf32, #tpu.memory_space<vmem>>, vector<1x4xf32>
    %58 = vector.broadcast %57 : vector<1x4xf32> to vector<256x4xf32>
    %59 = arith.addf %56, %58 : vector<256x4xf32>
    %cst_98 = arith.constant 0.000000e+00 : f32
    %60 = vector.broadcast %cst_98 : f32 to vector<256x4xf32>
    %61 = arith.maximumf %59, %60 : vector<256x4xf32>
    %62 = vector.shape_cast %61 : vector<256x4xf32> to vector<1x16x16x4xf32>
    %c0_99 = arith.constant 0 : index
    %c1_100 = arith.constant 1 : index
    %c1_101 = arith.constant 1 : index
    %c0_102 = arith.constant 0 : index
    %63 = vector.load %arg9[%c0_99, %c1_100, %c1_101, %c0_102] : memref<1x18x18x4xf32, #tpu.memory_space<vmem>>, vector<1x16x16x4xf32>
    tpu.vector_store %arg9[%c0_99, %c1_100, %c1_101, %c0_102], %62 {strides = array<i32>} : memref<1x18x18x4xf32, #tpu.memory_space<vmem>>, vector<1x16x16x4xf32>,
    %c0_103 = arith.constant 0 : index
    %c0_104 = arith.constant 0 : index
    %c0_105 = arith.constant 0 : index
    %c0_106 = arith.constant 0 : index
    %64 = vector.load %arg9[%c0_103, %c0_104, %c0_105, %c0_106] : memref<1x18x18x4xf32, #tpu.memory_space<vmem>>, vector<1x16x16x4xf32>
    %65 = vector.shape_cast %64 : vector<1x16x16x4xf32> to vector<256x4xf32>
    %c0_107 = arith.constant 0 : index
    %c0_108 = arith.constant 0 : index
    %66 = vector.load %arg10[%c0_107, %c0_108] : memref<256x36xf32, #tpu.memory_space<vmem>>, vector<256x4xf32>
    tpu.vector_store %arg10[%c0_107, %c0_108], %65 {strides = array<i32>} : memref<256x36xf32, #tpu.memory_space<vmem>>, vector<256x4xf32>,
    %c0_109 = arith.constant 0 : index
    %c0_110 = arith.constant 0 : index
    %c1_111 = arith.constant 1 : index
    %c0_112 = arith.constant 0 : index
    %67 = vector.load %arg9[%c0_109, %c0_110, %c1_111, %c0_112] : memref<1x18x18x4xf32, #tpu.memory_space<vmem>>, vector<1x16x16x4xf32>
    %68 = vector.shape_cast %67 : vector<1x16x16x4xf32> to vector<256x4xf32>
    %c0_113 = arith.constant 0 : index
    %c4_114 = arith.constant 4 : index
    %69 = vector.load %arg10[%c0_113, %c4_114] : memref<256x36xf32, #tpu.memory_space<vmem>>, vector<256x4xf32>
    tpu.vector_store %arg10[%c0_113, %c4_114], %68 {strides = array<i32>} : memref<256x36xf32, #tpu.memory_space<vmem>>, vector<256x4xf32>,
    %c0_115 = arith.constant 0 : index
    %c0_116 = arith.constant 0 : index
    %c2_117 = arith.constant 2 : index
    %c0_118 = arith.constant 0 : index
    %70 = vector.load %arg9[%c0_115, %c0_116, %c2_117, %c0_118] : memref<1x18x18x4xf32, #tpu.memory_space<vmem>>, vector<1x16x16x4xf32>
    %71 = vector.shape_cast %70 : vector<1x16x16x4xf32> to vector<256x4xf32>
    %c0_119 = arith.constant 0 : index
    %c8_120 = arith.constant 8 : index
    %72 = vector.load %arg10[%c0_119, %c8_120] : memref<256x36xf32, #tpu.memory_space<vmem>>, vector<256x4xf32>
    tpu.vector_store %arg10[%c0_119, %c8_120], %71 {strides = array<i32>} : memref<256x36xf32, #tpu.memory_space<vmem>>, vector<256x4xf32>,
    %c0_121 = arith.constant 0 : index
    %c1_122 = arith.constant 1 : index
    %c0_123 = arith.constant 0 : index
    %c0_124 = arith.constant 0 : index
    %73 = vector.load %arg9[%c0_121, %c1_122, %c0_123, %c0_124] : memref<1x18x18x4xf32, #tpu.memory_space<vmem>>, vector<1x16x16x4xf32>
    %74 = vector.shape_cast %73 : vector<1x16x16x4xf32> to vector<256x4xf32>
    %c0_125 = arith.constant 0 : index
    %c12_126 = arith.constant 12 : index
    %75 = vector.load %arg10[%c0_125, %c12_126] : memref<256x36xf32, #tpu.memory_space<vmem>>, vector<256x4xf32>
    tpu.vector_store %arg10[%c0_125, %c12_126], %74 {strides = array<i32>} : memref<256x36xf32, #tpu.memory_space<vmem>>, vector<256x4xf32>,
    %c0_127 = arith.constant 0 : index
    %c1_128 = arith.constant 1 : index
    %c1_129 = arith.constant 1 : index
    %c0_130 = arith.constant 0 : index
    %76 = vector.load %arg9[%c0_127, %c1_128, %c1_129, %c0_130] : memref<1x18x18x4xf32, #tpu.memory_space<vmem>>, vector<1x16x16x4xf32>
    %77 = vector.shape_cast %76 : vector<1x16x16x4xf32> to vector<256x4xf32>
    %c0_131 = arith.constant 0 : index
    %c16_132 = arith.constant 16 : index
    %78 = vector.load %arg10[%c0_131, %c16_132] : memref<256x36xf32, #tpu.memory_space<vmem>>, vector<256x4xf32>
    tpu.vector_store %arg10[%c0_131, %c16_132], %77 {strides = array<i32>} : memref<256x36xf32, #tpu.memory_space<vmem>>, vector<256x4xf32>,
    %c0_133 = arith.constant 0 : index
    %c1_134 = arith.constant 1 : index
    %c2_135 = arith.constant 2 : index
    %c0_136 = arith.constant 0 : index
    %79 = vector.load %arg9[%c0_133, %c1_134, %c2_135, %c0_136] : memref<1x18x18x4xf32, #tpu.memory_space<vmem>>, vector<1x16x16x4xf32>
    %80 = vector.shape_cast %79 : vector<1x16x16x4xf32> to vector<256x4xf32>
    %c0_137 = arith.constant 0 : index
    %c20_138 = arith.constant 20 : index
    %81 = vector.load %arg10[%c0_137, %c20_138] : memref<256x36xf32, #tpu.memory_space<vmem>>, vector<256x4xf32>
    tpu.vector_store %arg10[%c0_137, %c20_138], %80 {strides = array<i32>} : memref<256x36xf32, #tpu.memory_space<vmem>>, vector<256x4xf32>,
    %c0_139 = arith.constant 0 : index
    %c2_140 = arith.constant 2 : index
    %c0_141 = arith.constant 0 : index
    %c0_142 = arith.constant 0 : index
    %82 = vector.load %arg9[%c0_139, %c2_140, %c0_141, %c0_142] : memref<1x18x18x4xf32, #tpu.memory_space<vmem>>, vector<1x16x16x4xf32>
    %83 = vector.shape_cast %82 : vector<1x16x16x4xf32> to vector<256x4xf32>
    %c0_143 = arith.constant 0 : index
    %c24_144 = arith.constant 24 : index
    %84 = vector.load %arg10[%c0_143, %c24_144] : memref<256x36xf32, #tpu.memory_space<vmem>>, vector<256x4xf32>
    tpu.vector_store %arg10[%c0_143, %c24_144], %83 {strides = array<i32>} : memref<256x36xf32, #tpu.memory_space<vmem>>, vector<256x4xf32>,
    %c0_145 = arith.constant 0 : index
    %c2_146 = arith.constant 2 : index
    %c1_147 = arith.constant 1 : index
    %c0_148 = arith.constant 0 : index
    %85 = vector.load %arg9[%c0_145, %c2_146, %c1_147, %c0_148] : memref<1x18x18x4xf32, #tpu.memory_space<vmem>>, vector<1x16x16x4xf32>
    %86 = vector.shape_cast %85 : vector<1x16x16x4xf32> to vector<256x4xf32>
    %c0_149 = arith.constant 0 : index
    %c28_150 = arith.constant 28 : index
    %87 = vector.load %arg10[%c0_149, %c28_150] : memref<256x36xf32, #tpu.memory_space<vmem>>, vector<256x4xf32>
    tpu.vector_store %arg10[%c0_149, %c28_150], %86 {strides = array<i32>} : memref<256x36xf32, #tpu.memory_space<vmem>>, vector<256x4xf32>,
    %c0_151 = arith.constant 0 : index
    %c2_152 = arith.constant 2 : index
    %c2_153 = arith.constant 2 : index
    %c0_154 = arith.constant 0 : index
    %88 = vector.load %arg9[%c0_151, %c2_152, %c2_153, %c0_154] : memref<1x18x18x4xf32, #tpu.memory_space<vmem>>, vector<1x16x16x4xf32>
    %89 = vector.shape_cast %88 : vector<1x16x16x4xf32> to vector<256x4xf32>
    %c0_155 = arith.constant 0 : index
    %c32_156 = arith.constant 32 : index
    %90 = vector.load %arg10[%c0_155, %c32_156] : memref<256x36xf32, #tpu.memory_space<vmem>>, vector<256x4xf32>
    tpu.vector_store %arg10[%c0_155, %c32_156], %89 {strides = array<i32>} : memref<256x36xf32, #tpu.memory_space<vmem>>, vector<256x4xf32>,
    %c0_157 = arith.constant 0 : index
    %c0_158 = arith.constant 0 : index
    %91 = vector.load %arg6[%c0_157, %c0_158] : memref<4x36xf32, #tpu.memory_space<vmem>>, vector<4x36xf32>
    %c0_159 = arith.constant 0 : index
    %c0_160 = arith.constant 0 : index
    %92 = vector.load %arg10[%c0_159, %c0_160] : memref<256x36xf32, #tpu.memory_space<vmem>>, vector<256x36xf32>
    %cst_161 = arith.constant dense<0.000000e+00> : vector<4x256xf32>
    %93 = tpu.matmul %91, %92, %cst_161 {dimension_numbers = #tpu.dot_dimension_numbers<[1], [1], [0], [0], [0, 0, 1, 0], [], []>} : vector<4x36xf32>, vector<256x36xf32>, vector<4x256xf32> -> vector<4x256xf32>
    %c0_162 = arith.constant 0 : index
    %c0_163 = arith.constant 0 : index
    %c0_164 = arith.constant 0 : index
    %94 = vector.load %arg1[%c0_162, %c0_163, %c0_164] : memref<1x4x256xf32, #tpu.memory_space<vmem>>, vector<1x4x256xf32>
    %95 = vector.shape_cast %94 : vector<1x4x256xf32> to vector<4x256xf32>
    %96 = arith.addf %93, %95 : vector<4x256xf32>
    %c0_165 = arith.constant 0 : index
    %c0_166 = arith.constant 0 : index
    %c0_167 = arith.constant 0 : index
    %97 = vector.load %arg7[%c0_165, %c0_166, %c0_167] : memref<1x4x256xf32, #tpu.memory_space<vmem>>, vector<1x4x256xf32>
    %98 = vector.shape_cast %97 : vector<1x4x256xf32> to vector<4x256xf32>
    %99 = vector.shape_cast %96 : vector<4x256xf32> to vector<1x4x256xf32>
    tpu.vector_store %arg7[%c0_165, %c0_166, %c0_167], %99 {strides = array<i32>} : memref<1x4x256xf32, #tpu.memory_space<vmem>>, vector<1x4x256xf32>,
    return
  }
  func.func @transform_0(%arg0: i32) -> (i32, i32, i32) {
    %c0_i32 = arith.constant 0 : i32
    %c0_i32_0 = arith.constant 0 : i32
    %c0_i32_1 = arith.constant 0 : i32
    return %arg0, %c0_i32, %c0_i32_0 : i32, i32, i32
  }
  func.func @transform_1(%arg0: i32) -> (i32, i32, i32) {
    %c0_i32 = arith.constant 0 : i32
    %c0_i32_0 = arith.constant 0 : i32
    %c0_i32_1 = arith.constant 0 : i32
    %c0_i32_2 = arith.constant 0 : i32
    return %c0_i32, %c0_i32_0, %c0_i32_1 : i32, i32, i32
  }
  func.func @transform_2(%arg0: i32) -> (i32, i32, i32) {
    %c0_i32 = arith.constant 0 : i32
    %c0_i32_0 = arith.constant 0 : i32
    %c0_i32_1 = arith.constant 0 : i32
    %c0_i32_2 = arith.constant 0 : i32
    return %c0_i32, %c0_i32_0, %c0_i32_1 : i32, i32, i32
  }
  func.func @transform_3(%arg0: i32) -> (i32, i32) {
    %c0_i32 = arith.constant 0 : i32
    %c0_i32_0 = arith.constant 0 : i32
    %c0_i32_1 = arith.constant 0 : i32
    return %c0_i32, %c0_i32_0 : i32, i32
  }
  func.func @transform_4(%arg0: i32) -> (i32, i32) {
    %c0_i32 = arith.constant 0 : i32
    %c0_i32_0 = arith.constant 0 : i32
    %c0_i32_1 = arith.constant 0 : i32
    return %c0_i32, %c0_i32_0 : i32, i32
  }
  func.func @transform_5(%arg0: i32) -> (i32, i32) {
    %c0_i32 = arith.constant 0 : i32
    %c0_i32_0 = arith.constant 0 : i32
    %c0_i32_1 = arith.constant 0 : i32
    return %c0_i32, %c0_i32_0 : i32, i32
  }
  func.func @transform_6(%arg0: i32) -> (i32, i32, i32) {
    %c0_i32 = arith.constant 0 : i32
    %c0_i32_0 = arith.constant 0 : i32
    %c0_i32_1 = arith.constant 0 : i32
    return %arg0, %c0_i32, %c0_i32_0 : i32, i32, i32
  }
}

</mosaic_0001>

<bundles_post_ra>
// kernel: tpu_custom_call.1
= control target key start
LH: loop header
LB: loop body
LE: loop exit
PB: predicated region body
PF: predicated region fallthrough
CT: control target
= control target key end

     0   :  { %11 = vsyncpa [#allocation6], 0  ;;  %s6831_s0 = inlined_call_operand.vmem [shape: f32[2,4,256], index: 0, kind: input, shape index: {}]   ;;  %s6832_s1 = inlined_call_operand.vmem [shape: f32[1,4,1], index: 1, kind: input, shape index: {}]   ;;  %s6833_s2 = inlined_call_operand.vmem [shape: f32[1,4,1], index: 2, kind: input, shape index: {}]   ;;  %s6834_s3 = inlined_call_operand.vmem [shape: f32[36,4], index: 3, kind: input, shape index: {}]   ;;  %s6835_s4 = inlined_call_operand.vmem [shape: f32[1,4], index: 4, kind: input, shape index: {}]   ;;  %s6836_s5 = inlined_call_operand.vmem [shape: f32[4,36], index: 5, kind: input, shape index: {}]   ;;  %s6837_s6 = inlined_call_operand.hbm [shape: f32[2,4,256], index: 6, kind: output, shape index: {}]  }
   0x1   :  { %13 = vsyncpa [#allocation6 + $0x1], 0  ;;  %s4510_s21 = smov 0   ;;  %s4512_s22 = smov 0  }
   0x2   :  { %s4514_s23 = smov 0   ;;  %s4516_s24 = smov 0  }
   0x3 LB: > { %s4531_s25 = sadd.s32 4294967295, %s4462_s24   ;;  %s4257_s26 = sadd.s32 4294967294, %s4462_s24   ;;  %s4462_s24 = sphi %s4516_s24, %s6939_s24   ;;  %s4458_s23 = sphi %s4514_s23, %s6938_s23   ;;  %s4454_s22 = sphi %s4512_s22, %s6937_s22   ;;  %s4450_s21 = sphi %s4510_s21, %s6936_s21  }
   0x4   : > { %s4535_s27 = sadd.s32 1, %s4462_s24   ;;  %s157_s28 = sadd.s32 1, %s4458_s23 }
   0x5   : > { %s154_s29 = ssub.s32 %s4462_s24, %s4535_s27  ;;  %p167_p0 = scmp.ne.s32.totalorder %s4458_s23, %s4454_s22 }
   0x6   : > { %p155_p1 = scmp.eq.s32.totalorder %s154_s29, 0  ;;  %p168_p2 = scmp.eq.s32.totalorder %s4531_s25, 1 }
   0x7   : > { %p173_p3 = scmp.ne.s32.totalorder %s4454_s22, %s4450_s21  ;;  %p174_p4 = scmp.eq.s32.totalorder %s4257_s26, 1 }
   0x8   : > { %s4546_s30 = scalar_select %p155_p1, %s4458_s23, %s157_s28  }
   0x9   : > { %p4548_p5 = por %p168_p2, %p167_p0  ;;  %p4552_p6 = por %p174_p4, %p173_p3 }
   0xa   : > { %p4260_p7 = scmp.ge.s32.totalorder %s4462_s24, 1  ;;  %p215_p8 = scmp.lt.s32.totalorder %s4462_s24, 3 }
   0xc   : > { %p216_p9 = pnand %p4260_p7, %p215_p8 }
   0xe   : > { %219 = sbr.rel (%p216_p9) target bundleno = 2379 (0x94b), region = 44 }
  0x13   : > { %v340_v0 = vld [vmem:[%s6832_s1] sm:$0xf]  ;;  %v4464_v1 = vmov 0   ;;  %p245_p10 = scmp.lt.s32.totalorder %s4531_s25, 1  ;;  %v4465_v3 = vmov 839922192  }
  0x14   : > { %4398 = vset.pattern.permute.xlu0 %v4464_v1  ;;  %v351_v2 = vld [vmem:[%s6833_s2] sm:$0xf]  ;;  %v346_v4 = vunpack.c.l.s4 %v4465_v3  ;;  %vm250_vm0 = vcmask 31744   ;;  %v4466_v16 = vmov 0.0   ;;  %s4467_s18 = smov 8   ;;  %s4468_s19 = smov 4  }
  0x15   : > { %343 = vperm.xlu0 %4398, %v340_v0   ;;  %s246_s13 = scalar_select %p245_p10, %s4531_s25, 1  ;;  %251 = vst.msk [vmem:[#allocation2] sm:$0xff] %vm250_vm0, %v4466_v16  ;;  %vm253_vm1 = vcmask 25600   ;;  %vm259_vm2 = vcmask 24576   ;;  %vm690_vm3 = vcmask 64544   ;;  %vm883_vm4 = vcmask 97344  }
  0x16   : > { %v347_v6 = vunpack.c.0.s8 %v346_v4  ;;  %252 = vst.msk [vmem:[#allocation2 + $0x8] sm:$0xff] %vm250_vm0, %v4466_v16  ;;  %s4469_s20 = smov 12   ;;  %vm1076_vm5 = vcmask 130144   ;;  %s4470_s26 = smov 16   ;;  %vm1269_vm6 = vcmask 162944   ;;  %vm1462_vm7 = vcmask 195744  }
  0x17   : > { %s4336_s14 = sshll.u32 %s246_s13, 3  ;;  %256 = vst.msk [vmem:[#allocation2 + $0x198] sm:$0xff] %vm250_vm0, %v4466_v16  ;;  %s4471_s28 = smov 20   ;;  %vm1656_vm8 = vcmask 228544   ;;  %vm1849_vm9 = vcmask 261344   ;;  %vm2042_vm10 = vcmask 294144  }
  0x18   : > { %s249_s17 = scalar_lea.vmem %s6831_s0, %s4336_s14  ;;  %257 = vst.msk [vmem:[#allocation2 + $0x1a0] sm:$0xff] %vm250_vm0, %v4466_v16  ;;  %s4472_s29 = smov 24   ;;  %vm2213_vm11 = vcmask 1043456   ;;  %vm2116_vm12 = vcmask 293888  }
  0x19   : > { %v339_v8 = vld [vmem:[%s249_s17] sm:$0xff]  ;;  %296 = vst.msk [vmem:[#allocation3] sm:$0xff] %vm250_vm0, %v4466_v16  ;;  %s4473_s9 = smov 28   ;;  %s4474_s10 = smov 32  }
  0x1a   : > { %297 = vst.msk [vmem:[#allocation3 + $0x8] sm:$0xff] %vm250_vm0, %v4466_v16 }
  0x1b   : > { %300 = vst.msk [vmem:[#allocation3 + $0x198] sm:$0xff] %vm250_vm0, %v4466_v16 }
  0x1c   : > { %301 = vst.msk [vmem:[#allocation3 + $0x1a0] sm:$0xff] %vm250_vm0, %v4466_v16 }
  0x1d   : > { %354 = vperm.xlu0 %4398, %v351_v2   ;;  %v723_v17 = vld [vmem:[#allocation2 + $0x2] sm:$0xff]  ;;  %254 = vst.msk [vmem:[#allocation2 + $0x10] sm:$0x3] %vm253_vm1, %v4466_v16 }
  0x1e   : > { %v530_v18 = vld [vmem:[#allocation2 + $0x1] sm:$0xff]  ;;  %258 = vst.msk [vmem:[#allocation2 + $0x1a8] sm:$0x3] %vm253_vm1, %v4466_v16 }
  0x1f   : > { %594 = vrot.lane.b32.xlu2 %v530_v18, %s4468_s19  ;;  %298 = vst.msk [vmem:[#allocation3 + $0x10] sm:$0x3] %vm253_vm1, %v4466_v16  ;;  %v467_v38 = vld [vmem:[#allocation2 + $0x8] sm:$0xff] }
  0x20   : > { %302 = vst.msk [vmem:[#allocation3 + $0x1a8] sm:$0x3] %vm253_vm1, %v4466_v16 }
  0x21   : > { %261 = vst.msk [vmem:[#allocation2 + $0x18] sm:$0x1] %vm259_vm2, %v4466_v16 }
  0x22   : > { %260 = vst.msk [vmem:[#allocation2] sm:$0x1] %vm259_vm2, %v4466_v16 }
  0x23   : > { %262 = vst.msk [vmem:[#allocation2 + $0x30] sm:$0x1] %vm259_vm2, %v4466_v16 }
  0x24   : > { %v531_v19 = vld [vmem:[#allocation2 + $0x9] sm:$0xff]  ;;  %263 = vst.msk [vmem:[#allocation2 + $0x48] sm:$0x1] %vm259_vm2, %v4466_v16 }
  0x25   : > { %787 = vrot.lane.b32.xlu0 %v723_v17, %s4467_s18  ;;  %264 = vst.msk [vmem:[#allocation2 + $0x60] sm:$0x1] %vm259_vm2, %v4466_v16 }
  0x26   : > { %265 = vst.msk [vmem:[#allocation2 + $0x78] sm:$0x1] %vm259_vm2, %v4466_v16 }
  0x27   : > { %596 = vrot.lane.b32.xlu2 %v531_v19, %s4468_s19  ;;  %266 = vst.msk [vmem:[#allocation2 + $0x90] sm:$0x1] %vm259_vm2, %v4466_v16 }
  0x28   : > { %267 = vst.msk [vmem:[#allocation2 + $0xa8] sm:$0x1] %vm259_vm2, %v4466_v16 }
  0x29   : > { %268 = vst.msk [vmem:[#allocation2 + $0xc0] sm:$0x1] %vm259_vm2, %v4466_v16  ;;  %v466_v32 = vld [vmem:[#allocation2] sm:$0xff] }
  0x2a   : > { %269 = vst.msk [vmem:[#allocation2 + $0xd8] sm:$0x1] %vm259_vm2, %v4466_v16 }
  0x2b   : > { %270 = vst.msk [vmem:[#allocation2 + $0xf0] sm:$0x1] %vm259_vm2, %v4466_v16 }
  0x2c   : > { %271 = vst.msk [vmem:[#allocation2 + $0x108] sm:$0x1] %vm259_vm2, %v4466_v16 }
  0x2d   : > { %272 = vst.msk [vmem:[#allocation2 + $0x120] sm:$0x1] %vm259_vm2, %v4466_v16 }
  0x2e   : > { %273 = vst.msk [vmem:[#allocation2 + $0x138] sm:$0x1] %vm259_vm2, %v4466_v16 }
  0x2f   : > { %274 = vst.msk [vmem:[#allocation2 + $0x150] sm:$0x1] %vm259_vm2, %v4466_v16 }
  0x30   : > { %275 = vst.msk [vmem:[#allocation2 + $0x168] sm:$0x1] %vm259_vm2, %v4466_v16 }
  0x31   : > { %276 = vst.msk [vmem:[#allocation2 + $0x180] sm:$0x1] %vm259_vm2, %v4466_v16 }
  0x32   : > { %277 = vst.msk [vmem:[#allocation2 + $0x198] sm:$0x1] %vm259_vm2, %v4466_v16 }
  0x33   : > { %278 = vst.msk [vmem:[#allocation2 + $0x11] sm:$0x1] %vm259_vm2, %v4466_v16 }
  0x34   : > { %279 = vst.msk [vmem:[#allocation2 + $0x29] sm:$0x1] %vm259_vm2, %v4466_v16 }
  0x35   : > { %280 = vst.msk [vmem:[#allocation2 + $0x41] sm:$0x1] %vm259_vm2, %v4466_v16 }
  0x36   : > { %281 = vst.msk [vmem:[#allocation2 + $0x59] sm:$0x1] %vm259_vm2, %v4466_v16 }
  0x37   : > { %282 = vst.msk [vmem:[#allocation2 + $0x71] sm:$0x1] %vm259_vm2, %v4466_v16 }
  0x38   : > { %283 = vst.msk [vmem:[#allocation2 + $0x89] sm:$0x1] %vm259_vm2, %v4466_v16 }
  0x39   : > { %284 = vst.msk [vmem:[#allocation2 + $0xa1] sm:$0x1] %vm259_vm2, %v4466_v16 }
  0x3a   : > { %285 = vst.msk [vmem:[#allocation2 + $0xb9] sm:$0x1] %vm259_vm2, %v4466_v16 }
  0x3b   : > { %286 = vst.msk [vmem:[#allocation2 + $0xd1] sm:$0x1] %vm259_vm2, %v4466_v16 }
  0x3c   : > { %287 = vst.msk [vmem:[#allocation2 + $0xe9] sm:$0x1] %vm259_vm2, %v4466_v16 }
  0x3d   : > { %288 = vst.msk [vmem:[#allocation2 + $0x101] sm:$0x1] %vm259_vm2, %v4466_v16 }
  0x3e   : > { %289 = vst.msk [vmem:[#allocation2 + $0x119] sm:$0x1] %vm259_vm2, %v4466_v16 }
  0x3f   : > { %290 = vst.msk [vmem:[#allocation2 + $0x131] sm:$0x1] %vm259_vm2, %v4466_v16 }
  0x40   : > { %291 = vst.msk [vmem:[#allocation2 + $0x149] sm:$0x1] %vm259_vm2, %v4466_v16 }
  0x41   : > { %292 = vst.msk [vmem:[#allocation2 + $0x161] sm:$0x1] %vm259_vm2, %v4466_v16 }
  0x42   : > { %293 = vst.msk [vmem:[#allocation2 + $0x179] sm:$0x1] %vm259_vm2, %v4466_v16 }
  0x43   : > { %294 = vst.msk [vmem:[#allocation2 + $0x191] sm:$0x1] %vm259_vm2, %v4466_v16 }
  0x44   : > { %295 = vst.msk [vmem:[#allocation2 + $0x1a9] sm:$0x1] %vm259_vm2, %v4466_v16 }
  0x45   : > { %303 = vst.msk [vmem:[#allocation3] sm:$0x1] %vm259_vm2, %v4466_v16 }
  0x46   : > { %304 = vst.msk [vmem:[#allocation3 + $0x18] sm:$0x1] %vm259_vm2, %v4466_v16 }
  0x47   : > { %305 = vst.msk [vmem:[#allocation3 + $0x30] sm:$0x1] %vm259_vm2, %v4466_v16 }
  0x48   : > { %306 = vst.msk [vmem:[#allocation3 + $0x48] sm:$0x1] %vm259_vm2, %v4466_v16 }
  0x49   : > { %307 = vst.msk [vmem:[#allocation3 + $0x60] sm:$0x1] %vm259_vm2, %v4466_v16 }
  0x4a   : > { %308 = vst.msk [vmem:[#allocation3 + $0x78] sm:$0x1] %vm259_vm2, %v4466_v16 }
  0x4b   : > { %309 = vst.msk [vmem:[#allocation3 + $0x90] sm:$0x1] %vm259_vm2, %v4466_v16 }
  0x4c   : > { %310 = vst.msk [vmem:[#allocation3 + $0xa8] sm:$0x1] %vm259_vm2, %v4466_v16 }
  0x4d   : > { %311 = vst.msk [vmem:[#allocation3 + $0xc0] sm:$0x1] %vm259_vm2, %v4466_v16 }
  0x4e   : > { %312 = vst.msk [vmem:[#allocation3 + $0xd8] sm:$0x1] %vm259_vm2, %v4466_v16 }
  0x4f   : > { %313 = vst.msk [vmem:[#allocation3 + $0xf0] sm:$0x1] %vm259_vm2, %v4466_v16 }
  0x50   : > { %314 = vst.msk [vmem:[#allocation3 + $0x108] sm:$0x1] %vm259_vm2, %v4466_v16 }
  0x51   : > { %315 = vst.msk [vmem:[#allocation3 + $0x120] sm:$0x1] %vm259_vm2, %v4466_v16 }
  0x52   : > { %316 = vst.msk [vmem:[#allocation3 + $0x138] sm:$0x1] %vm259_vm2, %v4466_v16 }
  0x53   : > { %317 = vst.msk [vmem:[#allocation3 + $0x150] sm:$0x1] %vm259_vm2, %v4466_v16 }
  0x54   : > { %318 = vst.msk [vmem:[#allocation3 + $0x168] sm:$0x1] %vm259_vm2, %v4466_v16 }
  0x55   : > { %319 = vst.msk [vmem:[#allocation3 + $0x180] sm:$0x1] %vm259_vm2, %v4466_v16 }
  0x56   : > { %320 = vst.msk [vmem:[#allocation3 + $0x198] sm:$0x1] %vm259_vm2, %v4466_v16 }
  0x57   : > { %321 = vst.msk [vmem:[#allocation3 + $0x11] sm:$0x1] %vm259_vm2, %v4466_v16 }
  0x58   : > { %322 = vst.msk [vmem:[#allocation3 + $0x29] sm:$0x1] %vm259_vm2, %v4466_v16 }
  0x59   : > { %323 = vst.msk [vmem:[#allocation3 + $0x41] sm:$0x1] %vm259_vm2, %v4466_v16 }
  0x5a   : > { %324 = vst.msk [vmem:[#allocation3 + $0x59] sm:$0x1] %vm259_vm2, %v4466_v16 }
  0x5b   : > { %325 = vst.msk [vmem:[#allocation3 + $0x71] sm:$0x1] %vm259_vm2, %v4466_v16 }
  0x5c   : > { %326 = vst.msk [vmem:[#allocation3 + $0x89] sm:$0x1] %vm259_vm2, %v4466_v16 }
  0x5d   : > { %327 = vst.msk [vmem:[#allocation3 + $0xa1] sm:$0x1] %vm259_vm2, %v4466_v16 }
  0x5e   : > { %328 = vst.msk [vmem:[#allocation3 + $0xb9] sm:$0x1] %vm259_vm2, %v4466_v16 }
  0x5f   : > { %329 = vst.msk [vmem:[#allocation3 + $0xd1] sm:$0x1] %vm259_vm2, %v4466_v16 }
  0x60   : > { %330 = vst.msk [vmem:[#allocation3 + $0xe9] sm:$0x1] %vm259_vm2, %v4466_v16 }
  0x61   : > { %331 = vst.msk [vmem:[#allocation3 + $0x101] sm:$0x1] %vm259_vm2, %v4466_v16 }
  0x62   : > { %332 = vst.msk [vmem:[#allocation3 + $0x119] sm:$0x1] %vm259_vm2, %v4466_v16 }
  0x63   : > { %333 = vst.msk [vmem:[#allocation3 + $0x131] sm:$0x1] %vm259_vm2, %v4466_v16 }
  0x64   : > { %334 = vst.msk [vmem:[#allocation3 + $0x149] sm:$0x1] %vm259_vm2, %v4466_v16 }
  0x65   : > { %335 = vst.msk [vmem:[#allocation3 + $0x161] sm:$0x1] %vm259_vm2, %v4466_v16 }
  0x66   : > { %336 = vst.msk [vmem:[#allocation3 + $0x179] sm:$0x1] %vm259_vm2, %v4466_v16 }
  0x67   : > { %337 = vst.msk [vmem:[#allocation3 + $0x191] sm:$0x1] %vm259_vm2, %v4466_v16 }
  0x68   : > { %338 = vst.msk [vmem:[#allocation3 + $0x1a9] sm:$0x1] %vm259_vm2, %v4466_v16 }
  0x69   : > { %498 = vst.msk [vmem:[#allocation4] sm:$0xff] %vm250_vm0, %v466_v32 }
  0x6a   : > { %499 = vst.msk [vmem:[#allocation4 + $0x8] sm:$0xff] %vm250_vm0, %v467_v38 }
  0x79   : > { %v595_v31 = vpop.permute.xlu2 %594 }
  0x7a   : > { %691 = vst.msk [vmem:[#allocation4] sm:$0xff] %vm690_vm3, %v595_v31 }
  0x81   : > { %v597_v39 = vpop.permute.xlu2 %596 }
  0x82   : > { %692 = vst.msk [vmem:[#allocation4 + $0x8] sm:$0xff] %vm690_vm3, %v597_v39 }
  0x87   : > { %v344_v5 = vpop.permute.xlu0 %343 }
  0x88   : > { %v348_v7 = vperm.slane %v344_v5, %v347_v6 }
  0x8a   : > { %v350_v10 = vmul.f32 %v348_v7, %v339_v8 }
  0x8f   : > { %v355_v9 = vpop.permute.xlu0 %354 }
  0x90   : > { %v359_v11 = vperm.slane %v355_v9, %v347_v6 }
  0x92   : > { %v361_v12 = vadd.f32 %v359_v11, %v350_v10 }
  0x94   : > { %v362_v13 = vmax.f32 %v361_v12, 0.0 }
  0x96   : > { %364 = vst [vmem:[#allocation1] ss:$2 sm:$0xff] %v362_v13  ;;  %v724_v13 = vld [vmem:[#allocation2 + $0xa] sm:$0xff] }
  0x97   : > { %v788_v42 = vpop.permute.xlu0 %787 }
  0x98   : > { %884 = vst.msk [vmem:[#allocation4] sm:$0xff] %vm883_vm4, %v788_v42 }
  0x9d   : > { %v365_v14 = vld.sshfl [vmem:[#allocation1] sm:$0xff pattern:$0x75316420]  ;;  %v366_v15 = vld.sshfl [vmem:[#allocation1 + $0x8] sm:$0xff pattern:$0x75316420] }
  0x9e   : > { %369 = vxpose.xlu1.b32.start.end [1/1] (short) %v365_v14, 128  ;;  %4031 = vst [vmem:[#allocation1] ss:$2 sm:$0xff] %v339_v8 }
 0x11e   : > { %401 = vxpose.xlu1.b32.start.end [1/1] (short) %v366_v15, 128 }
 0x142   : > { %v385_v20 = vpop.trf.xlu1 }
 0x143   : > { %434 = vst.msk [vmem:[#allocation2 + $0x19] sm:$0xff] %vm250_vm0, %v385_v20 }
 0x14a   : > { %v386_v21 = vpop.trf.xlu1  ;;  %v916_v22 = vld [vmem:[#allocation2 + $0x18] sm:$0xff] }
 0x14b   : > { %v4671_v23 = vld [vmem:[#allocation2 + $0x19] sm:$0xff]  ;;  %435 = vst.msk [vmem:[#allocation2 + $0x21] sm:$0xff] %vm250_vm0, %v386_v21  ;;  %980 = vrot.lane.b32.xlu2 %v916_v22, %s4469_s20 }
 0x14c   : > { %598 = vrot.lane.b32.xlu0 %v4671_v23, %s4468_s19  ;;  %500 = vst.msk [vmem:[#allocation4 + $0x10] sm:$0xff] %vm250_vm0, %v916_v22 }
 0x152   : > { %v387_v24 = vpop.trf.xlu1  ;;  %v533_v25 = vld [vmem:[#allocation2 + $0x21] sm:$0xff] }
 0x153   : > { %600 = vrot.lane.b32.xlu2 %v533_v25, %s4468_s19  ;;  %436 = vst.msk [vmem:[#allocation2 + $0x31] sm:$0xff] %vm250_vm0, %v387_v24  ;;  %v4746_v29 = vld [vmem:[#allocation2 + $0x20] sm:$0xff] }
 0x154   : > { %501 = vst.msk [vmem:[#allocation4 + $0x18] sm:$0xff] %vm250_vm0, %v4746_v29  ;;  %v4832_v3 = vld [vmem:[#allocation2 + $0x22] sm:$0xff]  ;;  %v725_v8 = vld [vmem:[#allocation2 + $0x1a] sm:$0xff] }
 0x15a   : > { %v388_v26 = vpop.trf.xlu1  ;;  %v4755_v33 = vld [vmem:[#allocation2 + $0x30] sm:$0xff] }
 0x15b   : > { %437 = vst.msk [vmem:[#allocation2 + $0x39] sm:$0xff] %vm250_vm0, %v388_v26  ;;  %v4854_v12 = vld [vmem:[#allocation2 + $0x31] sm:$0xff] }
 0x15c   : > { %502 = vst.msk [vmem:[#allocation4 + $0x20] sm:$0xff] %vm250_vm0, %v4755_v33 }
 0x162   : > { %v389_v27 = vpop.trf.xlu1  ;;  %v4758_v34 = vld [vmem:[#allocation2 + $0x38] sm:$0xff] }
 0x163   : > { %438 = vst.msk [vmem:[#allocation2 + $0x49] sm:$0xff] %vm250_vm0, %v389_v27  ;;  %v4864_v16 = vld [vmem:[#allocation2 + $0x39] sm:$0xff] }
 0x164   : > { %503 = vst.msk [vmem:[#allocation4 + $0x28] sm:$0xff] %vm250_vm0, %v4758_v34  ;;  %v728_v21 = vld [vmem:[#allocation2 + $0x3a] sm:$0xff]  ;;  %v727_v25 = vld [vmem:[#allocation2 + $0x32] sm:$0xff] }
 0x16a   : > { %v390_v28 = vpop.trf.xlu1  ;;  %v4760_v35 = vld [vmem:[#allocation2 + $0x48] sm:$0xff] }
 0x16b   : > { %439 = vst.msk [vmem:[#allocation2 + $0x51] sm:$0xff] %vm250_vm0, %v390_v28 }
 0x16c   : > { %504 = vst.msk [vmem:[#allocation4 + $0x30] sm:$0xff] %vm250_vm0, %v4760_v35 }
 0x172   : > { %v391_v30 = vpop.trf.xlu1  ;;  %v4768_v37 = vld [vmem:[#allocation2 + $0x50] sm:$0xff] }
 0x173   : > { %440 = vst.msk [vmem:[#allocation2 + $0x61] sm:$0xff] %vm250_vm0, %v391_v30  ;;  %v4897_v30 = vld [vmem:[#allocation2 + $0x49] sm:$0xff]  ;;  %v730_v42 = vld [vmem:[#allocation2 + $0x52] sm:$0xff] }
 0x174   : > { %505 = vst.msk [vmem:[#allocation4 + $0x38] sm:$0xff] %vm250_vm0, %v4768_v37 }
 0x17a   : > { %v392_v36 = vpop.trf.xlu1  ;;  %v4775_v40 = vld [vmem:[#allocation2 + $0x60] sm:$0xff] }
 0x17b   : > { %441 = vst.msk [vmem:[#allocation2 + $0x69] sm:$0xff] %vm250_vm0, %v392_v36 }
 0x17c   : > { %506 = vst.msk [vmem:[#allocation4 + $0x40] sm:$0xff] %vm250_vm0, %v4775_v40 }
 0x182   : > { %v393_v41 = vpop.trf.xlu1  ;;  %v4781_v44 = vld [vmem:[#allocation2 + $0x68] sm:$0xff] }
 0x183   : > { %442 = vst.msk [vmem:[#allocation2 + $0x79] sm:$0xff] %vm250_vm0, %v393_v41 }
 0x184   : > { %507 = vst.msk [vmem:[#allocation4 + $0x48] sm:$0xff] %vm250_vm0, %v4781_v44 }
 0x18a   : > { %v394_v43 = vpop.trf.xlu1  ;;  %v4786_v45 = vld [vmem:[#allocation2 + $0x78] sm:$0xff] }
 0x18b   : > { %443 = vst.msk [vmem:[#allocation2 + $0x81] sm:$0xff] %vm250_vm0, %v394_v43 }
 0x18c   : > { %508 = vst.msk [vmem:[#allocation4 + $0x50] sm:$0xff] %vm250_vm0, %v4786_v45 }
 0x192   : > { %v395_v46 = vpop.trf.xlu1  ;;  %v4791_v48 = vld [vmem:[#allocation2 + $0x80] sm:$0xff] }
 0x193   : > { %444 = vst.msk [vmem:[#allocation2 + $0x91] sm:$0xff] %vm250_vm0, %v395_v46 }
 0x194   : > { %509 = vst.msk [vmem:[#allocation4 + $0x58] sm:$0xff] %vm250_vm0, %v4791_v48 }
 0x19a   : > { %v396_v47 = vpop.trf.xlu1  ;;  %v4796_v49 = vld [vmem:[#allocation2 + $0x90] sm:$0xff] }
 0x19b   : > { %445 = vst.msk [vmem:[#allocation2 + $0x99] sm:$0xff] %vm250_vm0, %v396_v47  ;;  %v4929_v47 = vld [vmem:[#allocation2 + $0x4a] sm:$0xff] }
 0x19c   : > { %510 = vst.msk [vmem:[#allocation4 + $0x60] sm:$0xff] %vm250_vm0, %v4796_v49 }
 0x1a2   : > { %v397_v50 = vpop.trf.xlu1  ;;  %v4802_v53 = vld [vmem:[#allocation2 + $0x98] sm:$0xff] }
 0x1a3   : > { %446 = vst.msk [vmem:[#allocation2 + $0xa9] sm:$0xff] %vm250_vm0, %v397_v50 }
 0x1a4   : > { %511 = vst.msk [vmem:[#allocation4 + $0x68] sm:$0xff] %vm250_vm0, %v4802_v53 }
 0x1a5   : > { %v981_v51 = vpop.permute.xlu2 %980 }
 0x1a6   : > { %1077 = vst.msk [vmem:[#allocation4] sm:$0xff] %vm1076_vm5, %v981_v51 }
 0x1aa   : > { %v398_v52 = vpop.trf.xlu1  ;;  %v4808_v55 = vld [vmem:[#allocation2 + $0xa8] sm:$0xff] }
 0x1ab   : > { %447 = vst.msk [vmem:[#allocation2 + $0xb1] sm:$0xff] %vm250_vm0, %v398_v52 }
 0x1ac   : > { %512 = vst.msk [vmem:[#allocation4 + $0x70] sm:$0xff] %vm250_vm0, %v4808_v55 }
 0x1ad   : > { %v601_v54 = vpop.permute.xlu2 %600 }
 0x1ae   : > { %694 = vst.msk [vmem:[#allocation4 + $0x18] sm:$0xff] %vm690_vm3, %v601_v54 }
 0x1b2   : > { %v399_v56 = vpop.trf.xlu1  ;;  %v4813_v58 = vld [vmem:[#allocation2 + $0xb0] sm:$0xff] }
 0x1b3   : > { %448 = vst.msk [vmem:[#allocation2 + $0xc1] sm:$0xff] %vm250_vm0, %v399_v56 }
 0x1b4   : > { %513 = vst.msk [vmem:[#allocation4 + $0x78] sm:$0xff] %vm250_vm0, %v4813_v58 }
 0x1ba   : > { %v400_v57 = vpop.trf.xlu1  ;;  %v4819_v60 = vld [vmem:[#allocation2 + $0xc0] sm:$0xff] }
 0x1bb   : > { %449 = vst.msk [vmem:[#allocation2 + $0xc9] sm:$0xff] %vm250_vm0, %v400_v57  ;;  %v538_v57 = vld [vmem:[#allocation2 + $0x61] sm:$0xff] }
 0x1bc   : > { %514 = vst.msk [vmem:[#allocation4 + $0x80] sm:$0xff] %vm250_vm0, %v4819_v60 }
 0x1be   : > { %v599_v59 = vpop.permute.xlu0 %598 }
 0x1bf   : > { %693 = vst.msk [vmem:[#allocation4 + $0x10] sm:$0xff] %vm690_vm3, %v599_v59 }
 0x1c2   : > { %v417_v61 = vpop.trf.xlu1  ;;  %v4824_v0 = vld [vmem:[#allocation2 + $0xc8] sm:$0xff] }
 0x1c3   : > { %450 = vst.msk [vmem:[#allocation2 + $0xd9] sm:$0xff] %vm250_vm0, %v417_v61 }
 0x1c4   : > { %515 = vst.msk [vmem:[#allocation4 + $0x88] sm:$0xff] %vm250_vm0, %v4824_v0 }
 0x1ca   : > { %v418_v62 = vpop.trf.xlu1  ;;  %v548_v63 = vld [vmem:[#allocation2 + $0xd9] sm:$0xff] }
 0x1cb   : > { %451 = vst.msk [vmem:[#allocation2 + $0xe1] sm:$0xff] %vm250_vm0, %v418_v62  ;;  %630 = vrot.lane.b32.xlu0 %v548_v63, %s4468_s19  ;;  %v4830_v1 = vld [vmem:[#allocation2 + $0xd8] sm:$0xff]  ;;  %v4953_v63 = vld [vmem:[#allocation2 + $0x69] sm:$0xff] }
 0x1cc   : > { %516 = vst.msk [vmem:[#allocation4 + $0x90] sm:$0xff] %vm250_vm0, %v4830_v1 }
 0x1d2   : > { %v419_v2 = vpop.trf.xlu1  ;;  %v549_v4 = vld [vmem:[#allocation2 + $0xe1] sm:$0xff] }
 0x1d3   : > { %452 = vst.msk [vmem:[#allocation2 + $0xf1] sm:$0xff] %vm250_vm0, %v419_v2  ;;  %793 = vrot.lane.b32.xlu0 %v4832_v3, %s4467_s18  ;;  %632 = vrot.lane.b32.xlu2 %v549_v4, %s4468_s19  ;;  %v742_v5 = vld [vmem:[#allocation2 + $0xe2] sm:$0xff]  ;;  %v4847_v10 = vld [vmem:[#allocation2 + $0xda] sm:$0xff] }
 0x1d4   : > { %v4840_v6 = vld [vmem:[#allocation2 + $0xe0] sm:$0xff] }
 0x1d5   : > { %517 = vst.msk [vmem:[#allocation4 + $0x98] sm:$0xff] %vm250_vm0, %v4840_v6 }
 0x1da   : > { %v420_v7 = vpop.trf.xlu1  ;;  %v4862_v14 = vld [vmem:[#allocation2 + $0xf1] sm:$0xff] }
 0x1db   : > { %453 = vst.msk [vmem:[#allocation2 + $0xf9] sm:$0xff] %vm250_vm0, %v420_v7  ;;  %825 = vrot.lane.b32.xlu0 %v742_v5, %s4467_s18  ;;  %791 = vrot.lane.b32.xlu2 %v725_v8, %s4467_s18  ;;  %v4875_v19 = vld [vmem:[#allocation2 + $0xf0] sm:$0xff] }
 0x1dc   : > { %518 = vst.msk [vmem:[#allocation4 + $0xa0] sm:$0xff] %vm250_vm0, %v4875_v19  ;;  %v4967_v5 = vld [vmem:[#allocation2 + $0x6a] sm:$0xff] }
 0x1e2   : > { %v421_v9 = vpop.trf.xlu1  ;;  %v4871_v17 = vld [vmem:[#allocation2 + $0xf9] sm:$0xff] }
 0x1e3   : > { %454 = vst.msk [vmem:[#allocation2 + $0x109] sm:$0xff] %vm250_vm0, %v421_v9  ;;  %982 = vrot.lane.b32.xlu0 %v4746_v29, %s4469_s20  ;;  %823 = vrot.lane.b32.xlu2 %v4847_v10, %s4467_s18  ;;  %v4873_v18 = vld [vmem:[#allocation2 + $0xf8] sm:$0xff] }
 0x1e4   : > { %519 = vst.msk [vmem:[#allocation4 + $0xa8] sm:$0xff] %vm250_vm0, %v4873_v18  ;;  %v4885_v22 = vld [vmem:[#allocation2 + $0xfa] sm:$0xff]  ;;  %v743_v28 = vld [vmem:[#allocation2 + $0xf2] sm:$0xff] }
 0x1ea   : > { %v422_v11 = vpop.trf.xlu1  ;;  %v4904_v31 = vld [vmem:[#allocation2 + $0x109] sm:$0xff] }
 0x1eb   : > { %455 = vst.msk [vmem:[#allocation2 + $0x111] sm:$0xff] %vm250_vm0, %v422_v11  ;;  %602 = vrot.lane.b32.xlu0 %v4854_v12, %s4468_s19  ;;  %984 = vrot.lane.b32.xlu2 %v4755_v33, %s4469_s20  ;;  %v4906_v33 = vld [vmem:[#allocation2 + $0x51] sm:$0xff]  ;;  %v4919_v39 = vld [vmem:[#allocation2 + $0x108] sm:$0xff] }
 0x1ec   : > { %520 = vst.msk [vmem:[#allocation4 + $0xb0] sm:$0xff] %vm250_vm0, %v4919_v39  ;;  %v4978_v11 = vld [vmem:[#allocation2 + $0x62] sm:$0xff] }
 0x1f0   : > { %789 = vrot.lane.b32.xlu1 %v724_v13, %s4467_s18  ;;  %v1118_v13 = vld [vmem:[#allocation2 + $0x81] sm:$0xff] }
 0x1f2   : > { %v423_v15 = vpop.trf.xlu1  ;;  %v4917_v38 = vld [vmem:[#allocation2 + $0x110] sm:$0xff] }
 0x1f3   : > { %456 = vst.msk [vmem:[#allocation2 + $0x121] sm:$0xff] %vm250_vm0, %v423_v15  ;;  %604 = vrot.lane.b32.xlu2 %v4864_v16, %s4468_s19  ;;  %634 = vrot.lane.b32.xlu0 %v4862_v14, %s4468_s19  ;;  %v746_v43 = vld [vmem:[#allocation2 + $0x112] sm:$0xff]  ;;  %v745_v51 = vld [vmem:[#allocation2 + $0x10a] sm:$0xff] }
 0x1f4   : > { %521 = vst.msk [vmem:[#allocation4 + $0xb8] sm:$0xff] %vm250_vm0, %v4917_v38 }
 0x1fa   : > { %v424_v20 = vpop.trf.xlu1  ;;  %v4951_v62 = vld [vmem:[#allocation2 + $0x121] sm:$0xff] }
 0x1fb   : > { %457 = vst.msk [vmem:[#allocation2 + $0x129] sm:$0xff] %vm250_vm0, %v424_v20  ;;  %797 = vrot.lane.b32.xlu0 %v728_v21, %s4467_s18  ;;  %636 = vrot.lane.b32.xlu2 %v4871_v17, %s4468_s19  ;;  %v4965_v4 = vld [vmem:[#allocation2 + $0x120] sm:$0xff]  ;;  %v4991_v21 = vld [vmem:[#allocation2 + $0xa9] sm:$0xff] }
 0x1fc   : > { %522 = vst.msk [vmem:[#allocation4 + $0xc0] sm:$0xff] %vm250_vm0, %v4965_v4 }
 0x202   : > { %v425_v24 = vpop.trf.xlu1  ;;  %v939_v26 = vld [vmem:[#allocation2 + $0x128] sm:$0xff] }
 0x203   : > { %458 = vst.msk [vmem:[#allocation2 + $0x139] sm:$0xff] %vm250_vm0, %v425_v24  ;;  %829 = vrot.lane.b32.xlu0 %v4885_v22, %s4467_s18  ;;  %795 = vrot.lane.b32.xlu2 %v727_v25, %s4467_s18  ;;  %v4963_v2 = vld [vmem:[#allocation2 + $0x129] sm:$0xff] }
 0x204   : > { %1026 = vrot.lane.b32.xlu1 %v939_v26, %s4469_s20  ;;  %523 = vst.msk [vmem:[#allocation4 + $0xc8] sm:$0xff] %vm250_vm0, %v939_v26  ;;  %v748_v9 = vld [vmem:[#allocation2 + $0x12a] sm:$0xff]  ;;  %v4985_v20 = vld [vmem:[#allocation2 + $0x122] sm:$0xff] }
 0x20a   : > { %v426_v27 = vpop.trf.xlu1 }
 0x20b   : > { %459 = vst.msk [vmem:[#allocation2 + $0x141] sm:$0xff] %vm250_vm0, %v426_v27  ;;  %986 = vrot.lane.b32.xlu0 %v4758_v34, %s4469_s20  ;;  %827 = vrot.lane.b32.xlu2 %v743_v28, %s4467_s18  ;;  %v4915_v34 = vld [vmem:[#allocation2 + $0x111] sm:$0xff]  ;;  %v4997_v27 = vld [vmem:[#allocation2 + $0x79] sm:$0xff]  ;;  %v5004_v28 = vld [vmem:[#allocation2 + $0xc9] sm:$0xff] }
 0x212   : > { %v427_v29 = vpop.trf.xlu1 }
 0x213   : > { %460 = vst.msk [vmem:[#allocation2 + $0x151] sm:$0xff] %vm250_vm0, %v427_v29  ;;  %606 = vrot.lane.b32.xlu0 %v4897_v30, %s4468_s19  ;;  %988 = vrot.lane.b32.xlu2 %v4760_v35, %s4469_s20 }
 0x21a   : > { %v428_v32 = vpop.trf.xlu1  ;;  %v942_v36 = vld [vmem:[#allocation2 + $0x150] sm:$0xff] }
 0x21b   : > { %461 = vst.msk [vmem:[#allocation2 + $0x159] sm:$0xff] %vm250_vm0, %v428_v32  ;;  %608 = vrot.lane.b32.xlu2 %v4906_v33, %s4468_s19  ;;  %638 = vrot.lane.b32.xlu0 %v4904_v31, %s4468_s19 }
 0x21c   : > { %1032 = vrot.lane.b32.xlu1 %v942_v36, %s4469_s20  ;;  %526 = vst.msk [vmem:[#allocation4 + $0xe0] sm:$0xff] %vm250_vm0, %v942_v36  ;;  %v556_v36 = vld [vmem:[#allocation2 + $0x139] sm:$0xff] }
 0x222   : > { %v429_v41 = vpop.trf.xlu1 }
 0x223   : > { %462 = vst.msk [vmem:[#allocation2 + $0x169] sm:$0xff] %vm250_vm0, %v429_v41  ;;  %801 = vrot.lane.b32.xlu0 %v730_v42, %s4467_s18  ;;  %640 = vrot.lane.b32.xlu2 %v4915_v34, %s4468_s19  ;;  %v5017_v42 = vld [vmem:[#allocation2 + $0x141] sm:$0xff] }
 0x22a   : > { %v430_v46 = vpop.trf.xlu1 }
 0x22b   : > { %463 = vst.msk [vmem:[#allocation2 + $0x171] sm:$0xff] %vm250_vm0, %v430_v46  ;;  %833 = vrot.lane.b32.xlu0 %v746_v43, %s4467_s18  ;;  %799 = vrot.lane.b32.xlu2 %v4929_v47, %s4467_s18  ;;  %v5019_v43 = vld [vmem:[#allocation2 + $0x140] sm:$0xff]  ;;  %v5021_v46 = vld [vmem:[#allocation2 + $0x138] sm:$0xff] }
 0x22c   : > { %525 = vst.msk [vmem:[#allocation4 + $0xd8] sm:$0xff] %vm250_vm0, %v5019_v43 }
 0x22d   : > { %v633_v50 = vpop.permute.xlu2 %632  ;;  %524 = vst.msk [vmem:[#allocation4 + $0xd0] sm:$0xff] %vm250_vm0, %v5021_v46 }
 0x22e   : > { %710 = vst.msk [vmem:[#allocation4 + $0x98] sm:$0xff] %vm690_vm3, %v633_v50  ;;  %v5023_v50 = vld [vmem:[#allocation2 + $0x82] sm:$0xff] }
 0x232   : > { %v945_v52 = vld [vmem:[#allocation2 + $0x170] sm:$0xff]  ;;  %v431_v54 = vpop.trf.xlu1 }
 0x233   : > { %990 = vrot.lane.b32.xlu0 %v4768_v37, %s4469_s20  ;;  %831 = vrot.lane.b32.xlu2 %v745_v51, %s4467_s18  ;;  %464 = vst.msk [vmem:[#allocation2 + $0x181] sm:$0xff] %vm250_vm0, %v431_v54  ;;  %v5039_v54 = vld [vmem:[#allocation2 + $0x7a] sm:$0xff] }
 0x234   : > { %1038 = vrot.lane.b32.xlu1 %v945_v52, %s4469_s20  ;;  %529 = vst.msk [vmem:[#allocation4 + $0xf8] sm:$0xff] %vm250_vm0, %v945_v52  ;;  %v5037_v52 = vld [vmem:[#allocation2 + $0x142] sm:$0xff] }
 0x235   : > { %v792_v56 = vpop.permute.xlu2 %791 }
 0x236   : > { %886 = vst.msk [vmem:[#allocation4 + $0x10] sm:$0xff] %vm883_vm4, %v792_v56 }
 0x23a   : > { %v432_v59 = vpop.trf.xlu1 }
 0x23b   : > { %610 = vrot.lane.b32.xlu0 %v538_v57, %s4468_s19  ;;  %992 = vrot.lane.b32.xlu2 %v4775_v40, %s4469_s20  ;;  %465 = vst.msk [vmem:[#allocation2 + $0x189] sm:$0xff] %vm250_vm0, %v432_v59  ;;  %v5048_v59 = vld [vmem:[#allocation2 + $0x13a] sm:$0xff] }
 0x23c   : > { %1173 = vrot.lane.b32.xlu1 %v4671_v23, %s4470_s26 }
 0x23d   : > { %v631_v37 = vpop.permute.xlu0 %630  ;;  %v824_v61 = vpop.permute.xlu2 %823 }
 0x23e   : > { %709 = vst.msk [vmem:[#allocation4 + $0x90] sm:$0xff] %vm690_vm3, %v631_v37 }
 0x23f   : > { %902 = vst.msk [vmem:[#allocation4 + $0x90] sm:$0xff] %vm883_vm4, %v824_v61 }
 0x243   : > { %612 = vrot.lane.b32.xlu2 %v4953_v63, %s4468_s19  ;;  %642 = vrot.lane.b32.xlu0 %v4951_v62, %s4468_s19 }
 0x244   : > { %1179 = vrot.lane.b32.xlu1 %v4864_v16, %s4470_s26 }
 0x245   : > { %v794_v23 = vpop.permute.xlu0 %793  ;;  %v985_v40 = vpop.permute.xlu2 %984 }
 0x246   : > { %887 = vst.msk [vmem:[#allocation4 + $0x18] sm:$0xff] %vm883_vm4, %v794_v23  ;;  %v1139_v23 = vld [vmem:[#allocation2 + $0x181] sm:$0xff] }
 0x247   : > { %1079 = vst.msk [vmem:[#allocation4 + $0x10] sm:$0xff] %vm1076_vm5, %v985_v40  ;;  %v5057_v40 = vld [vmem:[#allocation2 + $0x91] sm:$0xff] }
 0x24b   : > { %805 = vrot.lane.b32.xlu0 %v4967_v5, %s4467_s18  ;;  %644 = vrot.lane.b32.xlu2 %v4963_v2, %s4468_s19 }
 0x24c   : > { %1185 = vrot.lane.b32.xlu1 %v538_v57, %s4470_s26  ;;  %v1136_v57 = vld [vmem:[#allocation2 + $0x159] sm:$0xff] }
 0x24d   : > { %v826_v7 = vpop.permute.xlu0 %825  ;;  %v605_v8 = vpop.permute.xlu2 %604 }
 0x24e   : > { %903 = vst.msk [vmem:[#allocation4 + $0x98] sm:$0xff] %vm883_vm4, %v826_v7 }
 0x24f   : > { %696 = vst.msk [vmem:[#allocation4 + $0x28] sm:$0xff] %vm690_vm3, %v605_v8  ;;  %v5066_v8 = vld [vmem:[#allocation2 + $0x151] sm:$0xff] }
 0x253   : > { %837 = vrot.lane.b32.xlu0 %v748_v9, %s4467_s18  ;;  %803 = vrot.lane.b32.xlu2 %v4978_v11, %s4467_s18  ;;  %v5068_v9 = vld [vmem:[#allocation2 + $0x99] sm:$0xff] }
 0x254   : > { %1191 = vrot.lane.b32.xlu1 %v1118_v13, %s4470_s26 }
 0x255   : > { %v983_v15 = vpop.permute.xlu0 %982  ;;  %v637_v16 = vpop.permute.xlu2 %636 }
 0x256   : > { %712 = vst.msk [vmem:[#allocation4 + $0xa8] sm:$0xff] %vm690_vm3, %v637_v16 }
 0x25b   : > { %994 = vrot.lane.b32.xlu0 %v4781_v44, %s4469_s20  ;;  %835 = vrot.lane.b32.xlu2 %v4985_v20, %s4467_s18 }
 0x25c   : > { %1197 = vrot.lane.b32.xlu1 %v4991_v21, %s4470_s26 }
 0x25d   : > { %v603_v24 = vpop.permute.xlu0 %602  ;;  %v796_v25 = vpop.permute.xlu2 %795 }
 0x25e   : > { %695 = vst.msk [vmem:[#allocation4 + $0x20] sm:$0xff] %vm690_vm3, %v603_v24  ;;  %v5078_v24 = vld [vmem:[#allocation2 + $0x158] sm:$0xff] }
 0x25f   : > { %888 = vst.msk [vmem:[#allocation4 + $0x20] sm:$0xff] %vm883_vm4, %v796_v25  ;;  %v5080_v25 = vld [vmem:[#allocation2 + $0x9a] sm:$0xff] }
 0x260   : > { %527 = vst.msk [vmem:[#allocation4 + $0xe8] sm:$0xff] %vm250_vm0, %v5078_v24 }
 0x262   : > { %v790_v26 = vpop.permute.xlu1 %789 }
 0x263   : > { %885 = vst.msk [vmem:[#allocation4 + $0x8] sm:$0xff] %vm883_vm4, %v790_v26  ;;  %614 = vrot.lane.b32.xlu0 %v4997_v27, %s4468_s19  ;;  %996 = vrot.lane.b32.xlu2 %v4786_v45, %s4469_s20 }
 0x264   : > { %1078 = vst.msk [vmem:[#allocation4 + $0x8] sm:$0xff] %vm1076_vm5, %v983_v15  ;;  %1203 = vrot.lane.b32.xlu1 %v5004_v28, %s4470_s26 }
 0x265   : > { %v635_v29 = vpop.permute.xlu0 %634  ;;  %v828_v32 = vpop.permute.xlu2 %827 }
 0x266   : > { %711 = vst.msk [vmem:[#allocation4 + $0xa0] sm:$0xff] %vm690_vm3, %v635_v29 }
 0x267   : > { %904 = vst.msk [vmem:[#allocation4 + $0xa0] sm:$0xff] %vm883_vm4, %v828_v32  ;;  %v5094_v32 = vld [vmem:[#allocation2 + $0x15a] sm:$0xff] }
 0x26b   : > { %616 = vrot.lane.b32.xlu2 %v1118_v13, %s4468_s19  ;;  %646 = vrot.lane.b32.xlu0 %v556_v36, %s4468_s19 }
 0x26c   : > { %1209 = vrot.lane.b32.xlu1 %v4862_v14, %s4470_s26 }
 0x26d   : > { %v798_v45 = vpop.permute.xlu0 %797  ;;  %v989_v41 = vpop.permute.xlu2 %988 }
 0x26e   : > { %889 = vst.msk [vmem:[#allocation4 + $0x28] sm:$0xff] %vm883_vm4, %v798_v45 }
 0x26f   : > { %1081 = vst.msk [vmem:[#allocation4 + $0x20] sm:$0xff] %vm1076_vm5, %v989_v41 }
 0x273   : > { %809 = vrot.lane.b32.xlu0 %v5023_v50, %s4467_s18  ;;  %648 = vrot.lane.b32.xlu2 %v5017_v42, %s4468_s19 }
 0x274   : > { %1215 = vrot.lane.b32.xlu1 %v4915_v34, %s4470_s26 }
 0x275   : > { %v830_v14 = vpop.permute.xlu0 %829  ;;  %v609_v51 = vpop.permute.xlu2 %608 }
 0x276   : > { %905 = vst.msk [vmem:[#allocation4 + $0xa8] sm:$0xff] %vm883_vm4, %v830_v14  ;;  %v1027_v13 = vpop.permute.xlu1 %1026  ;;  %v5105_v14 = vld [vmem:[#allocation2 + $0x152] sm:$0xff] }
 0x277   : > { %698 = vst.msk [vmem:[#allocation4 + $0x38] sm:$0xff] %vm690_vm3, %v609_v51 }
 0x27b   : > { %841 = vrot.lane.b32.xlu0 %v5037_v52, %s4467_s18  ;;  %807 = vrot.lane.b32.xlu2 %v5039_v54, %s4467_s18 }
 0x27c   : > { %1221 = vrot.lane.b32.xlu1 %v556_v36, %s4470_s26  ;;  %v735_v36 = vld [vmem:[#allocation2 + $0x92] sm:$0xff] }
 0x27d   : > { %v987_v56 = vpop.permute.xlu0 %986  ;;  %v641_v34 = vpop.permute.xlu2 %640 }
 0x27e   : > { %1080 = vst.msk [vmem:[#allocation4 + $0x18] sm:$0xff] %vm1076_vm5, %v987_v56 }
 0x27f   : > { %714 = vst.msk [vmem:[#allocation4 + $0xb8] sm:$0xff] %vm690_vm3, %v641_v34  ;;  %v1315_v34 = vld [vmem:[#allocation2 + $0xb2] sm:$0xff] }
 0x283   : > { %998 = vrot.lane.b32.xlu0 %v4791_v48, %s4469_s20  ;;  %839 = vrot.lane.b32.xlu2 %v5048_v59, %s4467_s18 }
 0x284   : > { %1227 = vrot.lane.b32.xlu1 %v1136_v57, %s4470_s26 }
 0x285   : > { %v607_v37 = vpop.permute.xlu0 %606  ;;  %v800_v61 = vpop.permute.xlu2 %799 }
 0x286   : > { %697 = vst.msk [vmem:[#allocation4 + $0x30] sm:$0xff] %vm690_vm3, %v607_v37 }
 0x287   : > { %890 = vst.msk [vmem:[#allocation4 + $0x30] sm:$0xff] %vm883_vm4, %v800_v61 }
 0x28b   : > { %618 = vrot.lane.b32.xlu0 %v5057_v40, %s4468_s19  ;;  %1000 = vrot.lane.b32.xlu2 %v4796_v49, %s4469_s20 }
 0x28c   : > { %1233 = vrot.lane.b32.xlu1 %v1139_v23, %s4470_s26  ;;  %v5123_v23 = vld [vmem:[#allocation2 + $0x169] sm:$0xff] }
 0x28d   : > { %v639_v48 = vpop.permute.xlu0 %638  ;;  %v832_v7 = vpop.permute.xlu2 %831 }
 0x28e   : > { %713 = vst.msk [vmem:[#allocation4 + $0xb0] sm:$0xff] %vm690_vm3, %v639_v48  ;;  %v5125_v48 = vld [vmem:[#allocation2 + $0xb1] sm:$0xff] }
 0x28f   : > { %906 = vst.msk [vmem:[#allocation4 + $0xb0] sm:$0xff] %vm883_vm4, %v832_v7 }
 0x293   : > { %620 = vrot.lane.b32.xlu2 %v5068_v9, %s4468_s19  ;;  %650 = vrot.lane.b32.xlu0 %v5066_v8, %s4468_s19 }
 0x294   : > { %1368 = vrot.lane.b32.xlu1 %v4832_v3, %s4471_s28  ;;  %v5089_v3 = vpop.permute.xlu1 %1032 }
 0x295   : > { %v802_v15 = vpop.permute.xlu0 %801  ;;  %v993_v16 = vpop.permute.xlu2 %992 }
 0x296   : > { %891 = vst.msk [vmem:[#allocation4 + $0x38] sm:$0xff] %vm883_vm4, %v802_v15  ;;  %v5136_v15 = vld [vmem:[#allocation2 + $0x171] sm:$0xff] }
 0x297   : > { %1083 = vst.msk [vmem:[#allocation4 + $0x30] sm:$0xff] %vm1076_vm5, %v993_v16  ;;  %v5138_v16 = vld [vmem:[#allocation2 + $0x168] sm:$0xff] }
 0x298   : > { %528 = vst.msk [vmem:[#allocation4 + $0xf0] sm:$0xff] %vm250_vm0, %v5138_v16 }
 0x29b   : > { %813 = vrot.lane.b32.xlu0 %v5080_v25, %s4467_s18  ;;  %652 = vrot.lane.b32.xlu2 %v1136_v57, %s4468_s19 }
 0x29c   : > { %1374 = vrot.lane.b32.xlu1 %v4929_v47, %s4471_s28 }
 0x29d   : > { %v834_v26 = vpop.permute.xlu0 %833  ;;  %v613_v29 = vpop.permute.xlu2 %612 }
 0x29e   : > { %907 = vst.msk [vmem:[#allocation4 + $0xb8] sm:$0xff] %vm883_vm4, %v834_v26 }
 0x29f   : > { %1100 = vst.msk [vmem:[#allocation4 + $0xb8] sm:$0xff] %vm1076_vm5, %v1027_v13 }
 0x2a0   : > { %700 = vst.msk [vmem:[#allocation4 + $0x48] sm:$0xff] %vm690_vm3, %v613_v29  ;;  %v5149_v29 = vld [vmem:[#allocation2 + $0x172] sm:$0xff] }
 0x2a3   : > { %845 = vrot.lane.b32.xlu0 %v5094_v32, %s4467_s18  ;;  %811 = vrot.lane.b32.xlu2 %v735_v36, %s4467_s18 }
 0x2a4   : > { %1380 = vrot.lane.b32.xlu1 %v4967_v5, %s4471_s28 }
 0x2a5   : > { %v991_v47 = vpop.permute.xlu0 %990  ;;  %v645_v45 = vpop.permute.xlu2 %644 }
 0x2a6   : > { %1082 = vst.msk [vmem:[#allocation4 + $0x28] sm:$0xff] %vm1076_vm5, %v991_v47  ;;  %v5102_v41 = vpop.permute.xlu1 %1038 }
 0x2a7   : > { %716 = vst.msk [vmem:[#allocation4 + $0xc8] sm:$0xff] %vm690_vm3, %v645_v45  ;;  %v5161_v45 = vld [vmem:[#allocation2 + $0xc1] sm:$0xff] }
 0x2ab   : > { %1002 = vrot.lane.b32.xlu0 %v4802_v53, %s4469_s20  ;;  %843 = vrot.lane.b32.xlu2 %v5105_v14, %s4467_s18 }
 0x2ac   : > { %1386 = vrot.lane.b32.xlu1 %v735_v36, %s4471_s28  ;;  %v5151_v36 = vld [vmem:[#allocation2 + $0xaa] sm:$0xff] }
 0x2ad   : > { %v611_v51 = vpop.permute.xlu0 %610  ;;  %v804_v5 = vpop.permute.xlu2 %803 }
 0x2ae   : > { %699 = vst.msk [vmem:[#allocation4 + $0x40] sm:$0xff] %vm690_vm3, %v611_v51  ;;  %v1174_v56 = vpop.permute.xlu1 %1173  ;;  %v753_v51 = vld [vmem:[#allocation2 + $0x16a] sm:$0xff] }
 0x2af   : > { %892 = vst.msk [vmem:[#allocation4 + $0x40] sm:$0xff] %vm883_vm4, %v804_v5 }
 0x2b0   : > { %1270 = vst.msk [vmem:[#allocation4] sm:$0xff] %vm1269_vm6, %v1174_v56 }
 0x2b3   : > { %622 = vrot.lane.b32.xlu0 %v4991_v21, %s4468_s19  ;;  %1004 = vrot.lane.b32.xlu2 %v4808_v55, %s4469_s20 }
 0x2b4   : > { %1392 = vrot.lane.b32.xlu1 %v1315_v34, %s4471_s28 }
 0x2b5   : > { %v643_v57 = vpop.permute.xlu0 %642  ;;  %v836_v37 = vpop.permute.xlu2 %835 }
 0x2b6   : > { %715 = vst.msk [vmem:[#allocation4 + $0xc0] sm:$0xff] %vm690_vm3, %v643_v57  ;;  %v1180_v61 = vpop.permute.xlu1 %1179 }
 0x2b7   : > { %908 = vst.msk [vmem:[#allocation4 + $0xc0] sm:$0xff] %vm883_vm4, %v836_v37  ;;  %v5181_v37 = vld [vmem:[#allocation2 + $0xc2] sm:$0xff] }
 0x2b8   : > { %1273 = vst.msk [vmem:[#allocation4 + $0x18] sm:$0xff] %vm1269_vm6, %v1180_v61 }
 0x2bb   : > { %624 = vrot.lane.b32.xlu2 %v5125_v48, %s4468_s19  ;;  %654 = vrot.lane.b32.xlu0 %v5123_v23, %s4468_s19 }
 0x2bc   : > { %1398 = vrot.lane.b32.xlu1 %v4847_v10, %s4471_s28 }
 0x2bd   : > { %v806_v21 = vpop.permute.xlu0 %805  ;;  %v997_v7 = vpop.permute.xlu2 %996 }
 0x2be   : > { %893 = vst.msk [vmem:[#allocation4 + $0x48] sm:$0xff] %vm883_vm4, %v806_v21  ;;  %v1186_v13 = vpop.permute.xlu1 %1185 }
 0x2bf   : > { %1085 = vst.msk [vmem:[#allocation4 + $0x40] sm:$0xff] %vm1076_vm5, %v997_v7 }
 0x2c0   : > { %1276 = vst.msk [vmem:[#allocation4 + $0x30] sm:$0xff] %vm1269_vm6, %v1186_v13 }
 0x2c3   : > { %817 = vrot.lane.b32.xlu0 %v1315_v34, %s4467_s18  ;;  %656 = vrot.lane.b32.xlu2 %v5136_v15, %s4468_s19 }
 0x2c4   : > { %1404 = vrot.lane.b32.xlu1 %v4885_v22, %s4471_s28 }
 0x2c5   : > { %v838_v10 = vpop.permute.xlu0 %837  ;;  %v617_v26 = vpop.permute.xlu2 %616 }
 0x2c6   : > { %909 = vst.msk [vmem:[#allocation4 + $0xc8] sm:$0xff] %vm883_vm4, %v838_v10  ;;  %v1192_v7 = vpop.permute.xlu1 %1191 }
 0x2c7   : > { %702 = vst.msk [vmem:[#allocation4 + $0x58] sm:$0xff] %vm690_vm3, %v617_v26 }
 0x2cb   : > { %849 = vrot.lane.b32.xlu0 %v5149_v29, %s4467_s18  ;;  %815 = vrot.lane.b32.xlu2 %v5151_v36, %s4467_s18 }
 0x2cc   : > { %1410 = vrot.lane.b32.xlu1 %v4985_v20, %s4471_s28  ;;  %v5170_v20 = vld [vmem:[#allocation2 + $0xca] sm:$0xff] }
 0x2cd   : > { %v995_v22 = vpop.permute.xlu0 %994  ;;  %v649_v47 = vpop.permute.xlu2 %648 }
 0x2ce   : > { %1084 = vst.msk [vmem:[#allocation4 + $0x38] sm:$0xff] %vm1076_vm5, %v995_v22 }
 0x2cf   : > { %718 = vst.msk [vmem:[#allocation4 + $0xd8] sm:$0xff] %vm690_vm3, %v649_v47  ;;  %v5246_v47 = vld [vmem:[#allocation2 + $0x180] sm:$0xff] }
 0x2d3   : > { %626 = vrot.lane.b32.xlu0 %v5161_v45, %s4468_s19  ;;  %847 = vrot.lane.b32.xlu2 %v753_v51, %s4467_s18 }
 0x2d4   : > { %1416 = vrot.lane.b32.xlu1 %v5037_v52, %s4471_s28  ;;  %v1333_v52 = vld [vmem:[#allocation2 + $0x18a] sm:$0xff] }
 0x2d5   : > { %v615_v5 = vpop.permute.xlu0 %614  ;;  %v808_v56 = vpop.permute.xlu2 %807 }
 0x2d6   : > { %701 = vst.msk [vmem:[#allocation4 + $0x50] sm:$0xff] %vm690_vm3, %v615_v5 }
 0x2d7   : > { %894 = vst.msk [vmem:[#allocation4 + $0x50] sm:$0xff] %vm883_vm4, %v808_v56  ;;  %v947_v56 = vld [vmem:[#allocation2 + $0x188] sm:$0xff] }
 0x2db   : > { %821 = vrot.lane.b32.xlu0 %v5170_v20, %s4467_s18  ;;  %628 = vrot.lane.b32.xlu2 %v5004_v28, %s4468_s19 }
 0x2dc   : > { %1422 = vrot.lane.b32.xlu1 %v753_v51, %s4471_s28 }
 0x2dd   : > { %v647_v34 = vpop.permute.xlu0 %646  ;;  %v840_v57 = vpop.permute.xlu2 %839 }
 0x2de   : > { %717 = vst.msk [vmem:[#allocation4 + $0xd0] sm:$0xff] %vm690_vm3, %v647_v34 }
 0x2df   : > { %910 = vst.msk [vmem:[#allocation4 + $0xd0] sm:$0xff] %vm883_vm4, %v840_v57 }
 0x2e0   : > { %1103 = vst.msk [vmem:[#allocation4 + $0xd0] sm:$0xff] %vm1076_vm5, %v5089_v3 }
 0x2e3   : > { %1006 = vrot.lane.b32.xlu0 %v4813_v58, %s4469_s20  ;;  %819 = vrot.lane.b32.xlu2 %v5181_v37, %s4467_s18 }
 0x2e4   : > { %1428 = vrot.lane.b32.xlu1 %v1333_v52, %s4471_s28 }
 0x2e5   : > { %v810_v28 = vpop.permute.xlu0 %809  ;;  %v1001_v61 = vpop.permute.xlu2 %1000 }
 0x2e6   : > { %895 = vst.msk [vmem:[#allocation4 + $0x58] sm:$0xff] %vm883_vm4, %v810_v28 }
 0x2e7   : > { %1087 = vst.msk [vmem:[#allocation4 + $0x50] sm:$0xff] %vm1076_vm5, %v1001_v61 }
 0x2eb   : > { %1010 = vrot.lane.b32.xlu0 %v4824_v0, %s4469_s20  ;;  %1008 = vrot.lane.b32.xlu2 %v4819_v60, %s4469_s20 }
 0x2ec   : > { %1564 = vrot.lane.b32.xlu1 %v4760_v35, %s4472_s29 }
 0x2ed   : > { %v842_v3 = vpop.permute.xlu0 %841  ;;  %v621_v21 = vpop.permute.xlu2 %620 }
 0x2ee   : > { %911 = vst.msk [vmem:[#allocation4 + $0xd8] sm:$0xff] %vm883_vm4, %v842_v3 }
 0x2ef   : > { %704 = vst.msk [vmem:[#allocation4 + $0x68] sm:$0xff] %vm690_vm3, %v621_v21 }
 0x2f3   : > { %1014 = vrot.lane.b32.xlu0 %v4840_v6, %s4469_s20  ;;  %1012 = vrot.lane.b32.xlu2 %v4830_v1, %s4469_s20 }
 0x2f4   : > { %1570 = vrot.lane.b32.xlu1 %v4781_v44, %s4472_s29  ;;  %v1198_v44 = vpop.permute.xlu1 %1197 }
 0x2f5   : > { %v999_v13 = vpop.permute.xlu0 %998  ;;  %v653_v10 = vpop.permute.xlu2 %652 }
 0x2f6   : > { %1086 = vst.msk [vmem:[#allocation4 + $0x48] sm:$0xff] %vm1076_vm5, %v999_v13 }
 0x2f7   : > { %1279 = vst.msk [vmem:[#allocation4 + $0x48] sm:$0xff] %vm1269_vm6, %v1192_v7 }
 0x2f8   : > { %720 = vst.msk [vmem:[#allocation4 + $0xe8] sm:$0xff] %vm690_vm3, %v653_v10  ;;  %v1126_v10 = vld [vmem:[#allocation2 + $0xe1] sm:$0xff] }
 0x2fb   : > { %1018 = vrot.lane.b32.xlu0 %v4873_v18, %s4469_s20  ;;  %1016 = vrot.lane.b32.xlu2 %v4875_v19, %s4469_s20 }
 0x2fc   : > { %1576 = vrot.lane.b32.xlu1 %v4796_v49, %s4472_s29  ;;  %v5223_v49 = vpop.permute.xlu1 %1203 }
 0x2fd   : > { %v619_v35 = vpop.permute.xlu0 %618  ;;  %v812_v6 = vpop.permute.xlu2 %811 }
 0x2fe   : > { %703 = vst.msk [vmem:[#allocation4 + $0x60] sm:$0xff] %vm690_vm3, %v619_v35 }
 0x2ff   : > { %896 = vst.msk [vmem:[#allocation4 + $0x60] sm:$0xff] %vm883_vm4, %v812_v6 }
 0x303   : > { %1022 = vrot.lane.b32.xlu0 %v4917_v38, %s4469_s20  ;;  %1020 = vrot.lane.b32.xlu2 %v4919_v39, %s4469_s20 }
 0x304   : > { %1582 = vrot.lane.b32.xlu1 %v4813_v58, %s4472_s29  ;;  %v5234_v58 = vpop.permute.xlu1 %1209 }
 0x305   : > { %v651_v19 = vpop.permute.xlu0 %650  ;;  %v844_v26 = vpop.permute.xlu2 %843 }
 0x306   : > { %719 = vst.msk [vmem:[#allocation4 + $0xe0] sm:$0xff] %vm690_vm3, %v651_v19 }
 0x307   : > { %912 = vst.msk [vmem:[#allocation4 + $0xe0] sm:$0xff] %vm883_vm4, %v844_v26 }
 0x30b   : > { %1028 = vrot.lane.b32.xlu0 %v5021_v46, %s4469_s20  ;;  %1024 = vrot.lane.b32.xlu2 %v4965_v4, %s4469_s20 }
 0x30c   : > { %1588 = vrot.lane.b32.xlu1 %v4830_v1, %s4472_s29  ;;  %v5252_v51 = vpop.permute.xlu1 %1215 }
 0x30d   : > { %v814_v38 = vpop.permute.xlu0 %813  ;;  %v1005_v39 = vpop.permute.xlu2 %1004 }
 0x30e   : > { %897 = vst.msk [vmem:[#allocation4 + $0x68] sm:$0xff] %vm883_vm4, %v814_v38 }
 0x30f   : > { %1089 = vst.msk [vmem:[#allocation4 + $0x60] sm:$0xff] %vm1076_vm5, %v1005_v39 }
 0x310   : > { %1282 = vst.msk [vmem:[#allocation4 + $0x60] sm:$0xff] %vm1269_vm6, %v1198_v44 }
 0x313   : > { %1034 = vrot.lane.b32.xlu0 %v5078_v24, %s4469_s20  ;;  %1030 = vrot.lane.b32.xlu2 %v5019_v43, %s4469_s20 }
 0x314   : > { %1594 = vrot.lane.b32.xlu1 %v4873_v18, %s4472_s29  ;;  %v5262_v52 = vpop.permute.xlu1 %1221 }
 0x315   : > { %v846_v1 = vpop.permute.xlu0 %845  ;;  %v625_v22 = vpop.permute.xlu2 %624 }
 0x316   : > { %913 = vst.msk [vmem:[#allocation4 + $0xe8] sm:$0xff] %vm883_vm4, %v846_v1  ;;  %v1302_v1 = vld [vmem:[#allocation2 + $0x1a] sm:$0xff] }
 0x317   : > { %1106 = vst.msk [vmem:[#allocation4 + $0xe8] sm:$0xff] %vm1076_vm5, %v5102_v41  ;;  %v1110_v41 = vld [vmem:[#allocation2 + $0x21] sm:$0xff] }
 0x318   : > { %706 = vst.msk [vmem:[#allocation4 + $0x78] sm:$0xff] %vm690_vm3, %v625_v22 }
 0x31b   : > { %1036 = vrot.lane.b32.xlu2 %v5138_v16, %s4469_s20  ;;  %1040 = vrot.lane.b32.xlu0 %v5246_v47, %s4469_s20 }
 0x31c   : > { %1600 = vrot.lane.b32.xlu1 %v4965_v4, %s4472_s29 }
 0x31d   : > { %v1003_v18 = vpop.permute.xlu0 %1002  ;;  %v657_v5 = vpop.permute.xlu2 %656 }
 0x31e   : > { %1088 = vst.msk [vmem:[#allocation4 + $0x58] sm:$0xff] %vm1076_vm5, %v1003_v18  ;;  %v5381_v18 = vld [vmem:[#allocation2 + $0x52] sm:$0xff] }
 0x31f   : > { %722 = vst.msk [vmem:[#allocation4 + $0xf8] sm:$0xff] %vm690_vm3, %v657_v5  ;;  %v1305_v5 = vld [vmem:[#allocation2 + $0x3a] sm:$0xff] }
 0x323   : > { %1175 = vrot.lane.b32.xlu0 %v1110_v41, %s4470_s26  ;;  %1042 = vrot.lane.b32.xlu2 %v947_v56, %s4469_s20 }
 0x324   : > { %1606 = vrot.lane.b32.xlu1 %v5019_v43, %s4472_s29  ;;  %v5274_v43 = vpop.permute.xlu1 %1227 }
 0x325   : > { %v623_v34 = vpop.permute.xlu0 %622  ;;  %v816_v57 = vpop.permute.xlu2 %815 }
 0x326   : > { %705 = vst.msk [vmem:[#allocation4 + $0x70] sm:$0xff] %vm690_vm3, %v623_v34 }
 0x327   : > { %898 = vst.msk [vmem:[#allocation4 + $0x70] sm:$0xff] %vm883_vm4, %v816_v57 }
 0x32b   : > { %1181 = vrot.lane.b32.xlu0 %v4897_v30, %s4470_s26  ;;  %1177 = vrot.lane.b32.xlu2 %v4854_v12, %s4470_s26 }
 0x32c   : > { %1612 = vrot.lane.b32.xlu1 %v5138_v16, %s4472_s29  ;;  %v5283_v16 = vpop.permute.xlu1 %1233 }
 0x32d   : > { %v655_v4 = vpop.permute.xlu0 %654  ;;  %v848_v28 = vpop.permute.xlu2 %847 }
 0x32e   : > { %721 = vst.msk [vmem:[#allocation4 + $0xf0] sm:$0xff] %vm690_vm3, %v655_v4  ;;  %v1886_v4 = vld [vmem:[#allocation2 + $0x62] sm:$0xff] }
 0x32f   : > { %914 = vst.msk [vmem:[#allocation4 + $0xf0] sm:$0xff] %vm883_vm4, %v848_v28 }
 0x333   : > { %1187 = vrot.lane.b32.xlu0 %v4953_v63, %s4470_s26  ;;  %1183 = vrot.lane.b32.xlu2 %v4906_v33, %s4470_s26 }
 0x334   : > { %1618 = vrot.lane.b32.xlu1 %v947_v56, %s4472_s29  ;;  %v5296_v21 = vpop.permute.xlu1 %1368  ;;  %v1719_v56 = vld [vmem:[#allocation2 + $0x199] sm:$0xff] }
 0x335   : > { %v818_v30 = vpop.permute.xlu0 %817  ;;  %v629_v61 = vpop.permute.xlu2 %628 }
 0x336   : > { %899 = vst.msk [vmem:[#allocation4 + $0x78] sm:$0xff] %vm883_vm4, %v818_v30 }
 0x337   : > { %708 = vst.msk [vmem:[#allocation4 + $0x88] sm:$0xff] %vm690_vm3, %v629_v61 }
 0x33b   : > { %1193 = vrot.lane.b32.xlu0 %v5057_v40, %s4470_s26  ;;  %1189 = vrot.lane.b32.xlu2 %v4997_v27, %s4470_s26 }
 0x33c   : > { %1753 = vrot.lane.b32.xlu1 %v4854_v12, %s4473_s9  ;;  %v5303_v12 = vld [vmem:[#allocation2 + $0xd9] sm:$0xff]  ;;  %v5311_v13 = vpop.permute.xlu1 %1374 }
 0x33d   : > { %v850_v63 = vpop.permute.xlu0 %849  ;;  %v820_v3 = vpop.permute.xlu2 %819 }
 0x33e   : > { %915 = vst.msk [vmem:[#allocation4 + $0xf8] sm:$0xff] %vm883_vm4, %v850_v63  ;;  %v5439_v63 = vld [vmem:[#allocation2 + $0x10a] sm:$0xff] }
 0x343   : > { %1199 = vrot.lane.b32.xlu0 %v5125_v48, %s4470_s26  ;;  %1195 = vrot.lane.b32.xlu2 %v5068_v9, %s4470_s26 }
 0x344   : > { %1759 = vrot.lane.b32.xlu1 %v4906_v33, %s4473_s9 }
 0x345   : > { %v627_v40 = vpop.permute.xlu0 %626  ;;  %v1009_v7 = vpop.permute.xlu2 %1008 }
 0x346   : > { %707 = vst.msk [vmem:[#allocation4 + $0x80] sm:$0xff] %vm690_vm3, %v627_v40 }
 0x347   : > { %900 = vst.msk [vmem:[#allocation4 + $0x80] sm:$0xff] %vm883_vm4, %v820_v3  ;;  %v1320_v3 = vld [vmem:[#allocation2 + $0xf2] sm:$0xff] }
 0x348   : > { %1091 = vst.msk [vmem:[#allocation4 + $0x70] sm:$0xff] %vm1076_vm5, %v1009_v7  ;;  %v5452_v7 = vld [vmem:[#allocation2 + $0x12a] sm:$0xff] }
 0x34b   : > { %1205 = vrot.lane.b32.xlu0 %v5303_v12, %s4470_s26  ;;  %1201 = vrot.lane.b32.xlu2 %v5161_v45, %s4470_s26 }
 0x34c   : > { %1765 = vrot.lane.b32.xlu1 %v4997_v27, %s4473_s9  ;;  %v5322_v27 = vpop.permute.xlu1 %1380 }
 0x34d   : > { %v822_v33 = vpop.permute.xlu0 %821  ;;  %v1013_v48 = vpop.permute.xlu2 %1012 }
 0x34e   : > { %901 = vst.msk [vmem:[#allocation4 + $0x88] sm:$0xff] %vm883_vm4, %v822_v33  ;;  %v1323_v33 = vld [vmem:[#allocation2 + $0x112] sm:$0xff] }
 0x34f   : > { %1093 = vst.msk [vmem:[#allocation4 + $0x80] sm:$0xff] %vm1076_vm5, %v1013_v48 }
 0x353   : > { %1211 = vrot.lane.b32.xlu0 %v4871_v17, %s4470_s26  ;;  %1207 = vrot.lane.b32.xlu2 %v1126_v10, %s4470_s26 }
 0x354   : > { %1771 = vrot.lane.b32.xlu1 %v5068_v9, %s4473_s9  ;;  %v5336_v44 = vpop.permute.xlu1 %1386 }
 0x355   : > { %v1007_v35 = vpop.permute.xlu0 %1006  ;;  %v1017_v6 = vpop.permute.xlu2 %1016 }
 0x356   : > { %1090 = vst.msk [vmem:[#allocation4 + $0x68] sm:$0xff] %vm1076_vm5, %v1007_v35 }
 0x357   : > { %1095 = vst.msk [vmem:[#allocation4 + $0x90] sm:$0xff] %vm1076_vm5, %v1017_v6 }
 0x358   : > { %1288 = vst.msk [vmem:[#allocation4 + $0x90] sm:$0xff] %vm1269_vm6, %v5234_v58  ;;  %v5368_v58 = vld [vmem:[#allocation2 + $0x32] sm:$0xff] }
 0x35b   : > { %1217 = vrot.lane.b32.xlu0 %v4951_v62, %s4470_s26  ;;  %1213 = vrot.lane.b32.xlu2 %v4904_v31, %s4470_s26 }
 0x35c   : > { %1777 = vrot.lane.b32.xlu1 %v5161_v45, %s4473_s9  ;;  %v1707_v45 = vld [vmem:[#allocation2 + $0x109] sm:$0xff]  ;;  %v5349_v19 = vpop.permute.xlu1 %1392 }
 0x35d   : > { %v1011_v17 = vpop.permute.xlu0 %1010  ;;  %v1021_v9 = vpop.permute.xlu2 %1020 }
 0x35e   : > { %1092 = vst.msk [vmem:[#allocation4 + $0x78] sm:$0xff] %vm1076_vm5, %v1011_v17  ;;  %v1332_v17 = vld [vmem:[#allocation2 + $0x182] sm:$0xff] }
 0x35f   : > { %1285 = vst.msk [vmem:[#allocation4 + $0x78] sm:$0xff] %vm1269_vm6, %v5223_v49  ;;  %v5354_v49 = vld [vmem:[#allocation2 + $0x189] sm:$0xff] }
 0x360   : > { %1097 = vst.msk [vmem:[#allocation4 + $0xa0] sm:$0xff] %vm1076_vm5, %v1021_v9 }
 0x363   : > { %1223 = vrot.lane.b32.xlu0 %v5017_v42, %s4470_s26  ;;  %1219 = vrot.lane.b32.xlu2 %v4963_v2, %s4470_s26 }
 0x364   : > { %1783 = vrot.lane.b32.xlu1 %v1126_v10, %s4473_s9  ;;  %v5362_v39 = vpop.permute.xlu1 %1398 }
 0x365   : > { %v1015_v31 = vpop.permute.xlu0 %1014  ;;  %v1025_v62 = vpop.permute.xlu2 %1024 }
 0x366   : > { %1094 = vst.msk [vmem:[#allocation4 + $0x88] sm:$0xff] %vm1076_vm5, %v1015_v31  ;;  %v1499_v31 = vld [vmem:[#allocation2 + $0x50] sm:$0xff] }
 0x367   : > { %1099 = vst.msk [vmem:[#allocation4 + $0xb0] sm:$0xff] %vm1076_vm5, %v1025_v62  ;;  %v1497_v62 = vld [vmem:[#allocation2 + $0x38] sm:$0xff] }
 0x36b   : > { %1229 = vrot.lane.b32.xlu0 %v5123_v23, %s4470_s26  ;;  %1225 = vrot.lane.b32.xlu2 %v5066_v8, %s4470_s26 }
 0x36c   : > { %1789 = vrot.lane.b32.xlu1 %v1707_v45, %s4473_s9 }
 0x36d   : > { %v1019_v42 = vpop.permute.xlu0 %1018  ;;  %v1031_v26 = vpop.permute.xlu2 %1030 }
 0x36e   : > { %1096 = vst.msk [vmem:[#allocation4 + $0x98] sm:$0xff] %vm1076_vm5, %v1019_v42  ;;  %v1502_v42 = vld [vmem:[#allocation2 + $0x78] sm:$0xff] }
 0x36f   : > { %1102 = vst.msk [vmem:[#allocation4 + $0xc8] sm:$0xff] %vm1076_vm5, %v1031_v26  ;;  %v1500_v26 = vld [vmem:[#allocation2 + $0x60] sm:$0xff] }
 0x373   : > { %1235 = vrot.lane.b32.xlu0 %v5354_v49, %s4470_s26  ;;  %1231 = vrot.lane.b32.xlu2 %v5136_v15, %s4470_s26 }
 0x374   : > { %1795 = vrot.lane.b32.xlu1 %v4963_v2, %s4473_s9 }
 0x375   : > { %v1023_v23 = vpop.permute.xlu0 %1022  ;;  %v1037_v38 = vpop.permute.xlu2 %1036 }
 0x376   : > { %1098 = vst.msk [vmem:[#allocation4 + $0xa8] sm:$0xff] %vm1076_vm5, %v1023_v23 }
 0x377   : > { %1291 = vst.msk [vmem:[#allocation4 + $0xa8] sm:$0xff] %vm1269_vm6, %v5252_v51  ;;  %v5378_v51 = vpop.permute.xlu1 %1404 }
 0x378   : > { %1105 = vst.msk [vmem:[#allocation4 + $0xe0] sm:$0xff] %vm1076_vm5, %v1037_v38  ;;  %v1503_v38 = vld [vmem:[#allocation2 + $0x80] sm:$0xff] }
 0x37b   : > { %1370 = vrot.lane.b32.xlu0 %v5368_v58, %s4471_s28  ;;  %1366 = vrot.lane.b32.xlu2 %v1302_v1, %s4471_s28 }
 0x37c   : > { %1801 = vrot.lane.b32.xlu1 %v5066_v8, %s4473_s9 }
 0x37d   : > { %v1029_v2 = vpop.permute.xlu0 %1028  ;;  %v1043_v22 = vpop.permute.xlu2 %1042 }
 0x37e   : > { %1101 = vst.msk [vmem:[#allocation4 + $0xc0] sm:$0xff] %vm1076_vm5, %v1029_v2 }
 0x37f   : > { %1294 = vst.msk [vmem:[#allocation4 + $0xc0] sm:$0xff] %vm1269_vm6, %v5262_v52  ;;  %v5392_v34 = vpop.permute.xlu1 %1410 }
 0x380   : > { %1108 = vst.msk [vmem:[#allocation4 + $0xf8] sm:$0xff] %vm1076_vm5, %v1043_v22 }
 0x383   : > { %1376 = vrot.lane.b32.xlu0 %v5381_v18, %s4471_s28  ;;  %1372 = vrot.lane.b32.xlu2 %v1305_v5, %s4471_s28 }
 0x384   : > { %1807 = vrot.lane.b32.xlu1 %v5136_v15, %s4473_s9 }
 0x385   : > { %v1035_v8 = vpop.permute.xlu0 %1034  ;;  %v1178_v41 = vpop.permute.xlu2 %1177 }
 0x386   : > { %1104 = vst.msk [vmem:[#allocation4 + $0xd8] sm:$0xff] %vm1076_vm5, %v1035_v8 }
 0x387   : > { %1297 = vst.msk [vmem:[#allocation4 + $0xd8] sm:$0xff] %vm1269_vm6, %v5274_v43 }
 0x388   : > { %1272 = vst.msk [vmem:[#allocation4 + $0x10] sm:$0xff] %vm1269_vm6, %v1178_v41 }
 0x38b   : > { %1382 = vrot.lane.b32.xlu0 %v5039_v54, %s4471_s28  ;;  %1378 = vrot.lane.b32.xlu2 %v4978_v11, %s4471_s28  ;;  %v5407_v54 = vpop.permute.xlu1 %1416 }
 0x38c   : > { %1813 = vrot.lane.b32.xlu1 %v1719_v56, %s4473_s9  ;;  %v1512_v56 = vld [vmem:[#allocation2 + $0xf0] sm:$0xff] }
 0x38d   : > { %v1041_v15 = vpop.permute.xlu0 %1040  ;;  %v1184_v57 = vpop.permute.xlu2 %1183 }
 0x38e   : > { %1107 = vst.msk [vmem:[#allocation4 + $0xf0] sm:$0xff] %vm1076_vm5, %v1041_v15 }
 0x38f   : > { %1300 = vst.msk [vmem:[#allocation4 + $0xf0] sm:$0xff] %vm1269_vm6, %v5283_v16 }
 0x390   : > { %1275 = vst.msk [vmem:[#allocation4 + $0x28] sm:$0xff] %vm1269_vm6, %v1184_v57  ;;  %v1517_v57 = vld [vmem:[#allocation2 + $0x128] sm:$0xff] }
 0x393   : > { %1388 = vrot.lane.b32.xlu0 %v5080_v25, %s4471_s28  ;;  %1384 = vrot.lane.b32.xlu2 %v5023_v50, %s4471_s28  ;;  %v5417_v43 = vpop.permute.xlu1 %1422 }
 0x394   : > { %1948 = vrot.lane.b32.xlu1 %v1305_v5, %s4474_s10  ;;  %v1511_v5 = vld [vmem:[#allocation2 + $0xe0] sm:$0xff] }
 0x395   : > { %v1176_v11 = vpop.permute.xlu0 %1175  ;;  %v1190_v52 = vpop.permute.xlu2 %1189 }
 0x396   : > { %1271 = vst.msk [vmem:[#allocation4 + $0x8] sm:$0xff] %vm1269_vm6, %v1176_v11 }
 0x397   : > { %1278 = vst.msk [vmem:[#allocation4 + $0x40] sm:$0xff] %vm1269_vm6, %v1190_v52 }
 0x398   : > { %1464 = vst.msk [vmem:[#allocation4 + $0x8] sm:$0xff] %vm1462_vm7, %v5296_v21 }
 0x39b   : > { %1394 = vrot.lane.b32.xlu0 %v5181_v37, %s4471_s28  ;;  %1390 = vrot.lane.b32.xlu2 %v5151_v36, %s4471_s28  ;;  %v5425_v37 = vld [vmem:[#allocation2 + $0xe2] sm:$0xff]  ;;  %v5435_v16 = vpop.permute.xlu1 %1428 }
 0x39c   : > { %1954 = vrot.lane.b32.xlu1 %v1886_v4, %s4474_s10  ;;  %v1520_v4 = vld [vmem:[#allocation2 + $0x150] sm:$0xff] }
 0x39d   : > { %v1182_v25 = vpop.permute.xlu0 %1181  ;;  %v1196_v28 = vpop.permute.xlu2 %1195 }
 0x39e   : > { %1274 = vst.msk [vmem:[#allocation4 + $0x20] sm:$0xff] %vm1269_vm6, %v1182_v25 }
 0x39f   : > { %1281 = vst.msk [vmem:[#allocation4 + $0x58] sm:$0xff] %vm1269_vm6, %v1196_v28 }
 0x3a0   : > { %1467 = vst.msk [vmem:[#allocation4 + $0x20] sm:$0xff] %vm1462_vm7, %v5311_v13 }
 0x3a3   : > { %1400 = vrot.lane.b32.xlu0 %v5425_v37, %s4471_s28  ;;  %1396 = vrot.lane.b32.xlu2 %v5170_v20, %s4471_s28  ;;  %v5450_v40 = vpop.permute.xlu1 %1564 }
 0x3a4   : > { %1960 = vrot.lane.b32.xlu1 %v5023_v50, %s4474_s10 }
 0x3a5   : > { %v1188_v30 = vpop.permute.xlu0 %1187  ;;  %v1202_v61 = vpop.permute.xlu2 %1201 }
 0x3a6   : > { %1277 = vst.msk [vmem:[#allocation4 + $0x38] sm:$0xff] %vm1269_vm6, %v1188_v30  ;;  %v1523_v30 = vld [vmem:[#allocation2 + $0x170] sm:$0xff] }
 0x3a7   : > { %1284 = vst.msk [vmem:[#allocation4 + $0x70] sm:$0xff] %vm1269_vm6, %v1202_v61 }
 0x3a8   : > { %1470 = vst.msk [vmem:[#allocation4 + $0x38] sm:$0xff] %vm1462_vm7, %v5322_v27  ;;  %v1496_v27 = vld [vmem:[#allocation2 + $0x30] sm:$0xff] }
 0x3ab   : > { %1406 = vrot.lane.b32.xlu0 %v5439_v63, %s4471_s28  ;;  %1402 = vrot.lane.b32.xlu2 %v1320_v3, %s4471_s28  ;;  %v5467_v13 = vpop.permute.xlu1 %1570 }
 0x3ac   : > { %1966 = vrot.lane.b32.xlu1 %v5151_v36, %s4474_s10 }
 0x3ad   : > { %v1194_v50 = vpop.permute.xlu0 %1193  ;;  %v1208_v21 = vpop.permute.xlu2 %1207 }
 0x3ae   : > { %1280 = vst.msk [vmem:[#allocation4 + $0x50] sm:$0xff] %vm1269_vm6, %v1194_v50 }
 0x3af   : > { %1287 = vst.msk [vmem:[#allocation4 + $0x88] sm:$0xff] %vm1269_vm6, %v1208_v21 }
 0x3b0   : > { %1473 = vst.msk [vmem:[#allocation4 + $0x50] sm:$0xff] %vm1462_vm7, %v5336_v44 }
 0x3b3   : > { %1412 = vrot.lane.b32.xlu0 %v5452_v7, %s4471_s28  ;;  %1408 = vrot.lane.b32.xlu2 %v1323_v33, %s4471_s28  ;;  %v5479_v6 = vpop.permute.xlu1 %1576 }
 0x3b4   : > { %1972 = vrot.lane.b32.xlu1 %v5170_v20, %s4474_s10 }
 0x3b5   : > { %v1200_v36 = vpop.permute.xlu0 %1199  ;;  %v1214_v48 = vpop.permute.xlu2 %1213 }
 0x3b6   : > { %1283 = vst.msk [vmem:[#allocation4 + $0x68] sm:$0xff] %vm1269_vm6, %v1200_v36 }
 0x3b7   : > { %1290 = vst.msk [vmem:[#allocation4 + $0xa0] sm:$0xff] %vm1269_vm6, %v1214_v48 }
 0x3b8   : > { %1476 = vst.msk [vmem:[#allocation4 + $0x68] sm:$0xff] %vm1462_vm7, %v5349_v19 }
 0x3bb   : > { %1418 = vrot.lane.b32.xlu0 %v5105_v14, %s4471_s28  ;;  %1414 = vrot.lane.b32.xlu2 %v5048_v59, %s4471_s28  ;;  %v5491_v44 = vpop.permute.xlu1 %1582 }
 0x3bc   : > { %1978 = vrot.lane.b32.xlu1 %v1320_v3, %s4474_s10 }
 0x3bd   : > { %v1206_v20 = vpop.permute.xlu0 %1205  ;;  %v1220_v10 = vpop.permute.xlu2 %1219 }
 0x3be   : > { %1286 = vst.msk [vmem:[#allocation4 + $0x80] sm:$0xff] %vm1269_vm6, %v1206_v20  ;;  %v1691_v20 = vld [vmem:[#allocation2 + $0x49] sm:$0xff] }
 0x3bf   : > { %1293 = vst.msk [vmem:[#allocation4 + $0xb8] sm:$0xff] %vm1269_vm6, %v1220_v10 }
 0x3c0   : > { %1479 = vst.msk [vmem:[#allocation4 + $0x80] sm:$0xff] %vm1462_vm7, %v5362_v39 }
 0x3c3   : > { %1424 = vrot.lane.b32.xlu0 %v5149_v29, %s4471_s28  ;;  %1420 = vrot.lane.b32.xlu2 %v5094_v32, %s4471_s28  ;;  %v5503_v19 = vpop.permute.xlu1 %1588 }
 0x3c4   : > { %1984 = vrot.lane.b32.xlu1 %v1323_v33, %s4474_s10  ;;  %v1690_v33 = vld [vmem:[#allocation2 + $0x39] sm:$0xff] }
 0x3c5   : > { %v1212_v14 = vpop.permute.xlu0 %1211  ;;  %v1226_v35 = vpop.permute.xlu2 %1225 }
 0x3c6   : > { %1289 = vst.msk [vmem:[#allocation4 + $0x98] sm:$0xff] %vm1269_vm6, %v1212_v14 }
 0x3c7   : > { %1296 = vst.msk [vmem:[#allocation4 + $0xd0] sm:$0xff] %vm1269_vm6, %v1226_v35  ;;  %v1696_v35 = vld [vmem:[#allocation2 + $0x81] sm:$0xff] }
 0x3c8   : > { %1482 = vst.msk [vmem:[#allocation4 + $0x98] sm:$0xff] %vm1462_vm7, %v5378_v51 }
 0x3cb   : > { %1560 = vrot.lane.b32.xlu0 %v1496_v27, %s4472_s29  ;;  %1426 = vrot.lane.b32.xlu2 %v1332_v17, %s4471_s28  ;;  %v1595_v39 = vpop.permute.xlu1 %1594 }
 0x3cc   : > { %1990 = vrot.lane.b32.xlu1 %v5048_v59, %s4474_s10 }
 0x3cd   : > { %v1218_v29 = vpop.permute.xlu0 %1217  ;;  %v1232_v9 = vpop.permute.xlu2 %1231 }
 0x3ce   : > { %1292 = vst.msk [vmem:[#allocation4 + $0xb0] sm:$0xff] %vm1269_vm6, %v1218_v29 }
 0x3cf   : > { %1299 = vst.msk [vmem:[#allocation4 + $0xe8] sm:$0xff] %vm1269_vm6, %v1232_v9  ;;  %v1699_v9 = vld [vmem:[#allocation2 + $0xa9] sm:$0xff] }
 0x3d0   : > { %1485 = vst.msk [vmem:[#allocation4 + $0xb0] sm:$0xff] %vm1462_vm7, %v5392_v34 }
 0x3d3   : > { %1566 = vrot.lane.b32.xlu0 %v1499_v31, %s4472_s29  ;;  %1562 = vrot.lane.b32.xlu2 %v1497_v62, %s4472_s29  ;;  %v1601_v51 = vpop.permute.xlu1 %1600 }
 0x3d4   : > { %1996 = vrot.lane.b32.xlu1 %v5094_v32, %s4474_s10 }
 0x3d5   : > { %v1224_v59 = vpop.permute.xlu0 %1223  ;;  %v1367_v45 = vpop.permute.xlu2 %1366 }
 0x3d6   : > { %1295 = vst.msk [vmem:[#allocation4 + $0xc8] sm:$0xff] %vm1269_vm6, %v1224_v59 }
 0x3d7   : > { %1463 = vst.msk [vmem:[#allocation4] sm:$0xff] %vm1462_vm7, %v1367_v45  ;;  %v1702_v45 = vld [vmem:[#allocation2 + $0xc9] sm:$0xff] }
 0x3d8   : > { %1488 = vst.msk [vmem:[#allocation4 + $0xc8] sm:$0xff] %vm1462_vm7, %v5407_v54  ;;  %v1515_v54 = vld [vmem:[#allocation2 + $0x110] sm:$0xff] }
 0x3db   : > { %1572 = vrot.lane.b32.xlu0 %v1502_v42, %s4472_s29  ;;  %1568 = vrot.lane.b32.xlu2 %v1500_v26, %s4472_s29 }
 0x3dc   : > { %2002 = vrot.lane.b32.xlu1 %v1332_v17, %s4474_s10 }
 0x3dd   : > { %v1230_v32 = vpop.permute.xlu0 %1229  ;;  %v1373_v23 = vpop.permute.xlu2 %1372 }
 0x3de   : > { %1298 = vst.msk [vmem:[#allocation4 + $0xe0] sm:$0xff] %vm1269_vm6, %v1230_v32 }
 0x3df   : > { %1491 = vst.msk [vmem:[#allocation4 + $0xe0] sm:$0xff] %vm1462_vm7, %v5417_v43 }
 0x3e0   : > { %1466 = vst.msk [vmem:[#allocation4 + $0x18] sm:$0xff] %vm1462_vm7, %v1373_v23  ;;  %v1705_v23 = vld [vmem:[#allocation2 + $0xf1] sm:$0xff] }
 0x3e3   : > { %1578 = vrot.lane.b32.xlu0 %v4802_v53, %s4472_s29  ;;  %1574 = vrot.lane.b32.xlu2 %v1503_v38, %s4472_s29 }
 0x3e5   : > { %v1236_v1 = vpop.permute.xlu0 %1235  ;;  %v1379_v2 = vpop.permute.xlu2 %1378 }
 0x3e6   : > { %1301 = vst.msk [vmem:[#allocation4 + $0xf8] sm:$0xff] %vm1269_vm6, %v1236_v1 }
 0x3e7   : > { %1494 = vst.msk [vmem:[#allocation4 + $0xf8] sm:$0xff] %vm1462_vm7, %v5435_v16 }
 0x3e8   : > { %1469 = vst.msk [vmem:[#allocation4 + $0x30] sm:$0xff] %vm1462_vm7, %v1379_v2  ;;  %v1708_v2 = vld [vmem:[#allocation2 + $0x111] sm:$0xff] }
 0x3eb   : > { %1584 = vrot.lane.b32.xlu0 %v4819_v60, %s4472_s29  ;;  %1580 = vrot.lane.b32.xlu2 %v4808_v55, %s4472_s29  ;;  %v1607_v55 = vpop.permute.xlu1 %1606  ;;  %v1514_v60 = vld [vmem:[#allocation2 + $0x108] sm:$0xff] }
 0x3ed   : > { %v1371_v22 = vpop.permute.xlu0 %1370  ;;  %v1385_v53 = vpop.permute.xlu2 %1384 }
 0x3ee   : > { %1465 = vst.msk [vmem:[#allocation4 + $0x10] sm:$0xff] %vm1462_vm7, %v1371_v22  ;;  %v1706_v22 = vld [vmem:[#allocation2 + $0xf9] sm:$0xff] }
 0x3ef   : > { %1472 = vst.msk [vmem:[#allocation4 + $0x48] sm:$0xff] %vm1462_vm7, %v1385_v53 }
 0x3f0   : > { %1659 = vst.msk [vmem:[#allocation4 + $0x10] sm:$0xff] %vm1656_vm8, %v5450_v40  ;;  %v1527_v40 = vld [vmem:[#allocation2 + $0x1a0] sm:$0xff] }
 0x3f3   : > { %1590 = vrot.lane.b32.xlu0 %v1511_v5, %s4472_s29  ;;  %1586 = vrot.lane.b32.xlu2 %v4824_v0, %s4472_s29  ;;  %v1613_v15 = vpop.permute.xlu1 %1612  ;;  %v1709_v5 = vld [vmem:[#allocation2 + $0x121] sm:$0xff] }
 0x3f5   : > { %v1377_v8 = vpop.permute.xlu0 %1376  ;;  %v1391_v41 = vpop.permute.xlu2 %1390 }
 0x3f6   : > { %1468 = vst.msk [vmem:[#allocation4 + $0x28] sm:$0xff] %vm1462_vm7, %v1377_v8 }
 0x3f7   : > { %1475 = vst.msk [vmem:[#allocation4 + $0x60] sm:$0xff] %vm1462_vm7, %v1391_v41 }
 0x3f8   : > { %1662 = vst.msk [vmem:[#allocation4 + $0x28] sm:$0xff] %vm1656_vm8, %v5467_v13  ;;  %v1693_v13 = vld [vmem:[#allocation2 + $0x61] sm:$0xff] }
 0x3fb   : > { %1596 = vrot.lane.b32.xlu0 %v1514_v60, %s4472_s29  ;;  %1592 = vrot.lane.b32.xlu2 %v1512_v56, %s4472_s29  ;;  %v1619_v25 = vpop.permute.xlu1 %1618  ;;  %v1714_v60 = vld [vmem:[#allocation2 + $0x159] sm:$0xff]  ;;  %v1712_v56 = vld [vmem:[#allocation2 + $0x141] sm:$0xff] }
 0x3fd   : > { %v1383_v0 = vpop.permute.xlu0 %1382  ;;  %v1397_v34 = vpop.permute.xlu2 %1396 }
 0x3fe   : > { %1471 = vst.msk [vmem:[#allocation4 + $0x40] sm:$0xff] %vm1462_vm7, %v1383_v0 }
 0x3ff   : > { %1478 = vst.msk [vmem:[#allocation4 + $0x78] sm:$0xff] %vm1462_vm7, %v1397_v34 }
 0x400   : > { %1665 = vst.msk [vmem:[#allocation4 + $0x40] sm:$0xff] %vm1656_vm8, %v5479_v6  ;;  %v1694_v6 = vld [vmem:[#allocation2 + $0x69] sm:$0xff] }
 0x403   : > { %1602 = vrot.lane.b32.xlu0 %v1517_v57, %s4472_s29  ;;  %1598 = vrot.lane.b32.xlu2 %v1515_v54, %s4472_s29  ;;  %v1754_v3 = vpop.permute.xlu1 %1753  ;;  %v1717_v57 = vld [vmem:[#allocation2 + $0x181] sm:$0xff]  ;;  %v1715_v54 = vld [vmem:[#allocation2 + $0x169] sm:$0xff] }
 0x405   : > { %v1389_v11 = vpop.permute.xlu0 %1388  ;;  %v1403_v52 = vpop.permute.xlu2 %1402 }
 0x406   : > { %1474 = vst.msk [vmem:[#allocation4 + $0x58] sm:$0xff] %vm1462_vm7, %v1389_v11 }
 0x407   : > { %1481 = vst.msk [vmem:[#allocation4 + $0x90] sm:$0xff] %vm1462_vm7, %v1403_v52 }
 0x408   : > { %1668 = vst.msk [vmem:[#allocation4 + $0x58] sm:$0xff] %vm1656_vm8, %v5491_v44  ;;  %v1697_v44 = vld [vmem:[#allocation2 + $0x91] sm:$0xff] }
 0x40b   : > { %1608 = vrot.lane.b32.xlu0 %v1520_v4, %s4472_s29  ;;  %1604 = vrot.lane.b32.xlu2 %v5021_v46, %s4472_s29  ;;  %v1526_v46 = vld [vmem:[#allocation2 + $0x198] sm:$0xff] }
 0x40d   : > { %v1395_v28 = vpop.permute.xlu0 %1394  ;;  %v1409_v43 = vpop.permute.xlu2 %1408 }
 0x40e   : > { %1477 = vst.msk [vmem:[#allocation4 + $0x70] sm:$0xff] %vm1462_vm7, %v1395_v28 }
 0x40f   : > { %1484 = vst.msk [vmem:[#allocation4 + $0xa8] sm:$0xff] %vm1462_vm7, %v1409_v43 }
 0x410   : > { %1671 = vst.msk [vmem:[#allocation4 + $0x70] sm:$0xff] %vm1656_vm8, %v5503_v19  ;;  %v1700_v19 = vld [vmem:[#allocation2 + $0xb1] sm:$0xff] }
 0x413   : > { %1614 = vrot.lane.b32.xlu0 %v1523_v30, %s4472_s29  ;;  %1610 = vrot.lane.b32.xlu2 %v5078_v24, %s4472_s29  ;;  %v1760_v24 = vpop.permute.xlu1 %1759 }
 0x415   : > { %v1401_v61 = vpop.permute.xlu0 %1400  ;;  %v1415_v16 = vpop.permute.xlu2 %1414 }
 0x416   : > { %1480 = vst.msk [vmem:[#allocation4 + $0x88] sm:$0xff] %vm1462_vm7, %v1401_v61  ;;  %v1884_v61 = vld [vmem:[#allocation2 + $0x4a] sm:$0xff] }
 0x417   : > { %1487 = vst.msk [vmem:[#allocation4 + $0xc0] sm:$0xff] %vm1462_vm7, %v1415_v16 }
 0x418   : > { %1674 = vst.msk [vmem:[#allocation4 + $0x88] sm:$0xff] %vm1656_vm8, %v1595_v39 }
 0x41b   : > { %1620 = vrot.lane.b32.xlu0 %v1526_v46, %s4472_s29  ;;  %1616 = vrot.lane.b32.xlu2 %v5246_v47, %s4472_s29  ;;  %v1766_v47 = vpop.permute.xlu1 %1765 }
 0x41d   : > { %v1407_v50 = vpop.permute.xlu0 %1406  ;;  %v1421_v21 = vpop.permute.xlu2 %1420 }
 0x41e   : > { %1483 = vst.msk [vmem:[#allocation4 + $0xa0] sm:$0xff] %vm1462_vm7, %v1407_v50 }
 0x41f   : > { %1490 = vst.msk [vmem:[#allocation4 + $0xd8] sm:$0xff] %vm1462_vm7, %v1421_v21 }
 0x420   : > { %1677 = vst.msk [vmem:[#allocation4 + $0xa0] sm:$0xff] %vm1656_vm8, %v1601_v51 }
 0x423   : > { %1755 = vrot.lane.b32.xlu0 %v1690_v33, %s4473_s9  ;;  %1622 = vrot.lane.b32.xlu2 %v1527_v40, %s4472_s29  ;;  %v1772_v27 = vpop.permute.xlu1 %1771 }
 0x425   : > { %v1413_v36 = vpop.permute.xlu0 %1412  ;;  %v1427_v48 = vpop.permute.xlu2 %1426 }
 0x426   : > { %1486 = vst.msk [vmem:[#allocation4 + $0xb8] sm:$0xff] %vm1462_vm7, %v1413_v36 }
 0x427   : > { %1493 = vst.msk [vmem:[#allocation4 + $0xf0] sm:$0xff] %vm1462_vm7, %v1427_v48  ;;  %v1891_v48 = vld [vmem:[#allocation2 + $0x9a] sm:$0xff] }
 0x428   : > { %1680 = vst.msk [vmem:[#allocation4 + $0xb8] sm:$0xff] %vm1656_vm8, %v1607_v55 }
 0x42b   : > { %1761 = vrot.lane.b32.xlu0 %v1693_v13, %s4473_s9  ;;  %1757 = vrot.lane.b32.xlu2 %v1691_v20, %s4473_s9  ;;  %v1778_v59 = vpop.permute.xlu1 %1777 }
 0x42d   : > { %v1419_v10 = vpop.permute.xlu0 %1418  ;;  %v1563_v14 = vpop.permute.xlu2 %1562 }
 0x42e   : > { %1489 = vst.msk [vmem:[#allocation4 + $0xd0] sm:$0xff] %vm1462_vm7, %v1419_v10  ;;  %v1896_v10 = vld [vmem:[#allocation2 + $0xda] sm:$0xff] }
 0x42f   : > { %1658 = vst.msk [vmem:[#allocation4 + $0x8] sm:$0xff] %vm1656_vm8, %v1563_v14  ;;  %v1894_v14 = vld [vmem:[#allocation2 + $0xc2] sm:$0xff] }
 0x430   : > { %1683 = vst.msk [vmem:[#allocation4 + $0xd0] sm:$0xff] %vm1656_vm8, %v1613_v15 }
 0x433   : > { %1767 = vrot.lane.b32.xlu0 %v1696_v35, %s4473_s9  ;;  %1763 = vrot.lane.b32.xlu2 %v1694_v6, %s4473_s9  ;;  %v1784_v32 = vpop.permute.xlu1 %1783 }
 0x435   : > { %v1425_v17 = vpop.permute.xlu0 %1424  ;;  %v1569_v29 = vpop.permute.xlu2 %1568 }
 0x436   : > { %1492 = vst.msk [vmem:[#allocation4 + $0xe8] sm:$0xff] %vm1462_vm7, %v1425_v17  ;;  %v1899_v17 = vld [vmem:[#allocation2 + $0xfa] sm:$0xff] }
 0x437   : > { %1686 = vst.msk [vmem:[#allocation4 + $0xe8] sm:$0xff] %vm1656_vm8, %v1619_v25  ;;  %v1720_v25 = vld [vmem:[#allocation2 + $0x1a1] sm:$0xff] }
 0x438   : > { %1661 = vst.msk [vmem:[#allocation4 + $0x20] sm:$0xff] %vm1656_vm8, %v1569_v29 }
 0x43b   : > { %1773 = vrot.lane.b32.xlu0 %v1699_v9, %s4473_s9  ;;  %1769 = vrot.lane.b32.xlu2 %v1697_v44, %s4473_s9  ;;  %v1790_v1 = vpop.permute.xlu1 %1789  ;;  %v1902_v44 = vld [vmem:[#allocation2 + $0x122] sm:$0xff] }
 0x43d   : > { %v1561_v31 = vpop.permute.xlu0 %1560  ;;  %v1575_v62 = vpop.permute.xlu2 %1574 }
 0x43e   : > { %1657 = vst.msk [vmem:[#allocation4] sm:$0xff] %vm1656_vm8, %v1561_v31 }
 0x43f   : > { %1664 = vst.msk [vmem:[#allocation4 + $0x38] sm:$0xff] %vm1656_vm8, %v1575_v62 }
 0x440   : > { %1850 = vst.msk [vmem:[#allocation4] sm:$0xff] %vm1849_vm9, %v1754_v3 }
 0x443   : > { %1779 = vrot.lane.b32.xlu0 %v1702_v45, %s4473_s9  ;;  %1775 = vrot.lane.b32.xlu2 %v1700_v19, %s4473_s9  ;;  %v1796_v8 = vpop.permute.xlu1 %1795  ;;  %v1905_v45 = vld [vmem:[#allocation2 + $0x142] sm:$0xff] }
 0x445   : > { %v1567_v42 = vpop.permute.xlu0 %1566  ;;  %v1581_v26 = vpop.permute.xlu2 %1580 }
 0x446   : > { %1660 = vst.msk [vmem:[#allocation4 + $0x18] sm:$0xff] %vm1656_vm8, %v1567_v42 }
 0x447   : > { %1667 = vst.msk [vmem:[#allocation4 + $0x50] sm:$0xff] %vm1656_vm8, %v1581_v26  ;;  %v2110_v26 = vld [vmem:[%s6834_s3 + $0x18] sm:$0xff] }
 0x448   : > { %1853 = vst.msk [vmem:[#allocation4 + $0x18] sm:$0xff] %vm1849_vm9, %v1760_v24  ;;  %v1888_v24 = vld [vmem:[#allocation2 + $0x7a] sm:$0xff] }
 0x44b   : > { %1785 = vrot.lane.b32.xlu0 %v1705_v23, %s4473_s9  ;;  %1781 = vrot.lane.b32.xlu2 %v5303_v12, %s4473_s9  ;;  %v1711_v12 = vld [vmem:[#allocation2 + $0x139] sm:$0xff]  ;;  %v1802_v15 = vpop.permute.xlu1 %1801 }
 0x44c   : > { %v1906_v23 = vld [vmem:[#allocation2 + $0x152] sm:$0xff] }
 0x44d   : > { %v1573_v38 = vpop.permute.xlu0 %1572  ;;  %v1587_v39 = vpop.permute.xlu2 %1586 }
 0x44e   : > { %1663 = vst.msk [vmem:[#allocation4 + $0x30] sm:$0xff] %vm1656_vm8, %v1573_v38  ;;  %v2108_v38 = vld [vmem:[%s6834_s3 + $0x8] sm:$0xff] }
 0x44f   : > { %1670 = vst.msk [vmem:[#allocation4 + $0x68] sm:$0xff] %vm1656_vm8, %v1587_v39 }
 0x450   : > { %1856 = vst.msk [vmem:[#allocation4 + $0x30] sm:$0xff] %vm1849_vm9, %v1766_v47 }
 0x453   : > { %1791 = vrot.lane.b32.xlu0 %v1708_v2, %s4473_s9  ;;  %1787 = vrot.lane.b32.xlu2 %v1706_v22, %s4473_s9  ;;  %v1808_v4 = vpop.permute.xlu1 %1807  ;;  %v2107_v2 = vld [vmem:[%s6834_s3] sm:$0xff] }
 0x455   : > { %v1579_v53 = vpop.permute.xlu0 %1578  ;;  %v1593_v51 = vpop.permute.xlu2 %1592 }
 0x456   : > { %1666 = vst.msk [vmem:[#allocation4 + $0x48] sm:$0xff] %vm1656_vm8, %v1579_v53  ;;  %v1911_v53 = vld [vmem:[#allocation2 + $0x18a] sm:$0xff] }
 0x457   : > { %1673 = vst.msk [vmem:[#allocation4 + $0x80] sm:$0xff] %vm1656_vm8, %v1593_v51  ;;  %v1909_v51 = vld [vmem:[#allocation2 + $0x172] sm:$0xff] }
 0x458   : > { %1859 = vst.msk [vmem:[#allocation4 + $0x48] sm:$0xff] %vm1849_vm9, %v1772_v27 }
 0x45b   : > { %1797 = vrot.lane.b32.xlu0 %v1711_v12, %s4473_s9  ;;  %1793 = vrot.lane.b32.xlu2 %v1709_v5, %s4473_s9  ;;  %v1814_v30 = vpop.permute.xlu1 %1813 }
 0x45d   : > { %v1585_v41 = vpop.permute.xlu0 %1584  ;;  %v1599_v55 = vpop.permute.xlu2 %1598 }
 0x45e   : > { %1669 = vst.msk [vmem:[#allocation4 + $0x60] sm:$0xff] %vm1656_vm8, %v1585_v41 }
 0x45f   : > { %1676 = vst.msk [vmem:[#allocation4 + $0x98] sm:$0xff] %vm1656_vm8, %v1599_v55 }
 0x460   : > { %1862 = vst.msk [vmem:[#allocation4 + $0x60] sm:$0xff] %vm1849_vm9, %v1778_v59 }
 0x463   : > { %1803 = vrot.lane.b32.xlu0 %v1714_v60, %s4473_s9  ;;  %1799 = vrot.lane.b32.xlu2 %v1712_v56, %s4473_s9  ;;  %v1949_v46 = vpop.permute.xlu1 %1948 }
 0x465   : > { %v1591_v0 = vpop.permute.xlu0 %1590  ;;  %v1605_v34 = vpop.permute.xlu2 %1604 }
 0x466   : > { %1672 = vst.msk [vmem:[#allocation4 + $0x78] sm:$0xff] %vm1656_vm8, %v1591_v0 }
 0x467   : > { %1679 = vst.msk [vmem:[#allocation4 + $0xb0] sm:$0xff] %vm1656_vm8, %v1605_v34 }
 0x468   : > { %1865 = vst.msk [vmem:[#allocation4 + $0x78] sm:$0xff] %vm1849_vm9, %v1784_v32  ;;  %v2109_v32 = vld [vmem:[%s6834_s3 + $0x10] sm:$0xff] }
 0x46b   : > { %1809 = vrot.lane.b32.xlu0 %v1717_v57, %s4473_s9  ;;  %1805 = vrot.lane.b32.xlu2 %v1715_v54, %s4473_s9  ;;  %v1955_v36 = vpop.permute.xlu1 %1954 }
 0x46d   : > { %v1597_v11 = vpop.permute.xlu0 %1596  ;;  %v1611_v52 = vpop.permute.xlu2 %1610 }
 0x46e   : > { %1675 = vst.msk [vmem:[#allocation4 + $0x90] sm:$0xff] %vm1656_vm8, %v1597_v11 }
 0x46f   : > { %1682 = vst.msk [vmem:[#allocation4 + $0xc8] sm:$0xff] %vm1656_vm8, %v1611_v52 }
 0x470   : > { %1868 = vst.msk [vmem:[#allocation4 + $0x90] sm:$0xff] %vm1849_vm9, %v1790_v1 }
 0x473   : > { %1815 = vrot.lane.b32.xlu0 %v1720_v25, %s4473_s9  ;;  %1811 = vrot.lane.b32.xlu2 %v5354_v49, %s4473_s9  ;;  %v1887_v49 = vld [vmem:[#allocation2 + $0x6a] sm:$0xff]  ;;  %v1961_v20 = vpop.permute.xlu1 %1960 }
 0x475   : > { %v1603_v28 = vpop.permute.xlu0 %1602  ;;  %v1617_v43 = vpop.permute.xlu2 %1616 }
 0x476   : > { %1678 = vst.msk [vmem:[#allocation4 + $0xa8] sm:$0xff] %vm1656_vm8, %v1603_v28 }
 0x477   : > { %1685 = vst.msk [vmem:[#allocation4 + $0xe0] sm:$0xff] %vm1656_vm8, %v1617_v43 }
 0x478   : > { %1871 = vst.msk [vmem:[#allocation4 + $0xa8] sm:$0xff] %vm1849_vm9, %v1796_v8 }
 0x47b   : > { %1950 = vrot.lane.b32.xlu0 %v1884_v61, %s4474_s10  ;;  %1946 = vrot.lane.b32.xlu2 %v5368_v58, %s4474_s10  ;;  %v1890_v58 = vld [vmem:[#allocation2 + $0x92] sm:$0xff]  ;;  %v1967_v27 = vpop.permute.xlu1 %1966 }
 0x47d   : > { %v1609_v16 = vpop.permute.xlu0 %1608  ;;  %v1623_v3 = vpop.permute.xlu2 %1622 }
 0x47e   : > { %1681 = vst.msk [vmem:[#allocation4 + $0xc0] sm:$0xff] %vm1656_vm8, %v1609_v16 }
 0x47f   : > { %1688 = vst.msk [vmem:[#allocation4 + $0xf8] sm:$0xff] %vm1656_vm8, %v1623_v3 }
 0x480   : > { %1874 = vst.msk [vmem:[#allocation4 + $0xc0] sm:$0xff] %vm1849_vm9, %v1802_v15 }
 0x483   : > { %1956 = vrot.lane.b32.xlu0 %v1887_v49, %s4474_s10  ;;  %1952 = vrot.lane.b32.xlu2 %v5381_v18, %s4474_s10  ;;  %v1893_v18 = vld [vmem:[#allocation2 + $0xb2] sm:$0xff]  ;;  %v1973_v31 = vpop.permute.xlu1 %1972 }
 0x485   : > { %v1615_v50 = vpop.permute.xlu0 %1614  ;;  %v1758_v21 = vpop.permute.xlu2 %1757 }
 0x486   : > { %1684 = vst.msk [vmem:[#allocation4 + $0xd8] sm:$0xff] %vm1656_vm8, %v1615_v50 }
 0x487   : > { %1852 = vst.msk [vmem:[#allocation4 + $0x10] sm:$0xff] %vm1849_vm9, %v1758_v21 }
 0x488   : > { %1877 = vst.msk [vmem:[#allocation4 + $0xd8] sm:$0xff] %vm1849_vm9, %v1808_v4 }
 0x48b   : > { %1962 = vrot.lane.b32.xlu0 %v1890_v58, %s4474_s10  ;;  %1958 = vrot.lane.b32.xlu2 %v1888_v24, %s4474_s10  ;;  %v1979_v42 = vpop.permute.xlu1 %1978 }
 0x48d   : > { %v1621_v40 = vpop.permute.xlu0 %1620  ;;  %v1764_v33 = vpop.permute.xlu2 %1763 }
 0x48e   : > { %1687 = vst.msk [vmem:[#allocation4 + $0xf0] sm:$0xff] %vm1656_vm8, %v1621_v40 }
 0x48f   : > { %1880 = vst.msk [vmem:[#allocation4 + $0xf0] sm:$0xff] %vm1849_vm9, %v1814_v30 }
 0x490   : > { %1855 = vst.msk [vmem:[#allocation4 + $0x28] sm:$0xff] %vm1849_vm9, %v1764_v33 }
 0x493   : > { %1968 = vrot.lane.b32.xlu0 %v1893_v18, %s4474_s10  ;;  %1964 = vrot.lane.b32.xlu2 %v1891_v48, %s4474_s10  ;;  %v1985_v22 = vpop.permute.xlu1 %1984 }
 0x495   : > { %v1756_v47 = vpop.permute.xlu0 %1755  ;;  %v1770_v13 = vpop.permute.xlu2 %1769 }
 0x496   : > { %1851 = vst.msk [vmem:[#allocation4 + $0x8] sm:$0xff] %vm1849_vm9, %v1756_v47 }
 0x497   : > { %2044 = vst.msk [vmem:[#allocation4 + $0x8] sm:$0xff] %vm2042_vm10, %v1949_v46 }
 0x498   : > { %1858 = vst.msk [vmem:[#allocation4 + $0x40] sm:$0xff] %vm1849_vm9, %v1770_v13 }
 0x49b   : > { %1974 = vrot.lane.b32.xlu0 %v1896_v10, %s4474_s10  ;;  %1970 = vrot.lane.b32.xlu2 %v1894_v14, %s4474_s10  ;;  %v1991_v8 = vpop.permute.xlu1 %1990 }
 0x49d   : > { %v1762_v35 = vpop.permute.xlu0 %1761  ;;  %v1776_v6 = vpop.permute.xlu2 %1775 }
 0x49e   : > { %1854 = vst.msk [vmem:[#allocation4 + $0x20] sm:$0xff] %vm1849_vm9, %v1762_v35  ;;  %v2076_v4 = vld [vmem:[#allocation4 + $0x8] sm:$0xff] }
 0x49f   : > { %2047 = vst.msk [vmem:[#allocation4 + $0x20] sm:$0xff] %vm2042_vm10, %v1955_v36 }
 0x4a0   : > { %1861 = vst.msk [vmem:[#allocation4 + $0x58] sm:$0xff] %vm1849_vm9, %v1776_v6 }
 0x4a3   : > { %1980 = vrot.lane.b32.xlu0 %v1899_v17, %s4474_s10  ;;  %1976 = vrot.lane.b32.xlu2 %v5425_v37, %s4474_s10  ;;  %v2111_v37 = vld [vmem:[%s6834_s3 + $0x20] sm:$0xf]  ;;  %v1997_v60 = vpop.permute.xlu1 %1996 }
 0x4a4   : > { %4264 = vmatpush.msk.msra.mxu0 %vm2213_vm11, %v2111_v37  ;;  %4338 = vmatpush.msk.msra.mxu1 %vm2213_vm11, %v2111_v37 }
 0x4a5   : > { %v1768_v29 = vpop.permute.xlu0 %1767  ;;  %v1782_v9 = vpop.permute.xlu2 %1781  ;;  %4339 = vmatpush.msk.msra.mxu3 %vm2213_vm11, %v2111_v37 }
 0x4a6   : > { %1857 = vst.msk [vmem:[#allocation4 + $0x38] sm:$0xff] %vm1849_vm9, %v1768_v29  ;;  %2229 = vmatpush.msra.mxu0 %v2110_v26  ;;  %4340 = vmatpush.msra.mxu1 %v2110_v26  ;;  %v2079_v58 = vld [vmem:[#allocation4 + $0x20] sm:$0xff] }
 0x4a7   : > { %2050 = vst.msk [vmem:[#allocation4 + $0x38] sm:$0xff] %vm2042_vm10, %v1961_v20  ;;  %4341 = vmatpush.msra.mxu3 %v2110_v26 }
 0x4a8   : > { %1864 = vst.msk [vmem:[#allocation4 + $0x70] sm:$0xff] %vm1849_vm9, %v1782_v9  ;;  %2230 = vmatpush.msra.mxu0 %v2109_v32  ;;  %4342 = vmatpush.msra.mxu1 %v2109_v32 }
 0x4a9   : > { %4343 = vmatpush.msra.mxu3 %v2109_v32 }
 0x4aa   : > { %2231 = vmatpush.msra.mxu0 %v2108_v38  ;;  %4344 = vmatpush.msra.mxu1 %v2108_v38 }
 0x4ab   : > { %1986 = vrot.lane.b32.xlu0 %v1902_v44, %s4474_s10  ;;  %1982 = vrot.lane.b32.xlu2 %v5439_v63, %s4474_s10  ;;  %v2003_v57 = vpop.permute.xlu1 %2002 }
 0x4ac   : > { %4345 = vmatpush.msra.mxu3 %v2108_v38  ;;  %2232 = vmatpush.msra.mxu0 %v2107_v2 }
 0x4ad   : > { %v1774_v62 = vpop.permute.xlu0 %1773  ;;  %v1788_v59 = vpop.permute.xlu2 %1787  ;;  %4346 = vmatpush.msra.mxu1 %v2107_v2 }
 0x4ae   : > { %1860 = vst.msk [vmem:[#allocation4 + $0x50] sm:$0xff] %vm1849_vm9, %v1774_v62  ;;  %4347 = vmatpush.msra.mxu3 %v2107_v2  ;;  %v2082_v35 = vld [vmem:[#allocation4 + $0x38] sm:$0xff] }
 0x4af   : > { %2053 = vst.msk [vmem:[#allocation4 + $0x50] sm:$0xff] %vm2042_vm10, %v1967_v27 }
 0x4b0   : > { %1867 = vst.msk [vmem:[#allocation4 + $0x88] sm:$0xff] %vm1849_vm9, %v1788_v59 }
 0x4b3   : > { %1992 = vrot.lane.b32.xlu0 %v1905_v45, %s4474_s10  ;;  %1988 = vrot.lane.b32.xlu2 %v5452_v7, %s4474_s10  ;;  %v1908_v7 = vld [vmem:[#allocation2 + $0x16a] sm:$0xff] }
 0x4b5   : > { %v1780_v63 = vpop.permute.xlu0 %1779  ;;  %v1794_v19 = vpop.permute.xlu2 %1793 }
 0x4b6   : > { %1863 = vst.msk [vmem:[#allocation4 + $0x68] sm:$0xff] %vm1849_vm9, %v1780_v63  ;;  %v2085_v45 = vld [vmem:[#allocation4 + $0x50] sm:$0xff] }
 0x4b7   : > { %2056 = vst.msk [vmem:[#allocation4 + $0x68] sm:$0xff] %vm2042_vm10, %v1973_v31 }
 0x4b8   : > { %1870 = vst.msk [vmem:[#allocation4 + $0xa0] sm:$0xff] %vm1849_vm9, %v1794_v19 }
 0x4bb   : > { %1998 = vrot.lane.b32.xlu0 %v1908_v7, %s4474_s10  ;;  %1994 = vrot.lane.b32.xlu2 %v1906_v23, %s4474_s10  ;;  %v1913_v7 = vld [vmem:[#allocation2 + $0x1a2] sm:$0xff] }
 0x4bc   : > { %2008 = vrot.lane.b32.xlu1 %v1913_v7, %s4474_s10 }
 0x4bd   : > { %v1786_v39 = vpop.permute.xlu0 %1785  ;;  %v1800_v1 = vpop.permute.xlu2 %1799 }
 0x4be   : > { %1866 = vst.msk [vmem:[#allocation4 + $0x80] sm:$0xff] %vm1849_vm9, %v1786_v39  ;;  %v2088_v24 = vld [vmem:[#allocation4 + $0x68] sm:$0xff]  ;;  %v2459_v39 = vld [vmem:[#allocation3 + $0x1] sm:$0xff] }
 0x4bf   : > { %2059 = vst.msk [vmem:[#allocation4 + $0x80] sm:$0xff] %vm2042_vm10, %v1979_v42 }
 0x4c0   : > { %1873 = vst.msk [vmem:[#allocation4 + $0xb8] sm:$0xff] %vm1849_vm9, %v1800_v1  ;;  %v1912_v1 = vld [vmem:[#allocation2 + $0x19a] sm:$0xff] }
 0x4c3   : > { %2004 = vrot.lane.b32.xlu0 %v1911_v53, %s4474_s10  ;;  %2000 = vrot.lane.b32.xlu2 %v1909_v51, %s4474_s10  ;;  %v2460_v53 = vld [vmem:[#allocation3 + $0x9] sm:$0xff]  ;;  %v5759_v51 = vld [vmem:[%s6835_s4] ss:$0 sm:$0xff] }
 0x4c5   : > { %v1792_v12 = vpop.permute.xlu0 %1791  ;;  %v1806_v5 = vpop.permute.xlu2 %1805 }
 0x4c6   : > { %1869 = vst.msk [vmem:[#allocation4 + $0x98] sm:$0xff] %vm1849_vm9, %v1792_v12  ;;  %v2091_v9 = vld [vmem:[#allocation4 + $0x80] sm:$0xff] }
 0x4c7   : > { %2062 = vst.msk [vmem:[#allocation4 + $0x98] sm:$0xff] %vm2042_vm10, %v1985_v22 }
 0x4c8   : > { %1876 = vst.msk [vmem:[#allocation4 + $0xd0] sm:$0xff] %vm1849_vm9, %v1806_v5 }
 0x4cb   : > { %2523 = vrot.lane.b32.xlu0 %v2459_v39, %s4468_s19  ;;  %2006 = vrot.lane.b32.xlu2 %v1912_v1, %s4474_s10 }
 0x4cd   : > { %v1798_v41 = vpop.permute.xlu0 %1797  ;;  %v1812_v55 = vpop.permute.xlu2 %1811 }
 0x4ce   : > { %1872 = vst.msk [vmem:[#allocation4 + $0xb0] sm:$0xff] %vm1849_vm9, %v1798_v41  ;;  %v2094_v26 = vld [vmem:[#allocation4 + $0x98] sm:$0xff] }
 0x4cf   : > { %2065 = vst.msk [vmem:[#allocation4 + $0xb0] sm:$0xff] %vm2042_vm10, %v1991_v8 }
 0x4d0   : > { %1879 = vst.msk [vmem:[#allocation4 + $0xe8] sm:$0xff] %vm1849_vm9, %v1812_v55 }
 0x4d3   : > { %2525 = vrot.lane.b32.xlu2 %v2460_v53, %s4468_s19 }
 0x4d5   : > { %v1804_v56 = vpop.permute.xlu0 %1803  ;;  %v1947_v0 = vpop.permute.xlu2 %1946 }
 0x4d6   : > { %1875 = vst.msk [vmem:[#allocation4 + $0xc8] sm:$0xff] %vm1849_vm9, %v1804_v56  ;;  %v2097_v27 = vld [vmem:[#allocation4 + $0xb0] sm:$0xff] }
 0x4d7   : > { %2068 = vst.msk [vmem:[#allocation4 + $0xc8] sm:$0xff] %vm2042_vm10, %v1997_v60 }
 0x4d8   : > { %2043 = vst.msk [vmem:[#allocation4] sm:$0xff] %vm2042_vm10, %v1947_v0 }
 0x4dd   : > { %v1810_v34 = vpop.permute.xlu0 %1809  ;;  %v1953_v15 = vpop.permute.xlu2 %1952 }
 0x4de   : > { %1878 = vst.msk [vmem:[#allocation4 + $0xe0] sm:$0xff] %vm1849_vm9, %v1810_v34  ;;  %v2100_v32 = vld [vmem:[#allocation4 + $0xc8] sm:$0xff] }
 0x4df   : > { %2071 = vst.msk [vmem:[#allocation4 + $0xe0] sm:$0xff] %vm2042_vm10, %v2003_v57  ;;  %v2075_v54 = vld [vmem:[#allocation4] sm:$0xff] }
 0x4e0   : > { %2046 = vst.msk [vmem:[#allocation4 + $0x18] sm:$0xff] %vm2042_vm10, %v1953_v15  ;;  %4265 = vmatmul.msk.f32.vlgmr.msra.gmra.mxu0 %vm2116_vm12, %v2075_v54 }
 0x4e5   : > { %v1816_v11 = vpop.permute.xlu0 %1815  ;;  %v1959_v52 = vpop.permute.xlu2 %1958 }
 0x4e6   : > { %1881 = vst.msk [vmem:[#allocation4 + $0xf8] sm:$0xff] %vm1849_vm9, %v1816_v11  ;;  %v2103_v22 = vld [vmem:[#allocation4 + $0xe0] sm:$0xff] }
 0x4e7   : > { %2049 = vst.msk [vmem:[#allocation4 + $0x30] sm:$0xff] %vm2042_vm10, %v1959_v52  ;;  %v2078_v49 = vld [vmem:[#allocation4 + $0x18] sm:$0xff] }
 0x4e8   : > { %4266 = vmatmul.msk.f32.gmra.mxu0 %vm2116_vm12, %v2076_v4 }
 0x4ed   : > { %v1951_v25 = vpop.permute.xlu0 %1950  ;;  %v1965_v28 = vpop.permute.xlu2 %1964 }
 0x4ee   : > { %2045 = vst.msk [vmem:[#allocation4 + $0x10] sm:$0xff] %vm2042_vm10, %v1951_v25  ;;  %v2081_v47 = vld [vmem:[#allocation4 + $0x30] sm:$0xff] }
 0x4ef   : > { %2052 = vst.msk [vmem:[#allocation4 + $0x48] sm:$0xff] %vm2042_vm10, %v1965_v28 }
 0x4f5   : > { %v1957_v43 = vpop.permute.xlu0 %1956  ;;  %v1971_v30 = vpop.permute.xlu2 %1970  ;;  %v2077_v61 = vld [vmem:[#allocation4 + $0x10] sm:$0xff] }
 0x4f6   : > { %2048 = vst.msk [vmem:[#allocation4 + $0x28] sm:$0xff] %vm2042_vm10, %v1957_v43  ;;  %4267 = vmatmul.msk.f32.gmra.mxu0 %vm2116_vm12, %v2077_v61  ;;  %v2084_v31 = vld [vmem:[#allocation4 + $0x48] sm:$0xff] }
 0x4f7   : > { %2055 = vst.msk [vmem:[#allocation4 + $0x60] sm:$0xff] %vm2042_vm10, %v1971_v30 }
 0x4fd   : > { %v1963_v16 = vpop.permute.xlu0 %1962  ;;  %v1977_v3 = vpop.permute.xlu2 %1976  ;;  %v2080_v36 = vld [vmem:[#allocation4 + $0x28] sm:$0xff] }
 0x4fe   : > { %2051 = vst.msk [vmem:[#allocation4 + $0x40] sm:$0xff] %vm2042_vm10, %v1963_v16  ;;  %4268 = vmatmul.msk.f32.gmra.mxu0 %vm2116_vm12, %v2078_v49  ;;  %v2087_v46 = vld [vmem:[#allocation4 + $0x60] sm:$0xff] }
 0x4ff   : > { %2058 = vst.msk [vmem:[#allocation4 + $0x78] sm:$0xff] %vm2042_vm10, %v1977_v3  ;;  %4277 = vmatmul.msk.f32.vlgmr.msra.gmra.mxu1 %vm2116_vm12, %v2087_v46 }
 0x505   : > { %v1969_v50 = vpop.permute.xlu0 %1968  ;;  %v1983_v21 = vpop.permute.xlu2 %1982  ;;  %v2083_v29 = vld [vmem:[#allocation4 + $0x40] sm:$0xff] }
 0x506   : > { %2054 = vst.msk [vmem:[#allocation4 + $0x58] sm:$0xff] %vm2042_vm10, %v1969_v50  ;;  %4269 = vmatmul.msk.f32.gmra.mxu0 %vm2116_vm12, %v2079_v58  ;;  %v2090_v6 = vld [vmem:[#allocation4 + $0x78] sm:$0xff] }
 0x507   : > { %2061 = vst.msk [vmem:[#allocation4 + $0x90] sm:$0xff] %vm2042_vm10, %v1983_v21  ;;  %4278 = vmatmul.msk.f32.gmra.mxu1 %vm2116_vm12, %v2088_v24 }
 0x50d   : > { %v1975_v40 = vpop.permute.xlu0 %1974  ;;  %v1989_v33 = vpop.permute.xlu2 %1988  ;;  %v2086_v42 = vld [vmem:[#allocation4 + $0x58] sm:$0xff] }
 0x50e   : > { %2057 = vst.msk [vmem:[#allocation4 + $0x70] sm:$0xff] %vm2042_vm10, %v1975_v40  ;;  %4270 = vmatmul.msk.f32.gmra.mxu0 %vm2116_vm12, %v2080_v36  ;;  %v2093_v63 = vld [vmem:[#allocation4 + $0x90] sm:$0xff] }
 0x50f   : > { %2064 = vst.msk [vmem:[#allocation4 + $0xa8] sm:$0xff] %vm2042_vm10, %v1989_v33 }
 0x515   : > { %v1981_v18 = vpop.permute.xlu0 %1980  ;;  %v1995_v48 = vpop.permute.xlu2 %1994  ;;  %v2089_v13 = vld [vmem:[#allocation4 + $0x70] sm:$0xff] }
 0x516   : > { %2060 = vst.msk [vmem:[#allocation4 + $0x88] sm:$0xff] %vm2042_vm10, %v1981_v18  ;;  %4271 = vmatmul.msk.f32.gmra.mxu0 %vm2116_vm12, %v2081_v47  ;;  %4279 = vmatmul.msk.f32.gmra.mxu1 %vm2116_vm12, %v2089_v13  ;;  %v2096_v20 = vld [vmem:[#allocation4 + $0xa8] sm:$0xff] }
 0x517   : > { %2067 = vst.msk [vmem:[#allocation4 + $0xc0] sm:$0xff] %vm2042_vm10, %v1995_v48  ;;  %4286 = vmatmul.msk.f32.vlgmr.msra.gmra.mxu3 %vm2116_vm12, %v2096_v20 }
 0x51d   : > { %v1987_v10 = vpop.permute.xlu0 %1986  ;;  %v2001_v14 = vpop.permute.xlu2 %2000  ;;  %v2092_v62 = vld [vmem:[#allocation4 + $0x88] sm:$0xff] }
 0x51e   : > { %2063 = vst.msk [vmem:[#allocation4 + $0xa0] sm:$0xff] %vm2042_vm10, %v1987_v10  ;;  %4272 = vmatmul.msk.f32.gmra.mxu0 %vm2116_vm12, %v2082_v35  ;;  %4280 = vmatmul.msk.f32.gmra.mxu1 %vm2116_vm12, %v2090_v6  ;;  %v2099_v19 = vld [vmem:[#allocation4 + $0xc0] sm:$0xff] }
 0x51f   : > { %2070 = vst.msk [vmem:[#allocation4 + $0xd8] sm:$0xff] %vm2042_vm10, %v2001_v14  ;;  %4287 = vmatmul.msk.f32.gmra.mxu3 %vm2116_vm12, %v2097_v27 }
 0x525   : > { %v1993_v17 = vpop.permute.xlu0 %1992  ;;  %v2095_v23 = vld [vmem:[#allocation4 + $0xa0] sm:$0xff] }
 0x526   : > { %2066 = vst.msk [vmem:[#allocation4 + $0xb8] sm:$0xff] %vm2042_vm10, %v1993_v17  ;;  %4273 = vmatmul.msk.f32.gmra.mxu0 %vm2116_vm12, %v2083_v29  ;;  %4281 = vmatmul.msk.f32.gmra.mxu1 %vm2116_vm12, %v2091_v9  ;;  %v2102_v2 = vld [vmem:[#allocation4 + $0xd8] sm:$0xff] }
 0x52d   : > { %v1999_v44 = vpop.permute.xlu0 %1998  ;;  %v2098_v59 = vld [vmem:[#allocation4 + $0xb8] sm:$0xff] }
 0x52e   : > { %2069 = vst.msk [vmem:[#allocation4 + $0xd0] sm:$0xff] %vm2042_vm10, %v1999_v44  ;;  %4274 = vmatmul.msk.f32.gmra.mxu0 %vm2116_vm12, %v2084_v31  ;;  %4282 = vmatmul.msk.f32.gmra.mxu1 %vm2116_vm12, %v2092_v62 }
 0x52f   : > { %4288 = vmatmul.msk.f32.gmra.mxu3 %vm2116_vm12, %v2098_v59 }
 0x535   : > { %v2005_v37 = vpop.permute.xlu0 %2004  ;;  %v2101_v38 = vld [vmem:[#allocation4 + $0xd0] sm:$0xff] }
 0x536   : > { %2072 = vst.msk [vmem:[#allocation4 + $0xe8] sm:$0xff] %vm2042_vm10, %v2005_v37  ;;  %4275 = vmatmul.msk.f32.gmra.mxu0 %vm2116_vm12, %v2085_v45  ;;  %4283 = vmatmul.msk.f32.gmra.mxu1 %vm2116_vm12, %v2093_v63 }
 0x537   : > { %4289 = vmatmul.msk.f32.gmra.mxu3 %vm2116_vm12, %v2099_v19 }
 0x53d   : > { %v2104_v8 = vld [vmem:[#allocation4 + $0xe8] sm:$0xff] }
 0x53e   : > { %4276 = vmatmul.msk.f32.gmra.mxu0 %vm2116_vm12, %v2086_v42  ;;  %4284 = vmatmul.msk.f32.gmra.mxu1 %vm2116_vm12, %v2094_v26 }
 0x53f   : > { %4290 = vmatmul.msk.f32.gmra.mxu3 %vm2116_vm12, %v2100_v32 }
 0x546   : > { %4285 = vmatmul.msk.f32.gmra.mxu1 %vm2116_vm12, %v2095_v23 }
 0x547   : > { %4291 = vmatmul.msk.f32.gmra.mxu3 %vm2116_vm12, %v2101_v38 }
 0x54f   : > { %4292 = vmatmul.msk.f32.gmra.mxu3 %vm2116_vm12, %v2102_v2 }
 0x557   : > { %4293 = vmatmul.msk.f32.gmra.mxu3 %vm2116_vm12, %v2103_v22 }
 0x55d   : > { %v2234_v12 = vpop.f32.mrf.mxu0 }
 0x55e   : > { %v2235_v5 = vadd.f32 %v5759_v51, %v2234_v12 }
 0x55f   : > { %4294 = vmatmul.msk.f32.gmra.mxu3 %vm2116_vm12, %v2104_v8 }
 0x560   : > { %v2330_v41 = vmax.f32 %v2235_v5, 0.0 }
 0x562   : > { %2363 = vst.msk [vmem:[#allocation3 + $0x19] sm:$0xff] %vm250_vm0, %v2330_v41 }
 0x565   : > { %v2237_v55 = vpop.f32.mrf.mxu0 }
 0x566   : > { %v2238_v60 = vadd.f32 %v5759_v51, %v2237_v55 }
 0x568   : > { %v2331_v56 = vmax.f32 %v2238_v60, 0.0 }
 0x569   : > { %v5765_v0 = vld [vmem:[#allocation3 + $0x19] sm:$0xff] }
 0x56a   : > { %2364 = vst.msk [vmem:[#allocation3 + $0x21] sm:$0xff] %vm250_vm0, %v2331_v56  ;;  %2527 = vrot.lane.b32.xlu1 %v5765_v0, %s4468_s19  ;;  %v5770_v34 = vld [vmem:[#allocation3 + $0x18] sm:$0xff] }
 0x56b   : > { %2429 = vst.msk [vmem:[#allocation4 + $0x10] sm:$0xff] %vm250_vm0, %v5770_v34 }
 0x571   : > { %v5774_v15 = vld [vmem:[#allocation3 + $0x21] sm:$0xff] }
 0x572   : > { %2529 = vrot.lane.b32.xlu0 %v5774_v15, %s4468_s19  ;;  %v5779_v52 = vld [vmem:[#allocation3 + $0x20] sm:$0xff] }
 0x573   : > { %v2240_v57 = vpop.f32.mrf.mxu0  ;;  %2430 = vst.msk [vmem:[#allocation4 + $0x18] sm:$0xff] %vm250_vm0, %v5779_v52 }
 0x574   : > { %v2241_v54 = vadd.f32 %v5759_v51, %v2240_v57 }
 0x576   : > { %v2332_v11 = vmax.f32 %v2241_v54, 0.0 }
 0x578   : > { %2365 = vst.msk [vmem:[#allocation3 + $0x31] sm:$0xff] %vm250_vm0, %v2332_v11 }
 0x57b   : > { %v2243_v4 = vpop.f32.mrf.mxu0 }
 0x57c   : > { %v2244_v25 = vadd.f32 %v5759_v51, %v2243_v4  ;;  %v2270_v28 = vpop.f32.mrf.mxu1 }
 0x57d   : > { %v2271_v43 = vadd.f32 %v5759_v51, %v2270_v28  ;;  %v2007_v28 = vpop.permute.xlu2 %2006 }
 0x57e   : > { %v2333_v30 = vmax.f32 %v2244_v25, 0.0  ;;  %2073 = vst.msk [vmem:[#allocation4 + $0xf0] sm:$0xff] %vm2042_vm10, %v2007_v28 }
 0x57f   : > { %v2342_v61 = vmax.f32 %v2271_v43, 0.0  ;;  %v5786_v16 = vld [vmem:[#allocation3 + $0x31] sm:$0xff] }
 0x580   : > { %2366 = vst.msk [vmem:[#allocation3 + $0x39] sm:$0xff] %vm250_vm0, %v2333_v30  ;;  %2531 = vrot.lane.b32.xlu2 %v5786_v16, %s4468_s19  ;;  %v5794_v58 = vld [vmem:[#allocation3 + $0x30] sm:$0xff] }
 0x581   : > { %2375 = vst.msk [vmem:[#allocation3 + $0xa9] sm:$0xff] %vm250_vm0, %v2342_v61 }
 0x582   : > { %2431 = vst.msk [vmem:[#allocation4 + $0x20] sm:$0xff] %vm250_vm0, %v5794_v58 }
 0x583   : > { %v2246_v3 = vpop.f32.mrf.mxu0 }
 0x584   : > { %v2247_v49 = vadd.f32 %v5759_v51, %v2246_v3  ;;  %v2273_v46 = vpop.f32.mrf.mxu1 }
 0x585   : > { %v2274_v50 = vadd.f32 %v5759_v51, %v2273_v46 }
 0x586   : > { %v2334_v21 = vmax.f32 %v2247_v49, 0.0 }
 0x587   : > { %v2343_v24 = vmax.f32 %v2274_v50, 0.0  ;;  %v5796_v40 = vld [vmem:[#allocation3 + $0x39] sm:$0xff] }
 0x588   : > { %2367 = vst.msk [vmem:[#allocation3 + $0x49] sm:$0xff] %vm250_vm0, %v2334_v21  ;;  %2533 = vrot.lane.b32.xlu1 %v5796_v40, %s4468_s19  ;;  %v5805_v48 = vld [vmem:[#allocation3 + $0x38] sm:$0xff]  ;;  %v5811_v13 = vld [vmem:[#allocation3 + $0xa8] sm:$0xff] }
 0x589   : > { %2376 = vst.msk [vmem:[#allocation3 + $0xb1] sm:$0xff] %vm250_vm0, %v2343_v24 }
 0x58a   : > { %2432 = vst.msk [vmem:[#allocation4 + $0x28] sm:$0xff] %vm250_vm0, %v5805_v48 }
 0x58b   : > { %v2249_v33 = vpop.f32.mrf.mxu0  ;;  %2441 = vst.msk [vmem:[#allocation4 + $0x70] sm:$0xff] %vm250_vm0, %v5811_v13 }
 0x58c   : > { %v2250_v36 = vadd.f32 %v5759_v51, %v2249_v33 }
 0x58e   : > { %v2335_v18 = vmax.f32 %v2250_v36, 0.0 }
 0x58f   : > { %v5807_v47 = vld [vmem:[#allocation3 + $0x49] sm:$0xff] }
 0x590   : > { %2368 = vst.msk [vmem:[#allocation3 + $0x51] sm:$0xff] %vm250_vm0, %v2335_v18  ;;  %2535 = vrot.lane.b32.xlu0 %v5807_v47, %s4468_s19  ;;  %v5820_v17 = vld [vmem:[#allocation3 + $0x48] sm:$0xff]  ;;  %v5826_v9 = vld [vmem:[#allocation3 + $0xb0] sm:$0xff] }
 0x591   : > { %2433 = vst.msk [vmem:[#allocation4 + $0x30] sm:$0xff] %vm250_vm0, %v5820_v17 }
 0x592   : > { %2442 = vst.msk [vmem:[#allocation4 + $0x78] sm:$0xff] %vm250_vm0, %v5826_v9 }
 0x593   : > { %v2252_v20 = vpop.f32.mrf.mxu0  ;;  %v2276_v10 = vpop.f32.mrf.mxu1 }
 0x594   : > { %v2253_v14 = vadd.f32 %v5759_v51, %v2252_v20  ;;  %v2277_v35 = vadd.f32 %v5759_v51, %v2276_v10  ;;  %v2396_v20 = vld [vmem:[#allocation3 + $0x8] sm:$0xff]  ;;  %v2526_v10 = vpop.permute.xlu2 %2525 }
 0x595   : > { %2428 = vst.msk [vmem:[#allocation4 + $0x8] sm:$0xff] %vm250_vm0, %v2396_v20 }
 0x596   : > { %v2336_v6 = vmax.f32 %v2253_v14, 0.0  ;;  %v2344_v27 = vmax.f32 %v2277_v35, 0.0  ;;  %v2009_v35 = vpop.permute.xlu1 %2008  ;;  %2620 = vst.msk [vmem:[#allocation4 + $0x8] sm:$0xff] %vm690_vm3, %v2526_v10 }
 0x597   : > { %v5822_v29 = vld [vmem:[#allocation3 + $0x51] sm:$0xff]  ;;  %2074 = vst.msk [vmem:[#allocation4 + $0xf8] sm:$0xff] %vm2042_vm10, %v2009_v35 }
 0x598   : > { %2369 = vst.msk [vmem:[#allocation3 + $0x61] sm:$0xff] %vm250_vm0, %v2336_v6  ;;  %2537 = vrot.lane.b32.xlu2 %v5822_v29, %s4468_s19  ;;  %v5840_v32 = vld [vmem:[#allocation3 + $0x50] sm:$0xff] }
 0x599   : > { %2377 = vst.msk [vmem:[#allocation3 + $0xc1] sm:$0xff] %vm250_vm0, %v2344_v27 }
 0x59a   : > { %v2297_v44 = vpop.f32.mrf.mxu3  ;;  %2434 = vst.msk [vmem:[#allocation4 + $0x38] sm:$0xff] %vm250_vm0, %v5840_v32 }
 0x59b   : > { %v2298_v31 = vadd.f32 %v5759_v51, %v2297_v44  ;;  %v2255_v62 = vpop.f32.mrf.mxu0  ;;  %v2279_v59 = vpop.f32.mrf.mxu1 }
 0x59c   : > { %v2256_v37 = vadd.f32 %v5759_v51, %v2255_v62  ;;  %v2280_v45 = vadd.f32 %v5759_v51, %v2279_v59 }
 0x59d   : > { %v2351_v63 = vmax.f32 %v2298_v31, 0.0 }
 0x59e   : > { %v2337_v19 = vmax.f32 %v2256_v37, 0.0  ;;  %v2345_v42 = vmax.f32 %v2280_v45, 0.0 }
 0x59f   : > { %2384 = vst.msk [vmem:[#allocation3 + $0x111] sm:$0xff] %vm250_vm0, %v2351_v63  ;;  %v5838_v26 = vld [vmem:[#allocation3 + $0x61] sm:$0xff] }
 0x5a0   : > { %2370 = vst.msk [vmem:[#allocation3 + $0x69] sm:$0xff] %vm250_vm0, %v2337_v19  ;;  %2539 = vrot.lane.b32.xlu1 %v5838_v26, %s4468_s19  ;;  %v5854_v8 = vld [vmem:[#allocation3 + $0x60] sm:$0xff] }
 0x5a1   : > { %2378 = vst.msk [vmem:[#allocation3 + $0xc9] sm:$0xff] %vm250_vm0, %v2345_v42  ;;  %v5859_v41 = vld [vmem:[#allocation3 + $0xc0] sm:$0xff]  ;;  %v5912_v42 = vld [vmem:[#allocation3 + $0xa9] sm:$0xff] }
 0x5a2   : > { %v2300_v7 = vpop.f32.mrf.mxu3  ;;  %2435 = vst.msk [vmem:[#allocation4 + $0x40] sm:$0xff] %vm250_vm0, %v5854_v8 }
 0x5a3   : > { %v2301_v23 = vadd.f32 %v5759_v51, %v2300_v7  ;;  %v2258_v38 = vpop.f32.mrf.mxu0  ;;  %v2282_v39 = vpop.f32.mrf.mxu1  ;;  %2443 = vst.msk [vmem:[#allocation4 + $0x80] sm:$0xff] %vm250_vm0, %v5859_v41 }
 0x5a4   : > { %v2259_v1 = vadd.f32 %v5759_v51, %v2258_v38  ;;  %v2283_v2 = vadd.f32 %v5759_v51, %v2282_v39 }
 0x5a5   : > { %v2352_v22 = vmax.f32 %v2301_v23, 0.0  ;;  %v2395_v23 = vld [vmem:[#allocation3] sm:$0xff] }
 0x5a6   : > { %v2338_v53 = vmax.f32 %v2259_v1, 0.0  ;;  %v2346_v12 = vmax.f32 %v2283_v2, 0.0  ;;  %v2524_v1 = vpop.permute.xlu0 %2523  ;;  %2427 = vst.msk [vmem:[#allocation4] sm:$0xff] %vm250_vm0, %v2395_v23 }
 0x5a7   : > { %2385 = vst.msk [vmem:[#allocation3 + $0x121] sm:$0xff] %vm250_vm0, %v2352_v22  ;;  %v5852_v5 = vld [vmem:[#allocation3 + $0x69] sm:$0xff] }
 0x5a8   : > { %2371 = vst.msk [vmem:[#allocation3 + $0x79] sm:$0xff] %vm250_vm0, %v2338_v53  ;;  %2541 = vrot.lane.b32.xlu0 %v5852_v5, %s4468_s19  ;;  %v5868_v4 = vld [vmem:[#allocation3 + $0x68] sm:$0xff] }
 0x5a9   : > { %2379 = vst.msk [vmem:[#allocation3 + $0xd9] sm:$0xff] %vm250_vm0, %v2346_v12  ;;  %v5877_v43 = vld [vmem:[#allocation3 + $0xc8] sm:$0xff] }
 0x5aa   : > { %2436 = vst.msk [vmem:[#allocation4 + $0x48] sm:$0xff] %vm250_vm0, %v5868_v4 }
 0x5ab   : > { %v2261_v55 = vpop.f32.mrf.mxu0  ;;  %v2285_v60 = vpop.f32.mrf.mxu1  ;;  %2444 = vst.msk [vmem:[#allocation4 + $0x88] sm:$0xff] %vm250_vm0, %v5877_v43 }
 0x5ac   : > { %v2262_v56 = vadd.f32 %v5759_v51, %v2261_v55  ;;  %v2286_v57 = vadd.f32 %v5759_v51, %v2285_v60  ;;  %2619 = vst.msk [vmem:[#allocation4] sm:$0xff] %vm690_vm3, %v2524_v1 }
 0x5ae   : > { %v2339_v54 = vmax.f32 %v2262_v56, 0.0  ;;  %v2347_v11 = vmax.f32 %v2286_v57, 0.0  ;;  %v5886_v21 = vld [vmem:[#allocation3 + $0x120] sm:$0xff] }
 0x5af   : > { %v5870_v25 = vld [vmem:[#allocation3 + $0x79] sm:$0xff]  ;;  %2451 = vst.msk [vmem:[#allocation4 + $0xc0] sm:$0xff] %vm250_vm0, %v5886_v21 }
 0x5b0   : > { %2372 = vst.msk [vmem:[#allocation3 + $0x81] sm:$0xff] %vm250_vm0, %v2339_v54  ;;  %2543 = vrot.lane.b32.xlu2 %v5870_v25, %s4468_s19  ;;  %v5898_v6 = vld [vmem:[#allocation3 + $0x78] sm:$0xff] }
 0x5b1   : > { %2380 = vst.msk [vmem:[#allocation3 + $0xe1] sm:$0xff] %vm250_vm0, %v2347_v11  ;;  %v5902_v62 = vld [vmem:[#allocation3 + $0xd8] sm:$0xff]  ;;  %v5943_v11 = vld [vmem:[#allocation3 + $0xc9] sm:$0xff] }
 0x5b2   : > { %v2303_v30 = vpop.f32.mrf.mxu3  ;;  %2437 = vst.msk [vmem:[#allocation4 + $0x50] sm:$0xff] %vm250_vm0, %v5898_v6 }
 0x5b3   : > { %v2304_v61 = vadd.f32 %v5759_v51, %v2303_v30  ;;  %v2264_v3 = vpop.f32.mrf.mxu0  ;;  %v2288_v49 = vpop.f32.mrf.mxu1  ;;  %2445 = vst.msk [vmem:[#allocation4 + $0x90] sm:$0xff] %vm250_vm0, %v5902_v62  ;;  %v5952_v30 = vld [vmem:[#allocation3 + $0xb1] sm:$0xff] }
 0x5b4   : > { %v2265_v46 = vadd.f32 %v5759_v51, %v2264_v3  ;;  %v2289_v50 = vadd.f32 %v5759_v51, %v2288_v49 }
 0x5b5   : > { %v2353_v24 = vmax.f32 %v2304_v61, 0.0 }
 0x5b6   : > { %v2340_v33 = vmax.f32 %v2265_v46, 0.0  ;;  %v2348_v36 = vmax.f32 %v2289_v50, 0.0  ;;  %v5966_v50 = vld [vmem:[#allocation3 + $0xc1] sm:$0xff] }
 0x5b7   : > { %2386 = vst.msk [vmem:[#allocation3 + $0x129] sm:$0xff] %vm250_vm0, %v2353_v24  ;;  %v5891_v18 = vld [vmem:[#allocation3 + $0x81] sm:$0xff] }
 0x5b8   : > { %2373 = vst.msk [vmem:[#allocation3 + $0x91] sm:$0xff] %vm250_vm0, %v2340_v33  ;;  %2545 = vrot.lane.b32.xlu1 %v5891_v18, %s4468_s19  ;;  %v5922_v38 = vld [vmem:[#allocation3 + $0x80] sm:$0xff] }
 0x5b9   : > { %2381 = vst.msk [vmem:[#allocation3 + $0xf1] sm:$0xff] %vm250_vm0, %v2348_v36  ;;  %v5925_v2 = vld [vmem:[#allocation3 + $0xe0] sm:$0xff] }
 0x5ba   : > { %v2306_v14 = vpop.f32.mrf.mxu3  ;;  %2438 = vst.msk [vmem:[#allocation4 + $0x58] sm:$0xff] %vm250_vm0, %v5922_v38  ;;  %v5976_v36 = vld [vmem:[#allocation3 + $0xd9] sm:$0xff] }
 0x5bb   : > { %v2307_v27 = vadd.f32 %v5759_v51, %v2306_v14  ;;  %v2267_v44 = vpop.f32.mrf.mxu0  ;;  %v2291_v31 = vpop.f32.mrf.mxu1  ;;  %2446 = vst.msk [vmem:[#allocation4 + $0x98] sm:$0xff] %vm250_vm0, %v5925_v2 }
 0x5bc   : > { %v2268_v59 = vadd.f32 %v5759_v51, %v2267_v44  ;;  %v2292_v37 = vadd.f32 %v5759_v51, %v2291_v31  ;;  %v5994_v31 = vld [vmem:[#allocation3 + $0x111] sm:$0xff] }
 0x5bd   : > { %v2354_v45 = vmax.f32 %v2307_v27, 0.0 }
 0x5be   : > { %v2341_v63 = vmax.f32 %v2268_v59, 0.0  ;;  %v2349_v19 = vmax.f32 %v2292_v37, 0.0  ;;  %v5934_v60 = vld [vmem:[#allocation3 + $0x128] sm:$0xff] }
 0x5bf   : > { %2387 = vst.msk [vmem:[#allocation3 + $0x139] sm:$0xff] %vm250_vm0, %v2354_v45  ;;  %v5914_v7 = vld [vmem:[#allocation3 + $0x91] sm:$0xff]  ;;  %v5996_v59 = vld [vmem:[#allocation3 + $0xe1] sm:$0xff] }
 0x5c0   : > { %2374 = vst.msk [vmem:[#allocation3 + $0x99] sm:$0xff] %vm250_vm0, %v2341_v63  ;;  %2551 = vrot.lane.b32.xlu1 %v5912_v42, %s4468_s19  ;;  %2547 = vrot.lane.b32.xlu0 %v5914_v7, %s4468_s19  ;;  %v5936_v57 = vld [vmem:[#allocation3 + $0x90] sm:$0xff] }
 0x5c1   : > { %2382 = vst.msk [vmem:[#allocation3 + $0xf9] sm:$0xff] %vm250_vm0, %v2349_v19  ;;  %v5945_v28 = vld [vmem:[#allocation3 + $0xf0] sm:$0xff] }
 0x5c2   : > { %v2309_v39 = vpop.f32.mrf.mxu3  ;;  %2452 = vst.msk [vmem:[#allocation4 + $0xc8] sm:$0xff] %vm250_vm0, %v5934_v60  ;;  %v5968_v24 = vld [vmem:[#allocation3 + $0xf1] sm:$0xff] }
 0x5c3   : > { %v2310_v22 = vadd.f32 %v5759_v51, %v2309_v39  ;;  %v2294_v53 = vpop.f32.mrf.mxu1  ;;  %2439 = vst.msk [vmem:[#allocation4 + $0x60] sm:$0xff] %vm250_vm0, %v5936_v57  ;;  %v2105_v39 = vld [vmem:[#allocation4 + $0xf0] sm:$0xff] }
 0x5c4   : > { %v2295_v12 = vadd.f32 %v5759_v51, %v2294_v53  ;;  %2447 = vst.msk [vmem:[#allocation4 + $0xa0] sm:$0xff] %vm250_vm0, %v5945_v28  ;;  %4295 = vmatmul.msk.f32.gmra.mxu3 %vm2116_vm12, %v2105_v39 }
 0x5c5   : > { %v2355_v55 = vmax.f32 %v2310_v22, 0.0 }
 0x5c6   : > { %v2350_v56 = vmax.f32 %v2295_v12, 0.0  ;;  %v5961_v49 = vld [vmem:[#allocation3 + $0x138] sm:$0xff] }
 0x5c7   : > { %2388 = vst.msk [vmem:[#allocation3 + $0x141] sm:$0xff] %vm250_vm0, %v2355_v55  ;;  %v5941_v54 = vld [vmem:[#allocation3 + $0x99] sm:$0xff] }
 0x5c8   : > { %2383 = vst.msk [vmem:[#allocation3 + $0x109] sm:$0xff] %vm250_vm0, %v2350_v56  ;;  %2549 = vrot.lane.b32.xlu2 %v5941_v54, %s4468_s19  ;;  %2557 = vrot.lane.b32.xlu1 %v5943_v11, %s4468_s19  ;;  %v5970_v33 = vld [vmem:[#allocation3 + $0x98] sm:$0xff]  ;;  %v6029_v56 = vld [vmem:[#allocation3 + $0x121] sm:$0xff] }
 0x5c9   : > { %2553 = vrot.lane.b32.xlu0 %v5952_v30, %s4468_s19  ;;  %2453 = vst.msk [vmem:[#allocation4 + $0xd0] sm:$0xff] %vm250_vm0, %v5961_v49  ;;  %v5980_v20 = vld [vmem:[#allocation3 + $0xf8] sm:$0xff] }
 0x5ca   : > { %v2312_v61 = vpop.f32.mrf.mxu3  ;;  %2440 = vst.msk [vmem:[#allocation4 + $0x68] sm:$0xff] %vm250_vm0, %v5970_v33  ;;  %v6004_v45 = vld [vmem:[#allocation3 + $0xf9] sm:$0xff] }
 0x5cb   : > { %v2313_v3 = vadd.f32 %v5759_v51, %v2312_v61  ;;  %2448 = vst.msk [vmem:[#allocation4 + $0xa8] sm:$0xff] %vm250_vm0, %v5980_v20  ;;  %v6023_v55 = vld [vmem:[#allocation3 + $0x139] sm:$0xff] }
 0x5cd   : > { %v2356_v46 = vmax.f32 %v2313_v3, 0.0 }
 0x5ce   : > { %v5987_v35 = vld [vmem:[#allocation3 + $0x140] sm:$0xff] }
 0x5cf   : > { %2389 = vst.msk [vmem:[#allocation3 + $0x151] sm:$0xff] %vm250_vm0, %v2356_v46  ;;  %v5991_v44 = vld [vmem:[#allocation3 + $0x108] sm:$0xff]  ;;  %v5998_v37 = vld [vmem:[#allocation3 + $0x110] sm:$0xff] }
 0x5d0   : > { %2555 = vrot.lane.b32.xlu2 %v5966_v50, %s4468_s19  ;;  %2563 = vrot.lane.b32.xlu1 %v5968_v24, %s4468_s19  ;;  %2454 = vst.msk [vmem:[#allocation4 + $0xd8] sm:$0xff] %vm250_vm0, %v5987_v35  ;;  %v6021_v12 = vld [vmem:[#allocation3 + $0x109] sm:$0xff] }
 0x5d1   : > { %2559 = vrot.lane.b32.xlu0 %v5976_v36, %s4468_s19  ;;  %2449 = vst.msk [vmem:[#allocation4 + $0xb0] sm:$0xff] %vm250_vm0, %v5991_v44  ;;  %v2106_v46 = vld [vmem:[#allocation4 + $0xf8] sm:$0xff] }
 0x5d2   : > { %v2315_v10 = vpop.f32.mrf.mxu3  ;;  %2450 = vst.msk [vmem:[#allocation4 + $0xb8] sm:$0xff] %vm250_vm0, %v5998_v37  ;;  %4296 = vmatmul.msk.f32.gmra.mxu3 %vm2116_vm12, %v2106_v46 }
 0x5d3   : > { %v2316_v14 = vadd.f32 %v5759_v51, %v2315_v10 }
 0x5d5   : > { %v2357_v27 = vmax.f32 %v2316_v14, 0.0 }
 0x5d6   : > { %v6015_v22 = vld [vmem:[#allocation3 + $0x150] sm:$0xff] }
 0x5d7   : > { %2390 = vst.msk [vmem:[#allocation3 + $0x159] sm:$0xff] %vm250_vm0, %v2357_v27 }
 0x5d8   : > { %2569 = vrot.lane.b32.xlu1 %v5994_v31, %s4468_s19  ;;  %2561 = vrot.lane.b32.xlu2 %v5996_v59, %s4468_s19  ;;  %2455 = vst.msk [vmem:[#allocation4 + $0xe0] sm:$0xff] %vm250_vm0, %v6015_v22 }
 0x5d9   : > { %2565 = vrot.lane.b32.xlu0 %v6004_v45, %s4468_s19 }
 0x5da   : > { %v2318_v63 = vpop.f32.mrf.mxu3  ;;  %v2532_v19 = vpop.permute.xlu2 %2531 }
 0x5db   : > { %v2319_v23 = vadd.f32 %v5759_v51, %v2318_v63  ;;  %2623 = vst.msk [vmem:[#allocation4 + $0x20] sm:$0xff] %vm690_vm3, %v2532_v19  ;;  %v6041_v63 = vld [vmem:[#allocation3 + $0x129] sm:$0xff] }
 0x5dc   : > { %v2528_v1 = vpop.permute.xlu1 %2527 }
 0x5dd   : > { %v2358_v53 = vmax.f32 %v2319_v23, 0.0  ;;  %2621 = vst.msk [vmem:[#allocation4 + $0x10] sm:$0xff] %vm690_vm3, %v2528_v1  ;;  %v6049_v23 = vld [vmem:[#allocation3 + $0x141] sm:$0xff] }
 0x5de   : > { %v6035_v14 = vld [vmem:[#allocation3 + $0x158] sm:$0xff]  ;;  %6873 = vst [vmem:[#allocation9_spill] sm:$0xff] %v6049_v23  ;;  %v2651_v1 = vld [vmem:[#allocation3 + $0x2] sm:$0xff] }
 0x5df   : > { %2391 = vst.msk [vmem:[#allocation3 + $0x169] sm:$0xff] %vm250_vm0, %v2358_v53  ;;  %v6043_v19 = vld [vmem:[#allocation3 + $0x159] sm:$0xff]  ;;  %v6057_v53 = vld [vmem:[#allocation3 + $0x151] sm:$0xff] }
 0x5e0   : > { %2567 = vrot.lane.b32.xlu2 %v6021_v12, %s4468_s19  ;;  %2575 = vrot.lane.b32.xlu1 %v6023_v55, %s4468_s19  ;;  %2456 = vst.msk [vmem:[#allocation4 + $0xe8] sm:$0xff] %vm250_vm0, %v6035_v14 }
 0x5e1   : > { %2571 = vrot.lane.b32.xlu0 %v6029_v56, %s4468_s19  ;;  %6872 = vst [vmem:[#allocation8_spill] sm:$0xff] %v6043_v19 }
 0x5e2   : > { %v2321_v61 = vpop.f32.mrf.mxu3 }
 0x5e3   : > { %v2322_v3 = vadd.f32 %v5759_v51, %v2321_v61 }
 0x5e4   : > { %v2530_v10 = vpop.permute.xlu0 %2529 }
 0x5e5   : > { %v2359_v27 = vmax.f32 %v2322_v3, 0.0  ;;  %2622 = vst.msk [vmem:[#allocation4 + $0x18] sm:$0xff] %vm690_vm3, %v2530_v10  ;;  %v2652_v10 = vld [vmem:[#allocation3 + $0xa] sm:$0xff] }
 0x5e6   : > { %v6053_v39 = vld [vmem:[#allocation3 + $0x168] sm:$0xff] }
 0x5e7   : > { %2392 = vst.msk [vmem:[#allocation3 + $0x171] sm:$0xff] %vm250_vm0, %v2359_v27  ;;  %v6062_v61 = vld [vmem:[#allocation3 + $0x169] sm:$0xff] }
 0x5e8   : > { %2573 = vrot.lane.b32.xlu2 %v6041_v63, %s4468_s19  ;;  %2581 = vrot.lane.b32.xlu1 %v6043_v19, %s4468_s19  ;;  %2457 = vst.msk [vmem:[#allocation4 + $0xf0] sm:$0xff] %vm250_vm0, %v6053_v39  ;;  %v6071_v27 = vld [vmem:[#allocation3 + $0x22] sm:$0xff]  ;;  %v6083_v19 = vld [vmem:[#allocation3 + $0x1a] sm:$0xff] }
 0x5e9   : > { %2577 = vrot.lane.b32.xlu0 %v6049_v23, %s4468_s19  ;;  %6874 = vst [vmem:[#allocation10_spill] sm:$0xff] %v6062_v61  ;;  %v6089_v23 = vld [vmem:[#allocation3 + $0x32] sm:$0xff] }
 0x5ea   : > { %6875 = vst [vmem:[#allocation11_spill] sm:$0xff] %v6071_v27 }
 0x5eb   : > { %6878 = vst [vmem:[#allocation14_spill] sm:$0xff] %v6083_v19 }
 0x5ec   : > { %6879 = vst [vmem:[#allocation15_spill] sm:$0xff] %v6089_v23 }
 0x5ee   : > { %v6067_v46 = vld [vmem:[#allocation3 + $0x170] sm:$0xff] }
 0x5ef   : > { %2458 = vst.msk [vmem:[#allocation4 + $0xf8] sm:$0xff] %vm250_vm0, %v6067_v46 }
 0x5f0   : > { %2715 = vrot.lane.b32.xlu1 %v2651_v1, %s4467_s18  ;;  %2579 = vrot.lane.b32.xlu2 %v6057_v53, %s4468_s19  ;;  %v6073_v1 = vld [vmem:[#allocation3 + $0x171] sm:$0xff] }
 0x5f1   : > { %2583 = vrot.lane.b32.xlu0 %v6062_v61, %s4468_s19  ;;  %6876 = vst [vmem:[#allocation12_spill] sm:$0xff] %v6073_v1 }
 0x5f2   : > { %v2538_v3 = vpop.permute.xlu2 %2537 }
 0x5f3   : > { %2626 = vst.msk [vmem:[#allocation4 + $0x38] sm:$0xff] %vm690_vm3, %v2538_v3  ;;  %v6081_v3 = vld [vmem:[#allocation3 + $0x4a] sm:$0xff] }
 0x5f4   : > { %6877 = vst [vmem:[#allocation13_spill] sm:$0xff] %v6081_v3 }
 0x5f8   : > { %2721 = vrot.lane.b32.xlu1 %v6071_v27, %s4467_s18  ;;  %2585 = vrot.lane.b32.xlu2 %v6073_v1, %s4468_s19  ;;  %v6162_v1 = vld [vmem:[#allocation3 + $0xf2] sm:$0xff] }
 0x5f9   : > { %2717 = vrot.lane.b32.xlu0 %v2652_v10, %s4467_s18  ;;  %v6094_v10 = vld [vmem:[#allocation3 + $0x6a] sm:$0xff]  ;;  %6896 = vst [vmem:[#allocation32_spill] sm:$0xff] %v6162_v1 }
 0x5fa   : > { %v2534_v61 = vpop.permute.xlu1 %2533  ;;  %6880 = vst [vmem:[#allocation16_spill] sm:$0xff] %v6094_v10 }
 0x5fb   : > { %2624 = vst.msk [vmem:[#allocation4 + $0x28] sm:$0xff] %vm690_vm3, %v2534_v61  ;;  %v6096_v61 = vld [vmem:[#allocation3 + $0x3a] sm:$0xff] }
 0x5fc   : > { %6881 = vst [vmem:[#allocation17_spill] sm:$0xff] %v6096_v61 }
 0x600   : > { %2727 = vrot.lane.b32.xlu1 %v6081_v3, %s4467_s18  ;;  %2719 = vrot.lane.b32.xlu2 %v6083_v19, %s4467_s18  ;;  %v6102_v3 = vld [vmem:[#allocation3 + $0x52] sm:$0xff] }
 0x601   : > { %2723 = vrot.lane.b32.xlu0 %v6089_v23, %s4467_s18  ;;  %6882 = vst [vmem:[#allocation18_spill] sm:$0xff] %v6102_v3  ;;  %v6107_v23 = vld [vmem:[#allocation3 + $0x92] sm:$0xff] }
 0x602   : > { %v2536_v27 = vpop.permute.xlu0 %2535  ;;  %6883 = vst [vmem:[#allocation19_spill] sm:$0xff] %v6107_v23 }
 0x603   : > { %2625 = vst.msk [vmem:[#allocation4 + $0x30] sm:$0xff] %vm690_vm3, %v2536_v27  ;;  %v6109_v27 = vld [vmem:[#allocation3 + $0x62] sm:$0xff] }
 0x604   : > { %6884 = vst [vmem:[#allocation20_spill] sm:$0xff] %v6109_v27 }
 0x608   : > { %2733 = vrot.lane.b32.xlu1 %v6094_v10, %s4467_s18  ;;  %2725 = vrot.lane.b32.xlu2 %v6096_v61, %s4467_s18  ;;  %v6115_v10 = vld [vmem:[#allocation3 + $0x7a] sm:$0xff] }
 0x609   : > { %2729 = vrot.lane.b32.xlu0 %v6102_v3, %s4467_s18  ;;  %6885 = vst [vmem:[#allocation21_spill] sm:$0xff] %v6115_v10  ;;  %v6120_v3 = vld [vmem:[#allocation3 + $0xb2] sm:$0xff] }
 0x60a   : > { %v2544_v19 = vpop.permute.xlu2 %2543  ;;  %6886 = vst [vmem:[#allocation22_spill] sm:$0xff] %v6120_v3 }
 0x60b   : > { %2629 = vst.msk [vmem:[#allocation4 + $0x50] sm:$0xff] %vm690_vm3, %v2544_v19  ;;  %v6122_v19 = vld [vmem:[#allocation3 + $0x82] sm:$0xff] }
 0x60c   : > { %6887 = vst [vmem:[#allocation23_spill] sm:$0xff] %v6122_v19 }
 0x610   : > { %2739 = vrot.lane.b32.xlu1 %v6107_v23, %s4467_s18  ;;  %2731 = vrot.lane.b32.xlu2 %v6109_v27, %s4467_s18  ;;  %v6128_v23 = vld [vmem:[#allocation3 + $0x9a] sm:$0xff] }
 0x611   : > { %2735 = vrot.lane.b32.xlu0 %v6115_v10, %s4467_s18  ;;  %6888 = vst [vmem:[#allocation24_spill] sm:$0xff] %v6128_v23  ;;  %v6133_v10 = vld [vmem:[#allocation3 + $0xda] sm:$0xff] }
 0x612   : > { %v2540_v61 = vpop.permute.xlu1 %2539  ;;  %6889 = vst [vmem:[#allocation25_spill] sm:$0xff] %v6133_v10 }
 0x613   : > { %2627 = vst.msk [vmem:[#allocation4 + $0x40] sm:$0xff] %vm690_vm3, %v2540_v61  ;;  %v6135_v61 = vld [vmem:[#allocation3 + $0xaa] sm:$0xff] }
 0x614   : > { %6890 = vst [vmem:[#allocation26_spill] sm:$0xff] %v6135_v61 }
 0x618   : > { %2745 = vrot.lane.b32.xlu1 %v6120_v3, %s4467_s18  ;;  %2737 = vrot.lane.b32.xlu2 %v6122_v19, %s4467_s18  ;;  %v6141_v3 = vld [vmem:[#allocation3 + $0xc2] sm:$0xff] }
 0x619   : > { %2741 = vrot.lane.b32.xlu0 %v6128_v23, %s4467_s18  ;;  %6891 = vst [vmem:[#allocation27_spill] sm:$0xff] %v6141_v3  ;;  %v6146_v23 = vld [vmem:[#allocation3 + $0xfa] sm:$0xff] }
 0x61a   : > { %v2542_v27 = vpop.permute.xlu0 %2541  ;;  %6892 = vst [vmem:[#allocation28_spill] sm:$0xff] %v6146_v23 }
 0x61b   : > { %2628 = vst.msk [vmem:[#allocation4 + $0x48] sm:$0xff] %vm690_vm3, %v2542_v27  ;;  %v6148_v27 = vld [vmem:[#allocation3 + $0xca] sm:$0xff] }
 0x61c   : > { %6893 = vst [vmem:[#allocation29_spill] sm:$0xff] %v6148_v27 }
 0x620   : > { %2751 = vrot.lane.b32.xlu1 %v6133_v10, %s4467_s18  ;;  %2743 = vrot.lane.b32.xlu2 %v6135_v61, %s4467_s18  ;;  %v6154_v10 = vld [vmem:[#allocation3 + $0xe2] sm:$0xff] }
 0x621   : > { %2747 = vrot.lane.b32.xlu0 %v6141_v3, %s4467_s18  ;;  %6894 = vst [vmem:[#allocation30_spill] sm:$0xff] %v6154_v10 }
 0x622   : > { %v2550_v19 = vpop.permute.xlu2 %2549 }
 0x623   : > { %2632 = vst.msk [vmem:[#allocation4 + $0x68] sm:$0xff] %vm690_vm3, %v2550_v19  ;;  %v6160_v19 = vld [vmem:[#allocation3 + $0x122] sm:$0xff] }
 0x624   : > { %6895 = vst [vmem:[#allocation31_spill] sm:$0xff] %v6160_v19 }
 0x628   : > { %2757 = vrot.lane.b32.xlu1 %v6146_v23, %s4467_s18  ;;  %2749 = vrot.lane.b32.xlu2 %v6148_v27, %s4467_s18  ;;  %v6168_v23 = vld [vmem:[#allocation3 + $0x10a] sm:$0xff] }
 0x629   : > { %2753 = vrot.lane.b32.xlu0 %v6154_v10, %s4467_s18  ;;  %6897 = vst [vmem:[#allocation33_spill] sm:$0xff] %v6168_v23 }
 0x62a   : > { %v2556_v61 = vpop.permute.xlu2 %2555  ;;  %v2546_v3 = vpop.permute.xlu1 %2545 }
 0x62b   : > { %2635 = vst.msk [vmem:[#allocation4 + $0x80] sm:$0xff] %vm690_vm3, %v2556_v61  ;;  %v6175_v61 = vld [vmem:[#allocation3 + $0x142] sm:$0xff] }
 0x62c   : > { %2630 = vst.msk [vmem:[#allocation4 + $0x58] sm:$0xff] %vm690_vm3, %v2546_v3 }
 0x62d   : > { %6898 = vst [vmem:[#allocation34_spill] sm:$0xff] %v6175_v61 }
 0x630   : > { %2763 = vrot.lane.b32.xlu1 %v6160_v19, %s4467_s18  ;;  %2755 = vrot.lane.b32.xlu2 %v6162_v1, %s4467_s18  ;;  %v6177_v19 = vld [vmem:[#allocation3 + $0x112] sm:$0xff] }
 0x631   : > { %2759 = vrot.lane.b32.xlu0 %v6168_v23, %s4467_s18  ;;  %6899 = vst [vmem:[#allocation35_spill] sm:$0xff] %v6177_v19  ;;  %v6183_v23 = vld [vmem:[#allocation3 + $0x12a] sm:$0xff] }
 0x632   : > { %v2548_v10 = vpop.permute.xlu0 %2547  ;;  %v2562_v27 = vpop.permute.xlu2 %2561  ;;  %6900 = vst [vmem:[#allocation36_spill] sm:$0xff] %v6183_v23 }
 0x633   : > { %2631 = vst.msk [vmem:[#allocation4 + $0x60] sm:$0xff] %vm690_vm3, %v2548_v10  ;;  %v2552_v3 = vpop.permute.xlu1 %2551 }
 0x634   : > { %2638 = vst.msk [vmem:[#allocation4 + $0x98] sm:$0xff] %vm690_vm3, %v2562_v27 }
 0x635   : > { %2633 = vst.msk [vmem:[#allocation4 + $0x70] sm:$0xff] %vm690_vm3, %v2552_v3  ;;  %v6190_v3 = vld [vmem:[#allocation3 + $0x13a] sm:$0xff] }
 0x638   : > { %2769 = vrot.lane.b32.xlu1 %v6175_v61, %s4467_s18  ;;  %2761 = vrot.lane.b32.xlu2 %v6177_v19, %s4467_s18  ;;  %v6192_v61 = vld [vmem:[#allocation3 + $0x16a] sm:$0xff] }
 0x639   : > { %2765 = vrot.lane.b32.xlu0 %v6183_v23, %s4467_s18  ;;  %6901 = vst [vmem:[#allocation37_spill] sm:$0xff] %v6192_v61  ;;  %v6198_v23 = vld [vmem:[#allocation3 + $0x152] sm:$0xff] }
 0x63a   : > { %v2568_v10 = vpop.permute.xlu2 %2567  ;;  %6902 = vst [vmem:[#allocation38_spill] sm:$0xff] %v6198_v23 }
 0x63b   : > { %v2554_v1 = vpop.permute.xlu0 %2553  ;;  %2641 = vst.msk [vmem:[#allocation4 + $0xb0] sm:$0xff] %vm690_vm3, %v2568_v10  ;;  %v2558_v27 = vpop.permute.xlu1 %2557 }
 0x63c   : > { %2634 = vst.msk [vmem:[#allocation4 + $0x78] sm:$0xff] %vm690_vm3, %v2554_v1 }
 0x63d   : > { %2636 = vst.msk [vmem:[#allocation4 + $0x88] sm:$0xff] %vm690_vm3, %v2558_v27  ;;  %v6205_v27 = vld [vmem:[#allocation3 + $0x15a] sm:$0xff] }
 0x640   : > { %2767 = vrot.lane.b32.xlu2 %v6190_v3, %s4467_s18  ;;  %2775 = vrot.lane.b32.xlu1 %v6192_v61, %s4467_s18  ;;  %v6211_v61 = vld [vmem:[#allocation3 + $0x172] sm:$0xff] }
 0x641   : > { %2771 = vrot.lane.b32.xlu0 %v6198_v23, %s4467_s18  ;;  %6903 = vst [vmem:[#allocation39_spill] sm:$0xff] %v6211_v61 }
 0x642   : > { %v2574_v10 = vpop.permute.xlu2 %2573 }
 0x643   : > { %v2560_v19 = vpop.permute.xlu0 %2559  ;;  %2644 = vst.msk [vmem:[#allocation4 + $0xc8] sm:$0xff] %vm690_vm3, %v2574_v10  ;;  %v2564_v1 = vpop.permute.xlu1 %2563 }
 0x644   : > { %2637 = vst.msk [vmem:[#allocation4 + $0x90] sm:$0xff] %vm690_vm3, %v2560_v19 }
 0x645   : > { %2639 = vst.msk [vmem:[#allocation4 + $0xa0] sm:$0xff] %vm690_vm3, %v2564_v1 }
 0x648   : > { %2773 = vrot.lane.b32.xlu2 %v6205_v27, %s4467_s18  ;;  %2909 = vrot.lane.b32.xlu1 %v5779_v52, %s4469_s20 }
 0x649   : > { %2777 = vrot.lane.b32.xlu0 %v6211_v61, %s4467_s18  ;;  %s4420_s18 = scalar_lea.hbm %s6837_s6, 16 }
 0x64a   : > { %v2580_v23 = vpop.permute.xlu2 %2579 }
 0x64b   : > { %v2566_v10 = vpop.permute.xlu0 %2565  ;;  %2647 = vst.msk [vmem:[#allocation4 + $0xe0] sm:$0xff] %vm690_vm3, %v2580_v23  ;;  %v2570_v19 = vpop.permute.xlu1 %2569 }
 0x64c   : > { %2640 = vst.msk [vmem:[#allocation4 + $0xa8] sm:$0xff] %vm690_vm3, %v2566_v10 }
 0x64d   : > { %2642 = vst.msk [vmem:[#allocation4 + $0xb8] sm:$0xff] %vm690_vm3, %v2570_v19 }
 0x650   : > { %2907 = vrot.lane.b32.xlu2 %v5770_v34, %s4469_s20  ;;  %2915 = vrot.lane.b32.xlu1 %v5820_v17, %s4469_s20 }
 0x651   : > { %2911 = vrot.lane.b32.xlu0 %v5794_v58, %s4469_s20 }
 0x652   : > { %v2586_v52 = vpop.permute.xlu2 %2585 }
 0x653   : > { %v2572_v1 = vpop.permute.xlu0 %2571  ;;  %2650 = vst.msk [vmem:[#allocation4 + $0xf8] sm:$0xff] %vm690_vm3, %v2586_v52  ;;  %v2576_v61 = vpop.permute.xlu1 %2575 }
 0x654   : > { %2643 = vst.msk [vmem:[#allocation4 + $0xc0] sm:$0xff] %vm690_vm3, %v2572_v1 }
 0x655   : > { %2645 = vst.msk [vmem:[#allocation4 + $0xd0] sm:$0xff] %vm690_vm3, %v2576_v61 }
 0x658   : > { %2913 = vrot.lane.b32.xlu2 %v5805_v48, %s4469_s20  ;;  %2921 = vrot.lane.b32.xlu1 %v5868_v4, %s4469_s20  ;;  %v2324_v48 = vpop.f32.mrf.mxu3 }
 0x659   : > { %2917 = vrot.lane.b32.xlu0 %v5840_v32, %s4469_s20  ;;  %v2325_v4 = vadd.f32 %v5759_v51, %v2324_v48 }
 0x65a   : > { %v2720_v34 = vpop.permute.xlu2 %2719 }
 0x65b   : > { %v2578_v58 = vpop.permute.xlu0 %2577  ;;  %2813 = vst.msk [vmem:[#allocation4 + $0x10] sm:$0xff] %vm883_vm4, %v2720_v34  ;;  %v2582_v17 = vpop.permute.xlu1 %2581  ;;  %v2360_v10 = vmax.f32 %v2325_v4, 0.0 }
 0x65c   : > { %2646 = vst.msk [vmem:[#allocation4 + $0xd8] sm:$0xff] %vm690_vm3, %v2578_v58 }
 0x65d   : > { %2648 = vst.msk [vmem:[#allocation4 + $0xe8] sm:$0xff] %vm690_vm3, %v2582_v17 }
 0x65e   : > { %2393 = vst.msk [vmem:[#allocation3 + $0x181] sm:$0xff] %vm250_vm0, %v2360_v10  ;;  %v6904_v10 = vld [vmem:[#allocation9_spill] sm:$0xff] }
 0x660   : > { %2919 = vrot.lane.b32.xlu2 %v5854_v8, %s4469_s20  ;;  %2927 = vrot.lane.b32.xlu1 %v5936_v57, %s4469_s20  ;;  %v2327_v52 = vpop.f32.mrf.mxu3 }
 0x661   : > { %2923 = vrot.lane.b32.xlu0 %v5898_v6, %s4469_s20  ;;  %v2328_v1 = vadd.f32 %v5759_v51, %v2327_v52 }
 0x662   : > { %v2726_v32 = vpop.permute.xlu2 %2725 }
 0x663   : > { %2816 = vst.msk [vmem:[#allocation4 + $0x28] sm:$0xff] %vm883_vm4, %v2726_v32  ;;  %v2584_v23 = vpop.permute.xlu0 %2583  ;;  %v2716_v61 = vpop.permute.xlu1 %2715  ;;  %v2361_v34 = vmax.f32 %v2328_v1, 0.0  ;;  %v6908_v1 = vld [vmem:[#allocation14_spill] sm:$0xff] }
 0x664   : > { %2649 = vst.msk [vmem:[#allocation4 + $0xf0] sm:$0xff] %vm690_vm3, %v2584_v23 }
 0x665   : > { %2811 = vst.msk [vmem:[#allocation4] sm:$0xff] %vm883_vm4, %v2716_v61  ;;  %v6314_v4 = vld [vmem:[#allocation3 + $0x180] sm:$0xff] }
 0x666   : > { %2394 = vst.msk [vmem:[#allocation3 + $0x189] sm:$0xff] %vm250_vm0, %v2361_v34  ;;  %v6408_v52 = vld [vmem:[#allocation3 + $0x181] sm:$0xff] }
 0x668   : > { %2925 = vrot.lane.b32.xlu2 %v5922_v38, %s4469_s20  ;;  %2933 = vrot.lane.b32.xlu1 %v5826_v9, %s4469_s20 }
 0x669   : > { %2929 = vrot.lane.b32.xlu0 %v5970_v33, %s4469_s20 }
 0x66a   : > { %v2732_v8 = vpop.permute.xlu2 %2731 }
 0x66b   : > { %2819 = vst.msk [vmem:[#allocation4 + $0x40] sm:$0xff] %vm883_vm4, %v2732_v8  ;;  %v2718_v6 = vpop.permute.xlu0 %2717  ;;  %v2722_v19 = vpop.permute.xlu1 %2721 }
 0x66c   : > { %2812 = vst.msk [vmem:[#allocation4 + $0x8] sm:$0xff] %vm883_vm4, %v2718_v6 }
 0x66d   : > { %2814 = vst.msk [vmem:[#allocation4 + $0x18] sm:$0xff] %vm883_vm4, %v2722_v19  ;;  %v6303_v48 = vld [vmem:[#allocation3 + $0x188] sm:$0xff]  ;;  %v6907_v19 = vld [vmem:[#allocation10_spill] sm:$0xff] }
 0x670   : > { %2931 = vrot.lane.b32.xlu2 %v5811_v13, %s4469_s20  ;;  %2939 = vrot.lane.b32.xlu1 %v5902_v62, %s4469_s20 }
 0x671   : > { %2935 = vrot.lane.b32.xlu0 %v5859_v41, %s4469_s20 }
 0x672   : > { %v2738_v33 = vpop.permute.xlu2 %2737 }
 0x673   : > { %2822 = vst.msk [vmem:[#allocation4 + $0x58] sm:$0xff] %vm883_vm4, %v2738_v33  ;;  %v2724_v58 = vpop.permute.xlu0 %2723  ;;  %v2728_v17 = vpop.permute.xlu1 %2727 }
 0x674   : > { %2815 = vst.msk [vmem:[#allocation4 + $0x20] sm:$0xff] %vm883_vm4, %v2724_v58 }
 0x675   : > { %2817 = vst.msk [vmem:[#allocation4 + $0x30] sm:$0xff] %vm883_vm4, %v2728_v17  ;;  %v6417_v17 = vld [vmem:[#allocation3 + $0x189] sm:$0xff] }
 0x678   : > { %2937 = vrot.lane.b32.xlu2 %v5877_v43, %s4469_s20  ;;  %2945 = vrot.lane.b32.xlu1 %v5980_v20, %s4469_s20 }
 0x679   : > { %2941 = vrot.lane.b32.xlu0 %v5925_v2, %s4469_s20 }
 0x67a   : > { %v2744_v51 = vpop.permute.xlu2 %2743 }
 0x67b   : > { %2825 = vst.msk [vmem:[#allocation4 + $0x70] sm:$0xff] %vm883_vm4, %v2744_v51  ;;  %v2730_v41 = vpop.permute.xlu0 %2729  ;;  %v2734_v62 = vpop.permute.xlu1 %2733  ;;  %v6909_v51 = vld [vmem:[#allocation17_spill] sm:$0xff] }
 0x67c   : > { %2818 = vst.msk [vmem:[#allocation4 + $0x38] sm:$0xff] %vm883_vm4, %v2730_v41  ;;  %v6910_v41 = vld [vmem:[#allocation11_spill] sm:$0xff] }
 0x67d   : > { %2820 = vst.msk [vmem:[#allocation4 + $0x48] sm:$0xff] %vm883_vm4, %v2734_v62 }
 0x680   : > { %2943 = vrot.lane.b32.xlu2 %v5945_v28, %s4469_s20  ;;  %2951 = vrot.lane.b32.xlu1 %v5886_v21, %s4469_s20 }
 0x681   : > { %2947 = vrot.lane.b32.xlu0 %v5991_v44, %s4469_s20 }
 0x682   : > { %v2750_v43 = vpop.permute.xlu2 %2749 }
 0x683   : > { %2828 = vst.msk [vmem:[#allocation4 + $0x88] sm:$0xff] %vm883_vm4, %v2750_v43  ;;  %v2736_v2 = vpop.permute.xlu0 %2735  ;;  %v2740_v20 = vpop.permute.xlu1 %2739 }
 0x684   : > { %2821 = vst.msk [vmem:[#allocation4 + $0x50] sm:$0xff] %vm883_vm4, %v2736_v2 }
 0x685   : > { %2823 = vst.msk [vmem:[#allocation4 + $0x60] sm:$0xff] %vm883_vm4, %v2740_v20  ;;  %v6911_v20 = vld [vmem:[#allocation15_spill] sm:$0xff] }
 0x688   : > { %2949 = vrot.lane.b32.xlu2 %v5998_v37, %s4469_s20  ;;  %2957 = vrot.lane.b32.xlu1 %v5987_v35, %s4469_s20 }
 0x689   : > { %2953 = vrot.lane.b32.xlu0 %v5934_v60, %s4469_s20 }
 0x68a   : > { %v2756_v21 = vpop.permute.xlu2 %2755 }
 0x68b   : > { %2831 = vst.msk [vmem:[#allocation4 + $0xa0] sm:$0xff] %vm883_vm4, %v2756_v21  ;;  %v2742_v28 = vpop.permute.xlu0 %2741  ;;  %v2746_v44 = vpop.permute.xlu1 %2745  ;;  %v6912_v21 = vld [vmem:[#allocation20_spill] sm:$0xff] }
 0x68c   : > { %2824 = vst.msk [vmem:[#allocation4 + $0x68] sm:$0xff] %vm883_vm4, %v2742_v28  ;;  %v6913_v28 = vld [vmem:[#allocation13_spill] sm:$0xff] }
 0x68d   : > { %2826 = vst.msk [vmem:[#allocation4 + $0x78] sm:$0xff] %vm883_vm4, %v2746_v44 }
 0x690   : > { %2955 = vrot.lane.b32.xlu2 %v5961_v49, %s4469_s20  ;;  %2963 = vrot.lane.b32.xlu1 %v6053_v39, %s4469_s20 }
 0x691   : > { %2959 = vrot.lane.b32.xlu0 %v6015_v22, %s4469_s20 }
 0x692   : > { %v2762_v35 = vpop.permute.xlu2 %2761 }
 0x693   : > { %2834 = vst.msk [vmem:[#allocation4 + $0xb8] sm:$0xff] %vm883_vm4, %v2762_v35  ;;  %v2748_v60 = vpop.permute.xlu0 %2747  ;;  %v2752_v37 = vpop.permute.xlu1 %2751 }
 0x694   : > { %2827 = vst.msk [vmem:[#allocation4 + $0x80] sm:$0xff] %vm883_vm4, %v2748_v60 }
 0x695   : > { %2829 = vst.msk [vmem:[#allocation4 + $0x90] sm:$0xff] %vm883_vm4, %v2752_v37  ;;  %v6914_v37 = vld [vmem:[#allocation18_spill] sm:$0xff] }
 0x698   : > { %2961 = vrot.lane.b32.xlu2 %v6035_v14, %s4469_s20  ;;  %2969 = vrot.lane.b32.xlu1 %v6303_v48, %s4469_s20 }
 0x699   : > { %2965 = vrot.lane.b32.xlu0 %v6067_v46, %s4469_s20 }
 0x69a   : > { %v2768_v49 = vpop.permute.xlu2 %2767 }
 0x69b   : > { %2837 = vst.msk [vmem:[#allocation4 + $0xd0] sm:$0xff] %vm883_vm4, %v2768_v49  ;;  %v2754_v22 = vpop.permute.xlu0 %2753  ;;  %v2758_v32 = vpop.permute.xlu1 %2757  ;;  %v6915_v49 = vld [vmem:[#allocation23_spill] sm:$0xff] }
 0x69c   : > { %2830 = vst.msk [vmem:[#allocation4 + $0x98] sm:$0xff] %vm883_vm4, %v2754_v22  ;;  %v6916_v22 = vld [vmem:[#allocation16_spill] sm:$0xff] }
 0x69d   : > { %2832 = vst.msk [vmem:[#allocation4 + $0xa8] sm:$0xff] %vm883_vm4, %v2758_v32 }
 0x6a0   : > { %2967 = vrot.lane.b32.xlu2 %v6314_v4, %s4469_s20  ;;  %3103 = vrot.lane.b32.xlu1 %v5786_v16, %s4470_s26  ;;  %s242_s20 = sand.u32 1, %s4454_s22  }
 0x6a1   : > { %3099 = vrot.lane.b32.xlu0 %v5765_v0, %s4470_s26  ;;  %s4182_s12 = scalar_lea.sflag [#allocation6], %s242_s20 }
 0x6a2   : > { %v2774_v14 = vpop.permute.xlu2 %2773 }
 0x6a3   : > { %2840 = vst.msk [vmem:[#allocation4 + $0xe8] sm:$0xff] %vm883_vm4, %v2774_v14  ;;  %v2760_v46 = vpop.permute.xlu0 %2759  ;;  %v2764_v23 = vpop.permute.xlu1 %2763 }
 0x6a4   : > { %2833 = vst.msk [vmem:[#allocation4 + $0xb0] sm:$0xff] %vm883_vm4, %v2760_v46 }
 0x6a5   : > { %2835 = vst.msk [vmem:[#allocation4 + $0xc0] sm:$0xff] %vm883_vm4, %v2764_v23  ;;  %v6917_v23 = vld [vmem:[#allocation21_spill] sm:$0xff] }
 0x6a8   : > { %3101 = vrot.lane.b32.xlu2 %v5774_v15, %s4470_s26  ;;  %3109 = vrot.lane.b32.xlu1 %v5822_v29, %s4470_s26 }
 0x6a9   : > { %3105 = vrot.lane.b32.xlu0 %v5796_v40, %s4470_s26 }
 0x6aa   : > { %v2908_v16 = vpop.permute.xlu2 %2907 }
 0x6ab   : > { %3003 = vst.msk [vmem:[#allocation4] sm:$0xff] %vm1076_vm5, %v2908_v16  ;;  %v2766_v0 = vpop.permute.xlu0 %2765  ;;  %v2770_v61 = vpop.permute.xlu1 %2769  ;;  %v6918_v16 = vld [vmem:[#allocation26_spill] sm:$0xff] }
 0x6ac   : > { %2836 = vst.msk [vmem:[#allocation4 + $0xc8] sm:$0xff] %vm883_vm4, %v2766_v0  ;;  %v6919_v0 = vld [vmem:[#allocation19_spill] sm:$0xff] }
 0x6ad   : > { %2838 = vst.msk [vmem:[#allocation4 + $0xd8] sm:$0xff] %vm883_vm4, %v2770_v61 }
 0x6b0   : > { %3107 = vrot.lane.b32.xlu2 %v5807_v47, %s4470_s26  ;;  %3115 = vrot.lane.b32.xlu1 %v5870_v25, %s4470_s26 }
 0x6b1   : > { %3111 = vrot.lane.b32.xlu0 %v5838_v26, %s4470_s26 }
 0x6b2   : > { %v2914_v15 = vpop.permute.xlu2 %2913 }
 0x6b3   : > { %3006 = vst.msk [vmem:[#allocation4 + $0x18] sm:$0xff] %vm1076_vm5, %v2914_v15  ;;  %v2772_v40 = vpop.permute.xlu0 %2771  ;;  %v2776_v29 = vpop.permute.xlu1 %2775 }
 0x6b4   : > { %2839 = vst.msk [vmem:[#allocation4 + $0xe0] sm:$0xff] %vm883_vm4, %v2772_v40 }
 0x6b5   : > { %2841 = vst.msk [vmem:[#allocation4 + $0xf0] sm:$0xff] %vm883_vm4, %v2776_v29  ;;  %v6920_v29 = vld [vmem:[#allocation24_spill] sm:$0xff] }
 0x6b8   : > { %3113 = vrot.lane.b32.xlu2 %v5852_v5, %s4470_s26  ;;  %3121 = vrot.lane.b32.xlu1 %v5941_v54, %s4470_s26 }
 0x6b9   : > { %3117 = vrot.lane.b32.xlu0 %v5891_v18, %s4470_s26 }
 0x6ba   : > { %v2920_v47 = vpop.permute.xlu2 %2919 }
 0x6bb   : > { %3009 = vst.msk [vmem:[#allocation4 + $0x30] sm:$0xff] %vm1076_vm5, %v2920_v47  ;;  %v2778_v26 = vpop.permute.xlu0 %2777  ;;  %v2910_v25 = vpop.permute.xlu1 %2909  ;;  %v6921_v47 = vld [vmem:[#allocation29_spill] sm:$0xff] }
 0x6bc   : > { %2842 = vst.msk [vmem:[#allocation4 + $0xf8] sm:$0xff] %vm883_vm4, %v2778_v26  ;;  %v6922_v26 = vld [vmem:[#allocation22_spill] sm:$0xff] }
 0x6bd   : > { %3004 = vst.msk [vmem:[#allocation4 + $0x8] sm:$0xff] %vm1076_vm5, %v2910_v25 }
 0x6c0   : > { %3119 = vrot.lane.b32.xlu2 %v5914_v7, %s4470_s26  ;;  %3127 = vrot.lane.b32.xlu1 %v5966_v50, %s4470_s26 }
 0x6c1   : > { %3123 = vrot.lane.b32.xlu0 %v5912_v42, %s4470_s26 }
 0x6c2   : > { %v2926_v5 = vpop.permute.xlu2 %2925 }
 0x6c3   : > { %3012 = vst.msk [vmem:[#allocation4 + $0x48] sm:$0xff] %vm1076_vm5, %v2926_v5  ;;  %v2912_v18 = vpop.permute.xlu0 %2911  ;;  %v2916_v54 = vpop.permute.xlu1 %2915 }
 0x6c4   : > { %3005 = vst.msk [vmem:[#allocation4 + $0x10] sm:$0xff] %vm1076_vm5, %v2912_v18 }
 0x6c5   : > { %3007 = vst.msk [vmem:[#allocation4 + $0x20] sm:$0xff] %vm1076_vm5, %v2916_v54  ;;  %v6923_v54 = vld [vmem:[#allocation27_spill] sm:$0xff] }
 0x6c8   : > { %3125 = vrot.lane.b32.xlu2 %v5952_v30, %s4470_s26  ;;  %3133 = vrot.lane.b32.xlu1 %v5996_v59, %s4470_s26 }
 0x6c9   : > { %3129 = vrot.lane.b32.xlu0 %v5943_v11, %s4470_s26 }
 0x6ca   : > { %v2932_v7 = vpop.permute.xlu2 %2931 }
 0x6cb   : > { %3015 = vst.msk [vmem:[#allocation4 + $0x60] sm:$0xff] %vm1076_vm5, %v2932_v7  ;;  %v2918_v42 = vpop.permute.xlu0 %2917  ;;  %v2922_v50 = vpop.permute.xlu1 %2921  ;;  %v6924_v7 = vld [vmem:[#allocation32_spill] sm:$0xff] }
 0x6cc   : > { %3008 = vst.msk [vmem:[#allocation4 + $0x28] sm:$0xff] %vm1076_vm5, %v2918_v42  ;;  %v6925_v42 = vld [vmem:[#allocation25_spill] sm:$0xff] }
 0x6cd   : > { %3010 = vst.msk [vmem:[#allocation4 + $0x38] sm:$0xff] %vm1076_vm5, %v2922_v50 }
 0x6d0   : > { %3131 = vrot.lane.b32.xlu2 %v5976_v36, %s4470_s26  ;;  %3139 = vrot.lane.b32.xlu1 %v6021_v12, %s4470_s26 }
 0x6d1   : > { %3135 = vrot.lane.b32.xlu0 %v5968_v24, %s4470_s26 }
 0x6d2   : > { %v2938_v30 = vpop.permute.xlu2 %2937 }
 0x6d3   : > { %3018 = vst.msk [vmem:[#allocation4 + $0x78] sm:$0xff] %vm1076_vm5, %v2938_v30  ;;  %v2924_v11 = vpop.permute.xlu0 %2923  ;;  %v2928_v59 = vpop.permute.xlu1 %2927 }
 0x6d4   : > { %3011 = vst.msk [vmem:[#allocation4 + $0x40] sm:$0xff] %vm1076_vm5, %v2924_v11 }
 0x6d5   : > { %3013 = vst.msk [vmem:[#allocation4 + $0x50] sm:$0xff] %vm1076_vm5, %v2928_v59  ;;  %v6926_v59 = vld [vmem:[#allocation30_spill] sm:$0xff] }
 0x6d8   : > { %3137 = vrot.lane.b32.xlu2 %v6004_v45, %s4470_s26  ;;  %3145 = vrot.lane.b32.xlu1 %v6041_v63, %s4470_s26 }
 0x6d9   : > { %3141 = vrot.lane.b32.xlu0 %v5994_v31, %s4470_s26 }
 0x6da   : > { %v2944_v36 = vpop.permute.xlu2 %2943 }
 0x6db   : > { %3021 = vst.msk [vmem:[#allocation4 + $0x90] sm:$0xff] %vm1076_vm5, %v2944_v36  ;;  %v2930_v24 = vpop.permute.xlu0 %2929  ;;  %v2934_v12 = vpop.permute.xlu1 %2933  ;;  %v6927_v36 = vld [vmem:[#allocation35_spill] sm:$0xff] }
 0x6dc   : > { %3014 = vst.msk [vmem:[#allocation4 + $0x58] sm:$0xff] %vm1076_vm5, %v2930_v24  ;;  %v6928_v24 = vld [vmem:[#allocation28_spill] sm:$0xff] }
 0x6dd   : > { %3016 = vst.msk [vmem:[#allocation4 + $0x68] sm:$0xff] %vm1076_vm5, %v2934_v12 }
 0x6e0   : > { %3143 = vrot.lane.b32.xlu2 %v6029_v56, %s4470_s26  ;;  %3151 = vrot.lane.b32.xlu1 %v6057_v53, %s4470_s26  ;;  %v6905_v56 = vld [vmem:[#allocation12_spill] sm:$0xff] }
 0x6e1   : > { %3147 = vrot.lane.b32.xlu0 %v6023_v55, %s4470_s26  ;;  %v6906_v53 = vld [vmem:[#allocation8_spill] sm:$0xff] }
 0x6e2   : > { %v2950_v45 = vpop.permute.xlu2 %2949 }
 0x6e3   : > { %3024 = vst.msk [vmem:[#allocation4 + $0xa8] sm:$0xff] %vm1076_vm5, %v2950_v45  ;;  %v2936_v31 = vpop.permute.xlu0 %2935  ;;  %v2940_v63 = vpop.permute.xlu1 %2939 }
 0x6e4   : > { %3017 = vst.msk [vmem:[#allocation4 + $0x70] sm:$0xff] %vm1076_vm5, %v2936_v31 }
 0x6e5   : > { %3019 = vst.msk [vmem:[#allocation4 + $0x80] sm:$0xff] %vm1076_vm5, %v2940_v63  ;;  %v6929_v63 = vld [vmem:[#allocation33_spill] sm:$0xff] }
 0x6e8   : > { %3149 = vrot.lane.b32.xlu2 %v6904_v10, %s4470_s26  ;;  %3157 = vrot.lane.b32.xlu1 %v6905_v56, %s4470_s26  ;;  %v6930_v10 = vld [vmem:[#allocation31_spill] sm:$0xff] }
 0x6e9   : > { %3153 = vrot.lane.b32.xlu0 %v6906_v53, %s4470_s26 }
 0x6ea   : > { %v2956_v8 = vpop.permute.xlu2 %2955 }
 0x6eb   : > { %3027 = vst.msk [vmem:[#allocation4 + $0xc0] sm:$0xff] %vm1076_vm5, %v2956_v8  ;;  %v2942_v55 = vpop.permute.xlu0 %2941  ;;  %v2946_v6 = vpop.permute.xlu1 %2945 }
 0x6ec   : > { %3020 = vst.msk [vmem:[#allocation4 + $0x88] sm:$0xff] %vm1076_vm5, %v2942_v55  ;;  %v6931_v55 = vld [vmem:[#allocation36_spill] sm:$0xff] }
 0x6ed   : > { %3022 = vst.msk [vmem:[#allocation4 + $0x98] sm:$0xff] %vm1076_vm5, %v2946_v6 }
 0x6f0   : > { %3155 = vrot.lane.b32.xlu2 %v6907_v19, %s4470_s26  ;;  %3291 = vrot.lane.b32.xlu1 %v6908_v1, %s4471_s28 }
 0x6f1   : > { %3159 = vrot.lane.b32.xlu0 %v6408_v52, %s4470_s26 }
 0x6f2   : > { %v2962_v34 = vpop.permute.xlu2 %2961 }
 0x6f3   : > { %3030 = vst.msk [vmem:[#allocation4 + $0xd8] sm:$0xff] %vm1076_vm5, %v2962_v34  ;;  %v2948_v33 = vpop.permute.xlu0 %2947  ;;  %v2952_v58 = vpop.permute.xlu1 %2951  ;;  %v6500_v34 = vld [vmem:[#allocation3 + $0x182] sm:$0xff] }
 0x6f4   : > { %3023 = vst.msk [vmem:[#allocation4 + $0xa0] sm:$0xff] %vm1076_vm5, %v2948_v33  ;;  %v6933_v33 = vld [vmem:[#allocation38_spill] sm:$0xff] }
 0x6f5   : > { %3025 = vst.msk [vmem:[#allocation4 + $0xb0] sm:$0xff] %vm1076_vm5, %v2952_v58 }
 0x6f8   : > { %3161 = vrot.lane.b32.xlu2 %v6417_v17, %s4470_s26  ;;  %3297 = vrot.lane.b32.xlu1 %v6909_v51, %s4471_s28  ;;  %s4261_s26 = sshll.u32 %s242_s20, 3 }
 0x6f9   : > { %3293 = vrot.lane.b32.xlu0 %v6910_v41, %s4471_s28  ;;  %s244_s16 = scalar_lea.vmem [#allocation5], %s4261_s26 }
 0x6fa   : > { %v2968_v62 = vpop.permute.xlu2 %2967  ;;  %s4195_s17 = sshll.u32 %s244_s16, 4  ;;  %s4196_s17 = int_to_ptr.vmem [resolvable:$true] %s4195_s17 }
 0x6fb   : > { %3033 = vst.msk [vmem:[#allocation4 + $0xf0] sm:$0xff] %vm1076_vm5, %v2968_v62  ;;  %v2954_v43 = vpop.permute.xlu0 %2953  ;;  %v2958_v2 = vpop.permute.xlu1 %2957  ;;  %v3421_v62 = vld [vmem:[#allocation3 + $0x38] sm:$0xff] }
 0x6fc   : > { %3026 = vst.msk [vmem:[#allocation4 + $0xb8] sm:$0xff] %vm1076_vm5, %v2954_v43  ;;  %v6511_v43 = vld [vmem:[#allocation3 + $0x18a] sm:$0xff] }
 0x6fd   : > { %3028 = vst.msk [vmem:[#allocation4 + $0xc8] sm:$0xff] %vm1076_vm5, %v2958_v2  ;;  %v6935_v2 = vld [vmem:[#allocation39_spill] sm:$0xff] }
 0x700   : > { %3295 = vrot.lane.b32.xlu2 %v6911_v20, %s4471_s28  ;;  %3303 = vrot.lane.b32.xlu1 %v6912_v21, %s4471_s28 }
 0x701   : > { %3299 = vrot.lane.b32.xlu0 %v6913_v28, %s4471_s28 }
 0x702   : > { %v3102_v44 = vpop.permute.xlu2 %3101 }
 0x703   : > { %3196 = vst.msk [vmem:[#allocation4 + $0x8] sm:$0xff] %vm1269_vm6, %v3102_v44  ;;  %v2960_v35 = vpop.permute.xlu0 %2959  ;;  %v2964_v60 = vpop.permute.xlu1 %2963  ;;  %v3420_v44 = vld [vmem:[#allocation3 + $0x30] sm:$0xff] }
 0x704   : > { %3029 = vst.msk [vmem:[#allocation4 + $0xd0] sm:$0xff] %vm1076_vm5, %v2960_v35  ;;  %v3424_v35 = vld [vmem:[#allocation3 + $0x60] sm:$0xff] }
 0x705   : > { %3031 = vst.msk [vmem:[#allocation4 + $0xe0] sm:$0xff] %vm1076_vm5, %v2964_v60  ;;  %v3422_v60 = vld [vmem:[#allocation3 + $0x48] sm:$0xff] }
 0x708   : > { %3301 = vrot.lane.b32.xlu2 %v6914_v37, %s4471_s28  ;;  %3309 = vrot.lane.b32.xlu1 %v6915_v49, %s4471_s28 }
 0x709   : > { %3305 = vrot.lane.b32.xlu0 %v6916_v22, %s4471_s28 }
 0x70a   : > { %v3108_v32 = vpop.permute.xlu2 %3107 }
 0x70b   : > { %3199 = vst.msk [vmem:[#allocation4 + $0x20] sm:$0xff] %vm1269_vm6, %v3108_v32  ;;  %v2966_v14 = vpop.permute.xlu0 %2965  ;;  %v2970_v46 = vpop.permute.xlu1 %2969  ;;  %v3423_v32 = vld [vmem:[#allocation3 + $0x50] sm:$0xff] }
 0x70c   : > { %3032 = vst.msk [vmem:[#allocation4 + $0xe8] sm:$0xff] %vm1076_vm5, %v2966_v14  ;;  %v3425_v14 = vld [vmem:[#allocation3 + $0x68] sm:$0xff] }
 0x70d   : > { %3034 = vst.msk [vmem:[#allocation4 + $0xf8] sm:$0xff] %vm1076_vm5, %v2970_v46 }
 0x710   : > { %3307 = vrot.lane.b32.xlu2 %v6917_v23, %s4471_s28  ;;  %3315 = vrot.lane.b32.xlu1 %v6918_v16, %s4471_s28 }
 0x711   : > { %3311 = vrot.lane.b32.xlu0 %v6919_v0, %s4471_s28  ;;  %v3426_v0 = vld [vmem:[#allocation3 + $0x78] sm:$0xff] }
 0x712   : > { %v3114_v61 = vpop.permute.xlu2 %3113 }
 0x713   : > { %3202 = vst.msk [vmem:[#allocation4 + $0x38] sm:$0xff] %vm1269_vm6, %v3114_v61  ;;  %v3100_v15 = vpop.permute.xlu0 %3099  ;;  %v3104_v40 = vpop.permute.xlu1 %3103 }
 0x714   : > { %3195 = vst.msk [vmem:[#allocation4] sm:$0xff] %vm1269_vm6, %v3100_v15 }
 0x715   : > { %3197 = vst.msk [vmem:[#allocation4 + $0x10] sm:$0xff] %vm1269_vm6, %v3104_v40  ;;  %v3451_v40 = vld [vmem:[#allocation3 + $0x1a0] sm:$0xff] }
 0x718   : > { %3313 = vrot.lane.b32.xlu2 %v6920_v29, %s4471_s28  ;;  %3321 = vrot.lane.b32.xlu1 %v6921_v47, %s4471_s28  ;;  %v3429_v29 = vld [vmem:[#allocation3 + $0x98] sm:$0xff] }
 0x719   : > { %3317 = vrot.lane.b32.xlu0 %v6922_v26, %s4471_s28  ;;  %v3450_v26 = vld [vmem:[#allocation3 + $0x198] sm:$0xff] }
 0x71a   : > { %v3120_v25 = vpop.permute.xlu2 %3119 }
 0x71b   : > { %3205 = vst.msk [vmem:[#allocation4 + $0x50] sm:$0xff] %vm1269_vm6, %v3120_v25  ;;  %v3106_v5 = vpop.permute.xlu0 %3105  ;;  %v3110_v18 = vpop.permute.xlu1 %3109  ;;  %v3643_v25 = vld [vmem:[#allocation3 + $0x1a1] sm:$0xff] }
 0x71c   : > { %3198 = vst.msk [vmem:[#allocation4 + $0x18] sm:$0xff] %vm1269_vm6, %v3106_v5  ;;  %v3432_v5 = vld [vmem:[#allocation3 + $0xc0] sm:$0xff] }
 0x71d   : > { %3200 = vst.msk [vmem:[#allocation4 + $0x28] sm:$0xff] %vm1269_vm6, %v3110_v18 }
 0x720   : > { %3319 = vrot.lane.b32.xlu2 %v6923_v54, %s4471_s28  ;;  %3327 = vrot.lane.b32.xlu1 %v6924_v7, %s4471_s28  ;;  %v3835_v7 = vld [vmem:[#allocation3 + $0x1a2] sm:$0xff] }
 0x721   : > { %3323 = vrot.lane.b32.xlu0 %v6925_v42, %s4471_s28  ;;  %v3642_v42 = vld [vmem:[#allocation3 + $0x199] sm:$0xff] }
 0x722   : > { %v3126_v50 = vpop.permute.xlu2 %3125 }
 0x723   : > { %3208 = vst.msk [vmem:[#allocation4 + $0x68] sm:$0xff] %vm1269_vm6, %v3126_v50  ;;  %v3112_v30 = vpop.permute.xlu0 %3111  ;;  %v3116_v11 = vpop.permute.xlu1 %3115  ;;  %v3435_v50 = vld [vmem:[#allocation3 + $0xe0] sm:$0xff] }
 0x724   : > { %3201 = vst.msk [vmem:[#allocation4 + $0x30] sm:$0xff] %vm1269_vm6, %v3112_v30 }
 0x725   : > { %3203 = vst.msk [vmem:[#allocation4 + $0x40] sm:$0xff] %vm1269_vm6, %v3116_v11 }
 0x728   : > { %3325 = vrot.lane.b32.xlu2 %v6926_v59, %s4471_s28  ;;  %3333 = vrot.lane.b32.xlu1 %v6927_v36, %s4471_s28  ;;  %v3834_v36 = vld [vmem:[#allocation3 + $0x19a] sm:$0xff] }
 0x729   : > { %3329 = vrot.lane.b32.xlu0 %v6928_v24, %s4471_s28 }
 0x72a   : > { %v3132_v12 = vpop.permute.xlu2 %3131 }
 0x72b   : > { %3211 = vst.msk [vmem:[#allocation4 + $0x80] sm:$0xff] %vm1269_vm6, %v3132_v12  ;;  %v3118_v45 = vpop.permute.xlu0 %3117  ;;  %v3122_v31 = vpop.permute.xlu1 %3121 }
 0x72c   : > { %3204 = vst.msk [vmem:[#allocation4 + $0x48] sm:$0xff] %vm1269_vm6, %v3118_v45 }
 0x72d   : > { %3206 = vst.msk [vmem:[#allocation4 + $0x58] sm:$0xff] %vm1269_vm6, %v3122_v31  ;;  %v3627_v31 = vld [vmem:[#allocation3 + $0xe1] sm:$0xff] }
 0x730   : > { %3331 = vrot.lane.b32.xlu2 %v6929_v63, %s4471_s28  ;;  %3339 = vrot.lane.b32.xlu1 %v6190_v3, %s4471_s28  ;;  %v6932_v3 = vld [vmem:[#allocation34_spill] sm:$0xff]  ;;  %v3434_v63 = vld [vmem:[#allocation3 + $0xd8] sm:$0xff] }
 0x731   : > { %3335 = vrot.lane.b32.xlu0 %v6930_v10, %s4471_s28  ;;  %v3819_v10 = vld [vmem:[#allocation3 + $0xe2] sm:$0xff] }
 0x732   : > { %v3138_v56 = vpop.permute.xlu2 %3137 }
 0x733   : > { %3214 = vst.msk [vmem:[#allocation4 + $0x98] sm:$0xff] %vm1269_vm6, %v3138_v56  ;;  %v3124_v53 = vpop.permute.xlu0 %3123  ;;  %v3128_v8 = vpop.permute.xlu1 %3127 }
 0x734   : > { %3207 = vst.msk [vmem:[#allocation4 + $0x60] sm:$0xff] %vm1269_vm6, %v3124_v53 }
 0x735   : > { %3209 = vst.msk [vmem:[#allocation4 + $0x70] sm:$0xff] %vm1269_vm6, %v3128_v8 }
 0x738   : > { %3337 = vrot.lane.b32.xlu2 %v6931_v55, %s4471_s28  ;;  %3345 = vrot.lane.b32.xlu1 %v6205_v27, %s4471_s28  ;;  %v6934_v27 = vld [vmem:[#allocation37_spill] sm:$0xff] }
 0x739   : > { %3341 = vrot.lane.b32.xlu0 %v6932_v3, %s4471_s28  ;;  %v3626_v3 = vld [vmem:[#allocation3 + $0xd9] sm:$0xff] }
 0x73a   : > { %v3144_v6 = vpop.permute.xlu2 %3143 }
 0x73b   : > { %3217 = vst.msk [vmem:[#allocation4 + $0xb0] sm:$0xff] %vm1269_vm6, %v3144_v6  ;;  %v3130_v19 = vpop.permute.xlu0 %3129  ;;  %v3134_v1 = vpop.permute.xlu1 %3133  ;;  %v3433_v6 = vld [vmem:[#allocation3 + $0xc8] sm:$0xff] }
 0x73c   : > { %3210 = vst.msk [vmem:[#allocation4 + $0x78] sm:$0xff] %vm1269_vm6, %v3130_v19  ;;  %v3818_v19 = vld [vmem:[#allocation3 + $0xda] sm:$0xff] }
 0x73d   : > { %3212 = vst.msk [vmem:[#allocation4 + $0x88] sm:$0xff] %vm1269_vm6, %v3134_v1 }
 0x740   : > { %3343 = vrot.lane.b32.xlu2 %v6933_v33, %s4471_s28  ;;  %3351 = vrot.lane.b32.xlu1 %v6500_v34, %s4471_s28  ;;  %v3639_v33 = vld [vmem:[#allocation3 + $0x171] sm:$0xff] }
 0x741   : > { %3347 = vrot.lane.b32.xlu0 %v6934_v27, %s4471_s28  ;;  %v3447_v27 = vld [vmem:[#allocation3 + $0x170] sm:$0xff] }
 0x742   : > { %v3150_v58 = vpop.permute.xlu2 %3149 }
 0x743   : > { %3220 = vst.msk [vmem:[#allocation4 + $0xc8] sm:$0xff] %vm1269_vm6, %v3150_v58  ;;  %v3136_v51 = vpop.permute.xlu0 %3135  ;;  %v3140_v41 = vpop.permute.xlu1 %3139 }
 0x744   : > { %3213 = vst.msk [vmem:[#allocation4 + $0x90] sm:$0xff] %vm1269_vm6, %v3136_v51 }
 0x745   : > { %3215 = vst.msk [vmem:[#allocation4 + $0xa0] sm:$0xff] %vm1269_vm6, %v3140_v41 }
 0x748   : > { %3349 = vrot.lane.b32.xlu2 %v6935_v2, %s4471_s28  ;;  %3486 = vrot.lane.b32.xlu1 %v3421_v62, %s4472_s29  ;;  %v3625_v62 = vld [vmem:[#allocation3 + $0xc9] sm:$0xff] }
 0x749   : > { %3353 = vrot.lane.b32.xlu0 %v6511_v43, %s4471_s28  ;;  %s4337_s28 = sshll.u32 %s4531_s25, 3 }
 0x74a   : > { %v3156_v20 = vpop.permute.xlu2 %3155 }
 0x74b   : > { %3223 = vst.msk [vmem:[#allocation4 + $0xe0] sm:$0xff] %vm1269_vm6, %v3156_v20  ;;  %v3142_v21 = vpop.permute.xlu0 %3141  ;;  %v3146_v28 = vpop.permute.xlu1 %3145 }
 0x74c   : > { %3216 = vst.msk [vmem:[#allocation4 + $0xa8] sm:$0xff] %vm1269_vm6, %v3142_v21  ;;  %v3831_v21 = vld [vmem:[#allocation3 + $0x172] sm:$0xff] }
 0x74d   : > { %3218 = vst.msk [vmem:[#allocation4 + $0xb8] sm:$0xff] %vm1269_vm6, %v3146_v28  ;;  %v3816_v28 = vld [vmem:[#allocation3 + $0xc2] sm:$0xff] }
 0x750   : > { %3484 = vrot.lane.b32.xlu2 %v3420_v44, %s4472_s29  ;;  %3492 = vrot.lane.b32.xlu1 %v3424_v35, %s4472_s29  ;;  %v3624_v44 = vld [vmem:[#allocation3 + $0xc1] sm:$0xff] }
 0x751   : > { %3488 = vrot.lane.b32.xlu0 %v3422_v60, %s4472_s29 }
 0x752   : > { %v3162_v37 = vpop.permute.xlu2 %3161 }
 0x753   : > { %v3148_v49 = vpop.permute.xlu0 %3147  ;;  %3226 = vst.msk [vmem:[#allocation4 + $0xf8] sm:$0xff] %vm1269_vm6, %v3162_v37  ;;  %v3152_v22 = vpop.permute.xlu1 %3151  ;;  %v3638_v37 = vld [vmem:[#allocation3 + $0x169] sm:$0xff] }
 0x754   : > { %3219 = vst.msk [vmem:[#allocation4 + $0xc0] sm:$0xff] %vm1269_vm6, %v3148_v49  ;;  %v3623_v49 = vld [vmem:[#allocation3 + $0xb1] sm:$0xff] }
 0x755   : > { %3221 = vst.msk [vmem:[#allocation4 + $0xd0] sm:$0xff] %vm1269_vm6, %v3152_v22  ;;  %v3830_v22 = vld [vmem:[#allocation3 + $0x16a] sm:$0xff] }
 0x758   : > { %3490 = vrot.lane.b32.xlu2 %v3423_v32, %s4472_s29  ;;  %3498 = vrot.lane.b32.xlu1 %v5922_v38, %s4472_s29 }
 0x759   : > { %3494 = vrot.lane.b32.xlu0 %v3425_v14, %s4472_s29 }
 0x75a   : > { %v3296_v46 = vpop.permute.xlu2 %3295 }
 0x75b   : > { %v3154_v23 = vpop.permute.xlu0 %3153  ;;  %3389 = vst.msk [vmem:[#allocation4 + $0x10] sm:$0xff] %vm1462_vm7, %v3296_v46  ;;  %v3158_v16 = vpop.permute.xlu1 %3157 }
 0x75c   : > { %3222 = vst.msk [vmem:[#allocation4 + $0xd8] sm:$0xff] %vm1269_vm6, %v3154_v23  ;;  %v3445_v23 = vld [vmem:[#allocation3 + $0x158] sm:$0xff] }
 0x75d   : > { %3224 = vst.msk [vmem:[#allocation4 + $0xe8] sm:$0xff] %vm1269_vm6, %v3158_v16  ;;  %v3829_v16 = vld [vmem:[#allocation3 + $0x15a] sm:$0xff] }
 0x760   : > { %3496 = vrot.lane.b32.xlu2 %v3426_v0, %s4472_s29  ;;  %3504 = vrot.lane.b32.xlu1 %v5811_v13, %s4472_s29  ;;  %v3637_v0 = vld [vmem:[#allocation3 + $0x159] sm:$0xff] }
 0x761   : > { %3500 = vrot.lane.b32.xlu0 %v5936_v57, %s4472_s29 }
 0x762   : > { %v3302_v38 = vpop.permute.xlu2 %3301 }
 0x763   : > { %v3160_v61 = vpop.permute.xlu0 %3159  ;;  %3392 = vst.msk [vmem:[#allocation4 + $0x28] sm:$0xff] %vm1462_vm7, %v3302_v38  ;;  %v3292_v15 = vpop.permute.xlu1 %3291 }
 0x764   : > { %3225 = vst.msk [vmem:[#allocation4 + $0xf0] sm:$0xff] %vm1269_vm6, %v3160_v61 }
 0x765   : > { %3387 = vst.msk [vmem:[#allocation4] sm:$0xff] %vm1462_vm7, %v3292_v15 }
 0x768   : > { %3502 = vrot.lane.b32.xlu2 %v3429_v29, %s4472_s29  ;;  %3546 = vrot.lane.b32.xlu1 %v3451_v40, %s4472_s29  ;;  %v3815_v40 = vld [vmem:[#allocation3 + $0xb2] sm:$0xff] }
 0x769   : > { %3506 = vrot.lane.b32.xlu0 %v5826_v9, %s4472_s29  ;;  %v3636_v29 = vld [vmem:[#allocation3 + $0x151] sm:$0xff] }
 0x76a   : > { %v3308_v13 = vpop.permute.xlu2 %3307 }
 0x76b   : > { %v3294_v57 = vpop.permute.xlu0 %3293  ;;  %3395 = vst.msk [vmem:[#allocation4 + $0x40] sm:$0xff] %vm1462_vm7, %v3308_v13  ;;  %v3298_v47 = vpop.permute.xlu1 %3297  ;;  %v3444_v13 = vld [vmem:[#allocation3 + $0x150] sm:$0xff] }
 0x76c   : > { %3388 = vst.msk [vmem:[#allocation4 + $0x8] sm:$0xff] %vm1462_vm7, %v3294_v57 }
 0x76d   : > { %3390 = vst.msk [vmem:[#allocation4 + $0x18] sm:$0xff] %vm1462_vm7, %v3298_v47 }
 0x770   : > { %3508 = vrot.lane.b32.xlu2 %v3432_v5, %s4472_s29  ;;  %3544 = vrot.lane.b32.xlu1 %v3450_v26, %s4472_s29  ;;  %v3443_v5 = vld [vmem:[#allocation3 + $0x140] sm:$0xff] }
 0x771   : > { %3738 = vrot.lane.b32.xlu0 %v3643_v25, %s4473_s9  ;;  %v3622_v25 = vld [vmem:[#allocation3 + $0xa9] sm:$0xff] }
 0x772   : > { %v3314_v18 = vpop.permute.xlu2 %3313 }
 0x773   : > { %v3300_v9 = vpop.permute.xlu0 %3299  ;;  %3398 = vst.msk [vmem:[#allocation4 + $0x58] sm:$0xff] %vm1462_vm7, %v3314_v18  ;;  %v3304_v54 = vpop.permute.xlu1 %3303  ;;  %v3814_v18 = vld [vmem:[#allocation3 + $0xaa] sm:$0xff] }
 0x774   : > { %3391 = vst.msk [vmem:[#allocation4 + $0x20] sm:$0xff] %vm1462_vm7, %v3300_v9 }
 0x775   : > { %3393 = vst.msk [vmem:[#allocation4 + $0x30] sm:$0xff] %vm1462_vm7, %v3304_v54 }
 0x778   : > { %3930 = vrot.lane.b32.xlu2 %v3835_v7, %s4474_s10  ;;  %3514 = vrot.lane.b32.xlu1 %v3435_v50, %s4472_s29  ;;  %v3813_v50 = vld [vmem:[#allocation3 + $0x9a] sm:$0xff] }
 0x779   : > { %3736 = vrot.lane.b32.xlu0 %v3642_v42, %s4473_s9  ;;  %v3828_v42 = vld [vmem:[#allocation3 + $0x152] sm:$0xff] }
 0x77a   : > { %v3320_v30 = vpop.permute.xlu2 %3319 }
 0x77b   : > { %v3306_v11 = vpop.permute.xlu0 %3305  ;;  %3401 = vst.msk [vmem:[#allocation4 + $0x70] sm:$0xff] %vm1462_vm7, %v3320_v30  ;;  %v3310_v59 = vpop.permute.xlu1 %3309  ;;  %v3621_v30 = vld [vmem:[#allocation3 + $0x99] sm:$0xff] }
 0x77c   : > { %3394 = vst.msk [vmem:[#allocation4 + $0x38] sm:$0xff] %vm1462_vm7, %v3306_v11 }
 0x77d   : > { %3396 = vst.msk [vmem:[#allocation4 + $0x48] sm:$0xff] %vm1462_vm7, %v3310_v59 }
 0x780   : > { %3928 = vrot.lane.b32.xlu2 %v3834_v36, %s4474_s10  ;;  %3734 = vrot.lane.b32.xlu1 %v6417_v17, %s4473_s9 }
 0x781   : > { %3542 = vrot.lane.b32.xlu0 %v6303_v48, %s4472_s29 }
 0x782   : > { %v3326_v24 = vpop.permute.xlu2 %3325 }
 0x783   : > { %v3312_v12 = vpop.permute.xlu0 %3311  ;;  %3404 = vst.msk [vmem:[#allocation4 + $0x88] sm:$0xff] %vm1462_vm7, %v3326_v24  ;;  %v3316_v45 = vpop.permute.xlu1 %3315  ;;  %v3635_v24 = vld [vmem:[#allocation3 + $0x141] sm:$0xff] }
 0x784   : > { %3397 = vst.msk [vmem:[#allocation4 + $0x50] sm:$0xff] %vm1462_vm7, %v3312_v12  ;;  %v3620_v12 = vld [vmem:[#allocation3 + $0x91] sm:$0xff] }
 0x785   : > { %3399 = vst.msk [vmem:[#allocation4 + $0x60] sm:$0xff] %vm1462_vm7, %v3316_v45  ;;  %v3827_v45 = vld [vmem:[#allocation3 + $0x142] sm:$0xff] }
 0x788   : > { %3706 = vrot.lane.b32.xlu2 %v3627_v31, %s4473_s9  ;;  %3512 = vrot.lane.b32.xlu1 %v3434_v63, %s4472_s29 }
 0x789   : > { %3898 = vrot.lane.b32.xlu0 %v3819_v10, %s4474_s10 }
 0x78a   : > { %v3332_v17 = vpop.permute.xlu2 %3331 }
 0x78b   : > { %v3318_v48 = vpop.permute.xlu0 %3317  ;;  %3407 = vst.msk [vmem:[#allocation4 + $0xa0] sm:$0xff] %vm1462_vm7, %v3332_v17  ;;  %v3322_v56 = vpop.permute.xlu1 %3321  ;;  %v3442_v17 = vld [vmem:[#allocation3 + $0x138] sm:$0xff] }
 0x78c   : > { %3400 = vst.msk [vmem:[#allocation4 + $0x68] sm:$0xff] %vm1462_vm7, %v3318_v48  ;;  %v3826_v48 = vld [vmem:[#allocation3 + $0x13a] sm:$0xff] }
 0x78d   : > { %3402 = vst.msk [vmem:[#allocation4 + $0x78] sm:$0xff] %vm1462_vm7, %v3322_v56  ;;  %v3634_v56 = vld [vmem:[#allocation3 + $0x139] sm:$0xff] }
 0x790   : > { %3926 = vrot.lane.b32.xlu2 %v6511_v43, %s4474_s10  ;;  %3732 = vrot.lane.b32.xlu1 %v6408_v52, %s4473_s9  ;;  %v3817_v43 = vld [vmem:[#allocation3 + $0xca] sm:$0xff] }
 0x791   : > { %3540 = vrot.lane.b32.xlu0 %v6314_v4, %s4472_s29 }
 0x792   : > { %v3338_v53 = vpop.permute.xlu2 %3337 }
 0x793   : > { %v3324_v8 = vpop.permute.xlu0 %3323  ;;  %3410 = vst.msk [vmem:[#allocation4 + $0xb8] sm:$0xff] %vm1462_vm7, %v3338_v53  ;;  %v3328_v55 = vpop.permute.xlu1 %3327 }
 0x794   : > { %3403 = vst.msk [vmem:[#allocation4 + $0x80] sm:$0xff] %vm1462_vm7, %v3324_v8 }
 0x795   : > { %3405 = vst.msk [vmem:[#allocation4 + $0x90] sm:$0xff] %vm1462_vm7, %v3328_v55 }
 0x798   : > { %3704 = vrot.lane.b32.xlu2 %v3626_v3, %s4473_s9  ;;  %3510 = vrot.lane.b32.xlu1 %v3433_v6, %s4472_s29  ;;  %v3812_v6 = vld [vmem:[#allocation3 + $0x92] sm:$0xff] }
 0x799   : > { %3896 = vrot.lane.b32.xlu0 %v3818_v19, %s4474_s10  ;;  %v3633_v19 = vld [vmem:[#allocation3 + $0x129] sm:$0xff] }
 0x79a   : > { %v3344_v52 = vpop.permute.xlu2 %3343 }
 0x79b   : > { %v3330_v4 = vpop.permute.xlu0 %3329  ;;  %3413 = vst.msk [vmem:[#allocation4 + $0xd0] sm:$0xff] %vm1462_vm7, %v3344_v52  ;;  %v3334_v1 = vpop.permute.xlu1 %3333  ;;  %v3441_v52 = vld [vmem:[#allocation3 + $0x128] sm:$0xff] }
 0x79c   : > { %3406 = vst.msk [vmem:[#allocation4 + $0x98] sm:$0xff] %vm1462_vm7, %v3330_v4 }
 0x79d   : > { %3408 = vst.msk [vmem:[#allocation4 + $0xa8] sm:$0xff] %vm1462_vm7, %v3334_v1 }
 0x7a0   : > { %3924 = vrot.lane.b32.xlu2 %v6500_v34, %s4474_s10  ;;  %3730 = vrot.lane.b32.xlu1 %v3639_v33, %s4473_s9 }
 0x7a1   : > { %3538 = vrot.lane.b32.xlu0 %v3447_v27, %s4472_s29 }
 0x7a2   : > { %v3350_v58 = vpop.permute.xlu2 %3349 }
 0x7a3   : > { %v3336_v51 = vpop.permute.xlu0 %3335  ;;  %3416 = vst.msk [vmem:[#allocation4 + $0xe8] sm:$0xff] %vm1462_vm7, %v3350_v58  ;;  %v3340_v41 = vpop.permute.xlu1 %3339  ;;  %v3619_v58 = vld [vmem:[#allocation3 + $0x81] sm:$0xff] }
 0x7a4   : > { %3409 = vst.msk [vmem:[#allocation4 + $0xb0] sm:$0xff] %vm1462_vm7, %v3336_v51  ;;  %v3440_v51 = vld [vmem:[#allocation3 + $0x120] sm:$0xff] }
 0x7a5   : > { %3411 = vst.msk [vmem:[#allocation4 + $0xc0] sm:$0xff] %vm1462_vm7, %v3340_v41  ;;  %v3811_v41 = vld [vmem:[#allocation3 + $0x82] sm:$0xff] }
 0x7a8   : > { %3702 = vrot.lane.b32.xlu2 %v3625_v62, %s4473_s9  ;;  %3536 = vrot.lane.b32.xlu1 %v6053_v39, %s4472_s29 }
 0x7a9   : > { %3894 = vrot.lane.b32.xlu0 %v3817_v43, %s4474_s10 }
 0x7aa   : > { %v3485_v34 = vpop.permute.xlu2 %3484 }
 0x7ab   : > { %v3342_v2 = vpop.permute.xlu0 %3341  ;;  %3580 = vst.msk [vmem:[#allocation4] sm:$0xff] %vm1656_vm8, %v3485_v34  ;;  %v3346_v20 = vpop.permute.xlu1 %3345 }
 0x7ac   : > { %3412 = vst.msk [vmem:[#allocation4 + $0xc8] sm:$0xff] %vm1462_vm7, %v3342_v2 }
 0x7ad   : > { %3414 = vst.msk [vmem:[#allocation4 + $0xd8] sm:$0xff] %vm1462_vm7, %v3346_v20  ;;  %v3825_v20 = vld [vmem:[#allocation3 + $0x12a] sm:$0xff] }
 0x7b0   : > { %3922 = vrot.lane.b32.xlu2 %v3831_v21, %s4474_s10  ;;  %3892 = vrot.lane.b32.xlu1 %v3816_v28, %s4474_s10  ;;  %v3810_v21 = vld [vmem:[#allocation3 + $0x7a] sm:$0xff] }
 0x7b1   : > { %3700 = vrot.lane.b32.xlu0 %v3624_v44, %s4473_s9  ;;  %v3618_v28 = vld [vmem:[#allocation3 + $0x79] sm:$0xff] }
 0x7b2   : > { %v3491_v39 = vpop.permute.xlu2 %3490 }
 0x7b3   : > { %v3348_v35 = vpop.permute.xlu0 %3347  ;;  %3583 = vst.msk [vmem:[#allocation4 + $0x18] sm:$0xff] %vm1656_vm8, %v3491_v39  ;;  %v3352_v60 = vpop.permute.xlu1 %3351 }
 0x7b4   : > { %3415 = vst.msk [vmem:[#allocation4 + $0xe0] sm:$0xff] %vm1462_vm7, %v3348_v35 }
 0x7b5   : > { %3417 = vst.msk [vmem:[#allocation4 + $0xf0] sm:$0xff] %vm1462_vm7, %v3352_v60 }
 0x7b8   : > { %3728 = vrot.lane.b32.xlu2 %v3638_v37, %s4473_s9  ;;  %3698 = vrot.lane.b32.xlu1 %v3623_v49, %s4473_s9  ;;  %v3632_v37 = vld [vmem:[#allocation3 + $0x121] sm:$0xff]  ;;  %v3617_v49 = vld [vmem:[#allocation3 + $0x69] sm:$0xff] }
 0x7b9   : > { %3920 = vrot.lane.b32.xlu0 %v3830_v22, %s4474_s10  ;;  %v3824_v22 = vld [vmem:[#allocation3 + $0x122] sm:$0xff] }
 0x7ba   : > { %v3497_v32 = vpop.permute.xlu2 %3496 }
 0x7bb   : > { %v3354_v14 = vpop.permute.xlu0 %3353  ;;  %3586 = vst.msk [vmem:[#allocation4 + $0x30] sm:$0xff] %vm1656_vm8, %v3497_v32  ;;  %v3487_v46 = vpop.permute.xlu1 %3486 }
 0x7bc   : > { %3418 = vst.msk [vmem:[#allocation4 + $0xf8] sm:$0xff] %vm1462_vm7, %v3354_v14 }
 0x7bd   : > { %3581 = vst.msk [vmem:[#allocation4 + $0x8] sm:$0xff] %vm1656_vm8, %v3487_v46 }
 0x7c0   : > { %3534 = vrot.lane.b32.xlu2 %v3445_v23, %s4472_s29  ;;  %3918 = vrot.lane.b32.xlu1 %v3829_v16, %s4474_s10  ;;  %v3439_v16 = vld [vmem:[#allocation3 + $0x110] sm:$0xff] }
 0x7c1   : > { %3726 = vrot.lane.b32.xlu0 %v3637_v0, %s4473_s9  ;;  %v3823_v0 = vld [vmem:[#allocation3 + $0x112] sm:$0xff] }
 0x7c2   : > { %v3503_v38 = vpop.permute.xlu2 %3502 }
 0x7c3   : > { %v3489_v61 = vpop.permute.xlu0 %3488  ;;  %3589 = vst.msk [vmem:[#allocation4 + $0x48] sm:$0xff] %vm1656_vm8, %v3503_v38  ;;  %v3493_v15 = vpop.permute.xlu1 %3492  ;;  %v3631_v38 = vld [vmem:[#allocation3 + $0x111] sm:$0xff] }
 0x7c4   : > { %3582 = vst.msk [vmem:[#allocation4 + $0x10] sm:$0xff] %vm1656_vm8, %v3489_v61 }
 0x7c5   : > { %3584 = vst.msk [vmem:[#allocation4 + $0x20] sm:$0xff] %vm1656_vm8, %v3493_v15 }
 0x7c8   : > { %3890 = vrot.lane.b32.xlu2 %v3815_v40, %s4474_s10  ;;  %3724 = vrot.lane.b32.xlu1 %v3636_v29, %s4473_s9 }
 0x7c9   : > { %3532 = vrot.lane.b32.xlu0 %v3444_v13, %s4472_s29  ;;  %v3809_v13 = vld [vmem:[#allocation3 + $0x6a] sm:$0xff] }
 0x7ca   : > { %v3509_v57 = vpop.permute.xlu2 %3508 }
 0x7cb   : > { %v3495_v47 = vpop.permute.xlu0 %3494  ;;  %3592 = vst.msk [vmem:[#allocation4 + $0x60] sm:$0xff] %vm1656_vm8, %v3509_v57  ;;  %v3499_v26 = vpop.permute.xlu1 %3498  ;;  %v3630_v57 = vld [vmem:[#allocation3 + $0x109] sm:$0xff] }
 0x7cc   : > { %3585 = vst.msk [vmem:[#allocation4 + $0x28] sm:$0xff] %vm1656_vm8, %v3495_v47  ;;  %v3438_v47 = vld [vmem:[#allocation3 + $0x108] sm:$0xff] }
 0x7cd   : > { %3587 = vst.msk [vmem:[#allocation4 + $0x38] sm:$0xff] %vm1656_vm8, %v3499_v26 }
 0x7d0   : > { %3696 = vrot.lane.b32.xlu2 %v3622_v25, %s4473_s9  ;;  %3530 = vrot.lane.b32.xlu1 %v3443_v5, %s4472_s29 }
 0x7d1   : > { %3888 = vrot.lane.b32.xlu0 %v3814_v18, %s4474_s10 }
 0x7d2   : > { %v3931_v9 = vpop.permute.xlu2 %3930 }
 0x7d3   : > { %v3501_v54 = vpop.permute.xlu0 %3500  ;;  %v3505_v7 = vpop.permute.xlu1 %3504 }
 0x7d4   : > { %3588 = vst.msk [vmem:[#allocation4 + $0x40] sm:$0xff] %vm1656_vm8, %v3501_v54  ;;  %v3437_v54 = vld [vmem:[#allocation3 + $0xf8] sm:$0xff] }
 0x7d5   : > { %3590 = vst.msk [vmem:[#allocation4 + $0x50] sm:$0xff] %vm1656_vm8, %v3505_v7  ;;  %v3808_v7 = vld [vmem:[#allocation3 + $0x62] sm:$0xff] }
 0x7d8   : > { %3916 = vrot.lane.b32.xlu2 %v3828_v42, %s4474_s10  ;;  %3886 = vrot.lane.b32.xlu1 %v3813_v50, %s4474_s10 }
 0x7d9   : > { %3694 = vrot.lane.b32.xlu0 %v3621_v30, %s4473_s9 }
 0x7da   : > { %v3929_v11 = vpop.permute.xlu2 %3928 }
 0x7db   : > { %v3507_v59 = vpop.permute.xlu0 %3506  ;;  %v3547_v36 = vpop.permute.xlu1 %3546 }
 0x7dc   : > { %3591 = vst.msk [vmem:[#allocation4 + $0x58] sm:$0xff] %vm1656_vm8, %v3507_v59  ;;  %v3822_v59 = vld [vmem:[#allocation3 + $0x10a] sm:$0xff] }
 0x7dd   : > { %3611 = vst.msk [vmem:[#allocation4 + $0xf8] sm:$0xff] %vm1656_vm8, %v3547_v36  ;;  %v3807_v36 = vld [vmem:[#allocation3 + $0x52] sm:$0xff] }
 0x7e0   : > { %3722 = vrot.lane.b32.xlu2 %v3635_v24, %s4473_s9  ;;  %3692 = vrot.lane.b32.xlu1 %v3620_v12, %s4473_s9  ;;  %v3615_v24 = vld [vmem:[#allocation3 + $0x51] sm:$0xff] }
 0x7e1   : > { %3914 = vrot.lane.b32.xlu0 %v3827_v45, %s4474_s10 }
 0x7e2   : > { %v3707_v31 = vpop.permute.xlu2 %3706 }
 0x7e3   : > { %v3739_v63 = vpop.permute.xlu0 %3738  ;;  %v3545_v10 = vpop.permute.xlu1 %3544 }
 0x7e4   : > { %3803 = vst.msk [vmem:[#allocation4 + $0xf8] sm:$0xff] %vm1849_vm9, %v3739_v63 }
 0x7e5   : > { %3995 = vst.msk [vmem:[#allocation4 + $0xf8] sm:$0xff] %vm2042_vm10, %v3931_v9  ;;  %v3616_v9 = vld [vmem:[#allocation3 + $0x61] sm:$0xff] }
 0x7e6   : > { %3610 = vst.msk [vmem:[#allocation4 + $0xf0] sm:$0xff] %vm1656_vm8, %v3545_v10  ;;  %v3629_v10 = vld [vmem:[#allocation3 + $0xf9] sm:$0xff] }
 0x7e8   : > { %3528 = vrot.lane.b32.xlu2 %v3442_v17, %s4472_s29  ;;  %3912 = vrot.lane.b32.xlu1 %v3826_v48, %s4474_s10  ;;  %v3614_v17 = vld [vmem:[#allocation3 + $0x49] sm:$0xff]  ;;  %v3821_v48 = vld [vmem:[#allocation3 + $0xfa] sm:$0xff] }
 0x7e9   : > { %3720 = vrot.lane.b32.xlu0 %v3634_v56, %s4473_s9 }
 0x7ea   : > { %v3927_v53 = vpop.permute.xlu2 %3926 }
 0x7eb   : > { %v3737_v8 = vpop.permute.xlu0 %3736  ;;  %v3515_v55 = vpop.permute.xlu1 %3514 }
 0x7ec   : > { %3802 = vst.msk [vmem:[#allocation4 + $0xf0] sm:$0xff] %vm1849_vm9, %v3737_v8  ;;  %v4028_v3 = vld [vmem:[#allocation4 + $0xf8] sm:$0xff] }
 0x7ed   : > { %3994 = vst.msk [vmem:[#allocation4 + $0xf0] sm:$0xff] %vm2042_vm10, %v3929_v11  ;;  %4314 = vmatpush.xpose.msk.msra.mxu2 %vm2116_vm12, %v4028_v3 }
 0x7ee   : > { %3595 = vst.msk [vmem:[#allocation4 + $0x78] sm:$0xff] %vm1656_vm8, %v3515_v55 }
 0x7ef   : > { %3787 = vst.msk [vmem:[#allocation4 + $0x78] sm:$0xff] %vm1849_vm9, %v3707_v31 }
 0x7f0   : > { %3884 = vrot.lane.b32.xlu2 %v3812_v6, %s4474_s10  ;;  %3718 = vrot.lane.b32.xlu1 %v3633_v19, %s4473_s9  ;;  %v3436_v6 = vld [vmem:[#allocation3 + $0xf0] sm:$0xff] }
 0x7f1   : > { %3526 = vrot.lane.b32.xlu0 %v3441_v52, %s4472_s29  ;;  %v3820_v19 = vld [vmem:[#allocation3 + $0xf2] sm:$0xff] }
 0x7f2   : > { %v3705_v4 = vpop.permute.xlu2 %3704  ;;  %v3628_v52 = vld [vmem:[#allocation3 + $0xf1] sm:$0xff] }
 0x7f3   : > { %v3543_v1 = vpop.permute.xlu0 %3542  ;;  %v3735_v33 = vpop.permute.xlu1 %3734 }
 0x7f4   : > { %3609 = vst.msk [vmem:[#allocation4 + $0xe8] sm:$0xff] %vm1656_vm8, %v3543_v1  ;;  %v4027_v27 = vld [vmem:[#allocation4 + $0xf0] sm:$0xff] }
 0x7f5   : > { %3801 = vst.msk [vmem:[#allocation4 + $0xe8] sm:$0xff] %vm1849_vm9, %v3735_v33  ;;  %4315 = vmatpush.xpose.msk.msra.mxu2 %vm2116_vm12, %v4027_v27 }
 0x7f6   : > { %3993 = vst.msk [vmem:[#allocation4 + $0xe8] sm:$0xff] %vm2042_vm10, %v3927_v53 }
 0x7f8   : > { %3690 = vrot.lane.b32.xlu2 %v3619_v58, %s4473_s9  ;;  %3524 = vrot.lane.b32.xlu1 %v3440_v51, %s4472_s29  ;;  %v3806_v58 = vld [vmem:[#allocation3 + $0x4a] sm:$0xff] }
 0x7f9   : > { %3882 = vrot.lane.b32.xlu0 %v3811_v41, %s4474_s10  ;;  %v3612_v51 = vld [vmem:[#allocation3 + $0x31] sm:$0xff]  ;;  %v3613_v41 = vld [vmem:[#allocation3 + $0x39] sm:$0xff] }
 0x7fa   : > { %v3925_v62 = vpop.permute.xlu2 %3924 }
 0x7fb   : > { %v3899_v43 = vpop.permute.xlu0 %3898  ;;  %v3513_v34 = vpop.permute.xlu1 %3512 }
 0x7fc   : > { %3979 = vst.msk [vmem:[#allocation4 + $0x78] sm:$0xff] %vm2042_vm10, %v3899_v43 }
 0x7fd   : > { %3594 = vst.msk [vmem:[#allocation4 + $0x70] sm:$0xff] %vm1656_vm8, %v3513_v34  ;;  %v4026_v2 = vld [vmem:[#allocation4 + $0xe8] sm:$0xff] }
 0x7fe   : > { %3786 = vst.msk [vmem:[#allocation4 + $0x70] sm:$0xff] %vm1849_vm9, %v3705_v4  ;;  %4316 = vmatpush.xpose.msk.msra.mxu2 %vm2116_vm12, %v4026_v2 }
 0x800   : > { %3910 = vrot.lane.b32.xlu2 %v3825_v20, %s4474_s10  ;;  %3880 = vrot.lane.b32.xlu1 %v3810_v21, %s4474_s10  ;;  %v3805_v20 = vld [vmem:[#allocation3 + $0x3a] sm:$0xff]  ;;  %v3804_v21 = vld [vmem:[#allocation3 + $0x32] sm:$0xff] }
 0x801   : > { %3688 = vrot.lane.b32.xlu0 %v3618_v28, %s4473_s9 }
 0x802   : > { %v3703_v44 = vpop.permute.xlu2 %3702 }
 0x803   : > { %v3541_v39 = vpop.permute.xlu0 %3540  ;;  %v3733_v35 = vpop.permute.xlu1 %3732  ;;  %v4012_v60 = vld [vmem:[#allocation4 + $0x78] sm:$0xff] }
 0x804   : > { %3608 = vst.msk [vmem:[#allocation4 + $0xe0] sm:$0xff] %vm1656_vm8, %v3541_v39  ;;  %4297 = vmatpush.xpose.msk.msrb.mxu1 %vm2116_vm12, %v4012_v60 }
 0x805   : > { %3800 = vst.msk [vmem:[#allocation4 + $0xe0] sm:$0xff] %vm1849_vm9, %v3733_v35 }
 0x806   : > { %3992 = vst.msk [vmem:[#allocation4 + $0xe0] sm:$0xff] %vm2042_vm10, %v3925_v62 }
 0x808   : > { %3716 = vrot.lane.b32.xlu2 %v3632_v37, %s4473_s9  ;;  %3686 = vrot.lane.b32.xlu1 %v3617_v49, %s4473_s9 }
 0x809   : > { %3908 = vrot.lane.b32.xlu0 %v3824_v22, %s4474_s10 }
 0x80a   : > { %v3923_v32 = vpop.permute.xlu2 %3922 }
 0x80b   : > { %v3897_v14 = vpop.permute.xlu0 %3896  ;;  %v3511_v46 = vpop.permute.xlu1 %3510 }
 0x80c   : > { %3978 = vst.msk [vmem:[#allocation4 + $0x70] sm:$0xff] %vm2042_vm10, %v3897_v14 }
 0x80d   : > { %3593 = vst.msk [vmem:[#allocation4 + $0x68] sm:$0xff] %vm1656_vm8, %v3511_v46  ;;  %v4025_v23 = vld [vmem:[#allocation4 + $0xe0] sm:$0xff] }
 0x80e   : > { %3785 = vst.msk [vmem:[#allocation4 + $0x68] sm:$0xff] %vm1849_vm9, %v3703_v44  ;;  %4317 = vmatpush.xpose.msk.msra.mxu2 %vm2116_vm12, %v4025_v23 }
 0x810   : > { %3522 = vrot.lane.b32.xlu2 %v3439_v16, %s4472_s29  ;;  %3906 = vrot.lane.b32.xlu1 %v3823_v0, %s4474_s10 }
 0x811   : > { %3714 = vrot.lane.b32.xlu0 %v3631_v38, %s4473_s9 }
 0x812   : > { %v3729_v61 = vpop.permute.xlu2 %3728 }
 0x813   : > { %v3539_v15 = vpop.permute.xlu0 %3538  ;;  %v3731_v40 = vpop.permute.xlu1 %3730  ;;  %v4011_v29 = vld [vmem:[#allocation4 + $0x70] sm:$0xff] }
 0x814   : > { %3607 = vst.msk [vmem:[#allocation4 + $0xd8] sm:$0xff] %vm1656_vm8, %v3539_v15  ;;  %4298 = vmatpush.xpose.msk.msrb.mxu1 %vm2116_vm12, %v4011_v29 }
 0x815   : > { %3799 = vst.msk [vmem:[#allocation4 + $0xd8] sm:$0xff] %vm1849_vm9, %v3731_v40 }
 0x816   : > { %3991 = vst.msk [vmem:[#allocation4 + $0xd8] sm:$0xff] %vm2042_vm10, %v3923_v32 }
 0x818   : > { %3878 = vrot.lane.b32.xlu2 %v3809_v13, %s4474_s10  ;;  %3712 = vrot.lane.b32.xlu1 %v3630_v57, %s4473_s9 }
 0x819   : > { %3520 = vrot.lane.b32.xlu0 %v3438_v47, %s4472_s29 }
 0x81a   : > { %v3535_v26 = vpop.permute.xlu2 %3534 }
 0x81b   : > { %v3895_v25 = vpop.permute.xlu0 %3894  ;;  %3605 = vst.msk [vmem:[#allocation4 + $0xc8] sm:$0xff] %vm1656_vm8, %v3535_v26  ;;  %v3537_v5 = vpop.permute.xlu1 %3536 }
 0x81c   : > { %3977 = vst.msk [vmem:[#allocation4 + $0x68] sm:$0xff] %vm2042_vm10, %v3895_v25 }
 0x81d   : > { %3606 = vst.msk [vmem:[#allocation4 + $0xd0] sm:$0xff] %vm1656_vm8, %v3537_v5  ;;  %v4024_v18 = vld [vmem:[#allocation4 + $0xd8] sm:$0xff] }
 0x81e   : > { %3798 = vst.msk [vmem:[#allocation4 + $0xd0] sm:$0xff] %vm1849_vm9, %v3729_v61  ;;  %4318 = vmatpush.xpose.msk.msra.mxu2 %vm2116_vm12, %v4024_v18 }
 0x820   : > { %3684 = vrot.lane.b32.xlu2 %v3616_v9, %s4473_s9  ;;  %3518 = vrot.lane.b32.xlu1 %v3437_v54, %s4472_s29 }
 0x821   : > { %3876 = vrot.lane.b32.xlu0 %v3808_v7, %s4474_s10 }
 0x822   : > { %v3891_v42 = vpop.permute.xlu2 %3890 }
 0x823   : > { %v3701_v50 = vpop.permute.xlu0 %3700  ;;  %v3893_v30 = vpop.permute.xlu1 %3892  ;;  %v4010_v11 = vld [vmem:[#allocation4 + $0x68] sm:$0xff] }
 0x824   : > { %3784 = vst.msk [vmem:[#allocation4 + $0x60] sm:$0xff] %vm1849_vm9, %v3701_v50  ;;  %4299 = vmatpush.xpose.msk.msrb.mxu1 %vm2116_vm12, %v4010_v11 }
 0x825   : > { %3976 = vst.msk [vmem:[#allocation4 + $0x60] sm:$0xff] %vm2042_vm10, %v3893_v30 }
 0x828   : > { %3904 = vrot.lane.b32.xlu2 %v3822_v59, %s4474_s10  ;;  %3874 = vrot.lane.b32.xlu1 %v3807_v36, %s4474_s10 }
 0x829   : > { %3682 = vrot.lane.b32.xlu0 %v3615_v24, %s4473_s9 }
 0x82a   : > { %v3697_v12 = vpop.permute.xlu2 %3696 }
 0x82b   : > { %v3921_v45 = vpop.permute.xlu0 %3920  ;;  %3782 = vst.msk [vmem:[#allocation4 + $0x50] sm:$0xff] %vm1849_vm9, %v3697_v12  ;;  %v3699_v31 = vpop.permute.xlu1 %3698 }
 0x82c   : > { %3990 = vst.msk [vmem:[#allocation4 + $0xd0] sm:$0xff] %vm2042_vm10, %v3921_v45  ;;  %v4009_v63 = vld [vmem:[#allocation4 + $0x60] sm:$0xff] }
 0x82d   : > { %3783 = vst.msk [vmem:[#allocation4 + $0x58] sm:$0xff] %vm1849_vm9, %v3699_v31  ;;  %4300 = vmatpush.xpose.msk.msrb.mxu1 %vm2116_vm12, %v4009_v63 }
 0x82e   : > { %3975 = vst.msk [vmem:[#allocation4 + $0x58] sm:$0xff] %vm2042_vm10, %v3891_v42 }
 0x830   : > { %3710 = vrot.lane.b32.xlu2 %v3629_v10, %s4473_s9  ;;  %3680 = vrot.lane.b32.xlu1 %v3614_v17, %s4473_s9 }
 0x831   : > { %3902 = vrot.lane.b32.xlu0 %v3821_v48, %s4474_s10 }
 0x832   : > { %v3917_v56 = vpop.permute.xlu2 %3916 }
 0x833   : > { %v3727_v53 = vpop.permute.xlu0 %3726  ;;  %v3919_v8 = vpop.permute.xlu1 %3918  ;;  %v4023_v55 = vld [vmem:[#allocation4 + $0xd0] sm:$0xff] }
 0x834   : > { %3797 = vst.msk [vmem:[#allocation4 + $0xc8] sm:$0xff] %vm1849_vm9, %v3727_v53  ;;  %4319 = vmatpush.xpose.msk.msra.mxu2 %vm2116_vm12, %v4023_v55 }
 0x835   : > { %3989 = vst.msk [vmem:[#allocation4 + $0xc8] sm:$0xff] %vm2042_vm10, %v3919_v8  ;;  %v4008_v3 = vld [vmem:[#allocation4 + $0x58] sm:$0xff] }
 0x836   : > { %4301 = vmatpush.xpose.msk.msrb.mxu1 %vm2116_vm12, %v4008_v3 }
 0x838   : > { %3516 = vrot.lane.b32.xlu2 %v3436_v6, %s4472_s29  ;;  %3900 = vrot.lane.b32.xlu1 %v3820_v19, %s4474_s10 }
 0x839   : > { %3708 = vrot.lane.b32.xlu0 %v3628_v52, %s4473_s9 }
 0x83a   : > { %v3723_v4 = vpop.permute.xlu2 %3722 }
 0x83b   : > { %v3533_v1 = vpop.permute.xlu0 %3532  ;;  %v3725_v33 = vpop.permute.xlu1 %3724 }
 0x83c   : > { %3604 = vst.msk [vmem:[#allocation4 + $0xc0] sm:$0xff] %vm1656_vm8, %v3533_v1  ;;  %v4022_v27 = vld [vmem:[#allocation4 + $0xc8] sm:$0xff] }
 0x83d   : > { %3796 = vst.msk [vmem:[#allocation4 + $0xc0] sm:$0xff] %vm1849_vm9, %v3725_v33  ;;  %4320 = vmatpush.xpose.msk.msra.mxu2 %vm2116_vm12, %v4022_v27 }
 0x83e   : > { %3988 = vst.msk [vmem:[#allocation4 + $0xc0] sm:$0xff] %vm2042_vm10, %v3917_v56 }
 0x840   : > { %3872 = vrot.lane.b32.xlu2 %v3806_v58, %s4474_s10  ;;  %3676 = vrot.lane.b32.xlu1 %v3612_v51, %s4473_s9 }
 0x841   : > { %3678 = vrot.lane.b32.xlu0 %v3613_v41, %s4473_s9  ;;  %v3996_v41 = vld [vmem:[%s6836_s5] sm:$0xf] }
 0x842   : > { %v3529_v62 = vpop.permute.xlu2 %3528 }
 0x843   : > { %v3889_v43 = vpop.permute.xlu0 %3888  ;;  %3602 = vst.msk [vmem:[#allocation4 + $0xb0] sm:$0xff] %vm1656_vm8, %v3529_v62  ;;  %v3531_v34 = vpop.permute.xlu1 %3530 }
 0x844   : > { %3974 = vst.msk [vmem:[#allocation4 + $0x50] sm:$0xff] %vm2042_vm10, %v3889_v43 }
 0x845   : > { %3603 = vst.msk [vmem:[#allocation4 + $0xb8] sm:$0xff] %vm1656_vm8, %v3531_v34  ;;  %v4021_v2 = vld [vmem:[#allocation4 + $0xc0] sm:$0xff] }
 0x846   : > { %3795 = vst.msk [vmem:[#allocation4 + $0xb8] sm:$0xff] %vm1849_vm9, %v3723_v4  ;;  %4321 = vmatpush.xpose.msk.msra.mxu2 %vm2116_vm12, %v4021_v2  ;;  %v4033_v2 = vld.sshfl [vmem:[#allocation1 + $0x8] sm:$0xff pattern:$0x75316420] }
 0x848   : > { %3870 = vrot.lane.b32.xlu2 %v3805_v20, %s4474_s10 }
 0x849   : > { %3868 = vrot.lane.b32.xlu0 %v3804_v21, %s4474_s10  ;;  %s4193_s10 = scalar_lea.hbm %s6837_s6, %s4337_s28 }
 0x84a   : > { %v3885_v28 = vpop.permute.xlu2 %3884  ;;  %s4197_s11 = sshll.u32 %s4193_s10, 4  ;;  %s4198_s11 = int_to_ptr.hbm [resolvable:$true] %s4197_s11 }
 0x84b   : > { %v3695_v44 = vpop.permute.xlu0 %3694  ;;  %v3887_v39 = vpop.permute.xlu1 %3886  ;;  %v4007_v35 = vld [vmem:[#allocation4 + $0x50] sm:$0xff]  ;;  %s4414_s25 = sshra.s32 %s4198_s11, 4  ;;  %s4415_s25 = int_to_ptr.hbm [resolvable:$true] %s4414_s25 }
 0x84c   : > { %3781 = vst.msk [vmem:[#allocation4 + $0x48] sm:$0xff] %vm1849_vm9, %v3695_v44  ;;  %4302 = vmatpush.xpose.msk.msrb.mxu1 %vm2116_vm12, %v4007_v35  ;;  %s4416_s13 = scalar_lea.hbm %s4415_s25, 8  ;;  %p4421_p0 = scmp.lt.s32.totalorder %s4415_s25, %s6837_s6 }
 0x84d   : > { %3973 = vst.msk [vmem:[#allocation4 + $0x48] sm:$0xff] %vm2042_vm10, %v3887_v39  ;;  %p4417_p11 = scmp.ne.s32.totalorder %s4415_s25, %s4416_s13  ;;  %p4422_p1 = scmp.lt.s32.totalorder %s4420_s18, %s4416_s13 }
 0x84f   : > { %p4418_p12 = pnand %p4417_p11, %p4548_p5  ;;  %p4423_p2 = por %p4422_p1, %p4421_p0 }
 0x851   : > { %p4419_p13 = pneg %p4418_p12 }
 0x852   : > { %v3691_v60 = vpop.permute.xlu2 %3690 }
 0x853   : > { %v3915_v37 = vpop.permute.xlu0 %3914  ;;  %3779 = vst.msk [vmem:[#allocation4 + $0x38] sm:$0xff] %vm1849_vm9, %v3691_v60  ;;  %v3693_v49 = vpop.permute.xlu1 %3692  ;;  %p4424_p3 = pnand %p4423_p2, %p4419_p13 }
 0x854   : > { %3987 = vst.msk [vmem:[#allocation4 + $0xb8] sm:$0xff] %vm2042_vm10, %v3915_v37  ;;  %v4006_v22 = vld [vmem:[#allocation4 + $0x48] sm:$0xff] }
 0x855   : > { %3780 = vst.msk [vmem:[#allocation4 + $0x40] sm:$0xff] %vm1849_vm9, %v3693_v49  ;;  %4303 = vmatpush.xpose.msk.msrb.mxu1 %vm2116_vm12, %v4006_v22 }
 0x856   : > { %3972 = vst.msk [vmem:[#allocation4 + $0x40] sm:$0xff] %vm2042_vm10, %v3885_v28  ;;  %v4032_v28 = vld.sshfl [vmem:[#allocation1] sm:$0xff pattern:$0x75316420] }
 0x85a   : > { %v3911_v32 = vpop.permute.xlu2 %3910 }
 0x85b   : > { %v3721_v14 = vpop.permute.xlu0 %3720  ;;  %v3913_v46 = vpop.permute.xlu1 %3912  ;;  %v4020_v23 = vld [vmem:[#allocation4 + $0xb8] sm:$0xff] }
 0x85c   : > { %3794 = vst.msk [vmem:[#allocation4 + $0xb0] sm:$0xff] %vm1849_vm9, %v3721_v14  ;;  %4322 = vmatpush.xpose.msk.msra.mxu2 %vm2116_vm12, %v4020_v23 }
 0x85d   : > { %3986 = vst.msk [vmem:[#allocation4 + $0xb0] sm:$0xff] %vm2042_vm10, %v3913_v46  ;;  %v4005_v16 = vld [vmem:[#allocation4 + $0x40] sm:$0xff] }
 0x85e   : > { %4304 = vmatpush.xpose.msk.msrb.mxu1 %vm2116_vm12, %v4005_v16 }
 0x862   : > { %v3717_v0 = vpop.permute.xlu2 %3716 }
 0x863   : > { %v3527_v38 = vpop.permute.xlu0 %3526  ;;  %v3719_v61 = vpop.permute.xlu1 %3718 }
 0x864   : > { %3601 = vst.msk [vmem:[#allocation4 + $0xa8] sm:$0xff] %vm1656_vm8, %v3527_v38  ;;  %v4019_v15 = vld [vmem:[#allocation4 + $0xb0] sm:$0xff] }
 0x865   : > { %3793 = vst.msk [vmem:[#allocation4 + $0xa8] sm:$0xff] %vm1849_vm9, %v3719_v61  ;;  %4323 = vmatpush.xpose.msk.msra.mxu2 %vm2116_vm12, %v4019_v15 }
 0x866   : > { %3985 = vst.msk [vmem:[#allocation4 + $0xa8] sm:$0xff] %vm2042_vm10, %v3911_v32 }
 0x86a   : > { %v3523_v40 = vpop.permute.xlu2 %3522 }
 0x86b   : > { %v3883_v29 = vpop.permute.xlu0 %3882  ;;  %3599 = vst.msk [vmem:[#allocation4 + $0x98] sm:$0xff] %vm1656_vm8, %v3523_v40  ;;  %v3525_v13 = vpop.permute.xlu1 %3524 }
 0x86c   : > { %3971 = vst.msk [vmem:[#allocation4 + $0x38] sm:$0xff] %vm2042_vm10, %v3883_v29 }
 0x86d   : > { %3600 = vst.msk [vmem:[#allocation4 + $0xa0] sm:$0xff] %vm1656_vm8, %v3525_v13  ;;  %v4018_v57 = vld [vmem:[#allocation4 + $0xa8] sm:$0xff] }
 0x86e   : > { %3792 = vst.msk [vmem:[#allocation4 + $0xa0] sm:$0xff] %vm1849_vm9, %v3717_v0  ;;  %4324 = vmatpush.xpose.msk.msra.mxu2 %vm2116_vm12, %v4018_v57 }
 0x872   : > { %v3879_v47 = vpop.permute.xlu2 %3878 }
 0x873   : > { %v3689_v26 = vpop.permute.xlu0 %3688  ;;  %v3881_v25 = vpop.permute.xlu1 %3880  ;;  %v4004_v5 = vld [vmem:[#allocation4 + $0x38] sm:$0xff] }
 0x874   : > { %3778 = vst.msk [vmem:[#allocation4 + $0x30] sm:$0xff] %vm1849_vm9, %v3689_v26  ;;  %4305 = vmatpush.xpose.msk.msrb.mxu1 %vm2116_vm12, %v4004_v5 }
 0x875   : > { %3970 = vst.msk [vmem:[#allocation4 + $0x30] sm:$0xff] %vm2042_vm10, %v3881_v25 }
 0x87a   : > { %v3685_v18 = vpop.permute.xlu2 %3684 }
 0x87b   : > { %v3909_v9 = vpop.permute.xlu0 %3908  ;;  %3776 = vst.msk [vmem:[#allocation4 + $0x20] sm:$0xff] %vm1849_vm9, %v3685_v18  ;;  %v3687_v54 = vpop.permute.xlu1 %3686 }
 0x87c   : > { %3984 = vst.msk [vmem:[#allocation4 + $0xa0] sm:$0xff] %vm2042_vm10, %v3909_v9  ;;  %v4003_v7 = vld [vmem:[#allocation4 + $0x30] sm:$0xff] }
 0x87d   : > { %3777 = vst.msk [vmem:[#allocation4 + $0x28] sm:$0xff] %vm1849_vm9, %v3687_v54  ;;  %4306 = vmatpush.xpose.msk.msrb.mxu1 %vm2116_vm12, %v4003_v7 }
 0x87e   : > { %3969 = vst.msk [vmem:[#allocation4 + $0x28] sm:$0xff] %vm2042_vm10, %v3879_v47 }
 0x882   : > { %v3905_v42 = vpop.permute.xlu2 %3904 }
 0x883   : > { %v3715_v50 = vpop.permute.xlu0 %3714  ;;  %v3907_v30 = vpop.permute.xlu1 %3906  ;;  %v4017_v11 = vld [vmem:[#allocation4 + $0xa0] sm:$0xff] }
 0x884   : > { %3791 = vst.msk [vmem:[#allocation4 + $0x98] sm:$0xff] %vm1849_vm9, %v3715_v50  ;;  %4325 = vmatpush.xpose.msk.msra.mxu2 %vm2116_vm12, %v4017_v11 }
 0x885   : > { %3983 = vst.msk [vmem:[#allocation4 + $0x98] sm:$0xff] %vm2042_vm10, %v3907_v30  ;;  %v4002_v59 = vld [vmem:[#allocation4 + $0x28] sm:$0xff] }
 0x886   : > { %4307 = vmatpush.xpose.msk.msrb.mxu1 %vm2116_vm12, %v4002_v59 }
 0x88a   : > { %v3711_v36 = vpop.permute.xlu2 %3710 }
 0x88b   : > { %v3521_v24 = vpop.permute.xlu0 %3520  ;;  %v3713_v12 = vpop.permute.xlu1 %3712 }
 0x88c   : > { %3598 = vst.msk [vmem:[#allocation4 + $0x90] sm:$0xff] %vm1656_vm8, %v3521_v24  ;;  %v4016_v45 = vld [vmem:[#allocation4 + $0x98] sm:$0xff] }
 0x88d   : > { %3790 = vst.msk [vmem:[#allocation4 + $0x90] sm:$0xff] %vm1849_vm9, %v3713_v12  ;;  %4326 = vmatpush.xpose.msk.msra.mxu2 %vm2116_vm12, %v4016_v45 }
 0x88e   : > { %3982 = vst.msk [vmem:[#allocation4 + $0x90] sm:$0xff] %vm2042_vm10, %v3905_v42 }
 0x892   : > { %v3517_v31 = vpop.permute.xlu2 %3516 }
 0x893   : > { %v3877_v63 = vpop.permute.xlu0 %3876  ;;  %3596 = vst.msk [vmem:[#allocation4 + $0x80] sm:$0xff] %vm1656_vm8, %v3517_v31  ;;  %v3519_v10 = vpop.permute.xlu1 %3518 }
 0x894   : > { %3968 = vst.msk [vmem:[#allocation4 + $0x20] sm:$0xff] %vm2042_vm10, %v3877_v63 }
 0x895   : > { %3597 = vst.msk [vmem:[#allocation4 + $0x88] sm:$0xff] %vm1656_vm8, %v3519_v10  ;;  %v4015_v17 = vld [vmem:[#allocation4 + $0x90] sm:$0xff] }
 0x896   : > { %3789 = vst.msk [vmem:[#allocation4 + $0x88] sm:$0xff] %vm1849_vm9, %v3711_v36  ;;  %4327 = vmatpush.xpose.msk.msra.mxu2 %vm2116_vm12, %v4015_v17 }
 0x89a   : > { %v3873_v6 = vpop.permute.xlu2 %3872 }
 0x89b   : > { %v3683_v48 = vpop.permute.xlu0 %3682  ;;  %v3875_v56 = vpop.permute.xlu1 %3874  ;;  %v4001_v53 = vld [vmem:[#allocation4 + $0x20] sm:$0xff] }
 0x89c   : > { %3775 = vst.msk [vmem:[#allocation4 + $0x18] sm:$0xff] %vm1849_vm9, %v3683_v48  ;;  %4308 = vmatpush.xpose.msk.msrb.mxu1 %vm2116_vm12, %v4001_v53 }
 0x89d   : > { %3967 = vst.msk [vmem:[#allocation4 + $0x18] sm:$0xff] %vm2042_vm10, %v3875_v56 }
 0x8a2   : > { %v3871_v58 = vpop.permute.xlu2 %3870 }
 0x8a3   : > { %v3903_v8 = vpop.permute.xlu0 %3902  ;;  %v3681_v55 = vpop.permute.xlu1 %3680 }
 0x8a4   : > { %3981 = vst.msk [vmem:[#allocation4 + $0x88] sm:$0xff] %vm2042_vm10, %v3903_v8  ;;  %v4000_v3 = vld [vmem:[#allocation4 + $0x18] sm:$0xff] }
 0x8a5   : > { %3774 = vst.msk [vmem:[#allocation4 + $0x10] sm:$0xff] %vm1849_vm9, %v3681_v55  ;;  %4309 = vmatpush.xpose.msk.msrb.mxu1 %vm2116_vm12, %v4000_v3 }
 0x8a6   : > { %3966 = vst.msk [vmem:[#allocation4 + $0x10] sm:$0xff] %vm2042_vm10, %v3873_v6 }
 0x8ab   : > { %v3709_v19 = vpop.permute.xlu0 %3708  ;;  %v3901_v52 = vpop.permute.xlu1 %3900  ;;  %v4014_v4 = vld [vmem:[#allocation4 + $0x88] sm:$0xff] }
 0x8ac   : > { %3788 = vst.msk [vmem:[#allocation4 + $0x80] sm:$0xff] %vm1849_vm9, %v3709_v19  ;;  %4328 = vmatpush.xpose.msk.msra.mxu2 %vm2116_vm12, %v4014_v4 }
 0x8ad   : > { %3980 = vst.msk [vmem:[#allocation4 + $0x80] sm:$0xff] %vm2042_vm10, %v3901_v52  ;;  %v3999_v1 = vld [vmem:[#allocation4 + $0x10] sm:$0xff] }
 0x8ae   : > { %4310 = vmatpush.xpose.msk.msrb.mxu1 %vm2116_vm12, %v3999_v1 }
 0x8b3   : > { %v3679_v33 = vpop.permute.xlu0 %3678  ;;  %v3677_v27 = vpop.permute.xlu1 %3676 }
 0x8b4   : > { %3773 = vst.msk [vmem:[#allocation4 + $0x8] sm:$0xff] %vm1849_vm9, %v3679_v33  ;;  %v4013_v51 = vld [vmem:[#allocation4 + $0x80] sm:$0xff] }
 0x8b5   : > { %3965 = vst.msk [vmem:[#allocation4 + $0x8] sm:$0xff] %vm2042_vm10, %v3871_v58  ;;  %4329 = vmatpush.xpose.msk.msra.mxu2 %vm2116_vm12, %v4013_v51 }
 0x8b6   : > { %3772 = vst.msk [vmem:[#allocation4] sm:$0xff] %vm1849_vm9, %v3677_v27 }
 0x8b8   : > { %4330 = vmatmul.msk.f32.vlgmr.msra.gmra.mxu2 %vm2116_vm12, %v3996_v41 }
 0x8bb   : > { %v3869_v62 = vpop.permute.xlu0 %3868 }
 0x8bc   : > { %3964 = vst.msk [vmem:[#allocation4] sm:$0xff] %vm2042_vm10, %v3869_v62  ;;  %v3998_v43 = vld [vmem:[#allocation4 + $0x8] sm:$0xff] }
 0x8bd   : > { %4311 = vmatpush.xpose.msk.msrb.mxu1 %vm2116_vm12, %v3998_v43 }
 0x8c3   : > { %v3997_v34 = vld [vmem:[#allocation4] sm:$0xff] }
 0x8c4   : > { %4312 = vmatpush.xpose.msk.msrb.mxu1 %vm2116_vm12, %v3997_v34 }
 0x8c7   : > { %4313 = vmatmul.msk.f32.vlgmr.msrb.gmra.mxu1 %vm2116_vm12, %v3996_v41 }
 0x93b   : > { %v4172_v20 = vpop.f32.mrf.mxu2 }
 0x93c   : > { %v4173_v21 = vadd.f32 %v4172_v20, %v4033_v2 }
 0x93e   : > { %v4177_v44 = vrot.slane %v4173_v21, 4 }
 0x944   : > { %v4152_v39 = vpop.f32.mrf.mxu1 }
 0x945   : > { %v4153_v35 = vadd.f32 %v4152_v39, %v4032_v28 }
 0x947   : > { %v4178_v60 = vsel %vm2213_vm11, %v4153_v35, %v4177_v44 }
 0x948   : > { %4180 = vst [vmem:[%s244_s16] sm:$0xff] %v4178_v60 }
 0x949   : > { %4427 = shalt.err (!%p4424_p3)
}
 0x94a   : > { %4348 = dma.vmem_to_hbm [thread:$0]  (%p4548_p5), %s4196_s17, 128, %s4198_s11, %s4182_s12  }
 0x94b PF: > { %p4354_p4 = scmp.ge.s32.totalorder %s4462_s24, 2  ;;  %s4209_s20 = sand.u32 1, %s4450_s21  }
 0x94c   : > { %s4210_s28 = scalar_lea.sflag [#allocation6], %s4209_s20 }
 0x94d   : > { %p4351_p7 = pnand %p4354_p4, %p4552_p6 }
 0x94f   : > { %p4352_p8 = pneg %p4351_p7 }
 0x951   : > { %4445 = dma.done.wait (%p4352_p8), %s4210_s28, 128  }
 0x952   : > { %4447 = vsyncadd (%p4352_p8), %s4210_s28, 4294967168  ;;  %p16_p9 = scmp.ge.s32.totalorder %s4535_s27, 4   ;;  %s6936_s21 = smov %s4454_s22 }
 0x953   : > { %s6937_s22 = smov %s4458_s23  ;;  %s6938_s23 = smov %s4546_s30 }
 0x954   : > { %s6939_s24 = smov %s4535_s27  ;;  %18 = sbr.rel (!%p16_p9) target bundleno = 3 (0x3), region = 85 }
 0x959   :  { %4216 = vsyncpa [#allocation6], 1 }
 0x95a   :  { %4218 = vsyncpa [#allocation6 + $0x1], 1 }

</bundles_post_ra>
